<compile_context>
chip_gen: v5e
topology: v5e:2x2
jax: 0.10.0
libtpu: 0.0.40
codegen_flags: <defaults>
</compile_context>

<pallas_src>
import functools

import jax
import jax.numpy as jnp
from jax.experimental import pallas as pl
from jax.experimental.pallas import tpu as pltpu


def _ncuts_pair_kernel(i_blk_ref, j_blk_ref,      # scalar-prefetch tables (SMEM)
                       qi_ref, qj_ref,            # (T, 8) bf16, (8, T) bf16
                       ni_ref, nj_ref,            # (T, 1) f32,  (1, T) f32
                       pi_ref, pja_ref,           # (T, K) f32,  (T, K+1) bf16
                       num_ref, den_ref,          # (1, K) f32 resident accumulators
                       *, two_inv_sp2, k_classes):
    g = pl.program_id(0)

    @pl.when(g == 0)
    def _():
        num_ref[...] = jnp.zeros_like(num_ref)
        den_ref[...] = jnp.zeros_like(den_ref)

    bi = i_blk_ref[g]
    bj = j_blk_ref[g]
    off_diag = (bi != bj).astype(jnp.float32)      # 0. on diagonal tiles, 1. off
    fac = 1.0 + off_diag                           # mirror multiplicity for num

    # MXU: Gram matrix of the scaled features -> both Gaussian exponents at once.
    #   w_ij = exp(2*inv_sp2 * (u_i . u_j) - |u_i|^2/sp^2 - |u_j|^2/sp^2)
    s = jnp.dot(qi_ref[...], qj_ref[...], preferred_element_type=jnp.float32)
    w = jnp.exp(s * two_inv_sp2 - ni_ref[...] - nj_ref[...])        # (T, T) f32

    # MXU: W @ [prob_j | 1]  ->  [W p_j | row_sum(W)] in a single pass.
    wp_aug = jnp.dot(w.astype(jnp.bfloat16), pja_ref[...],
                     preferred_element_type=jnp.float32)            # (T, K+1)
    wp = wp_aug[:, :k_classes]                                      # (T, K)
    row_w = wp_aug[:, k_classes:k_classes + 1]                      # (T, 1)

    pi = pi_ref[...]                                                # (T, K) f32
    num_c = jnp.sum(pi * wp, axis=0, keepdims=True)                 # p_i^T W p_j
    den_r = jnp.sum(pi * row_w, axis=0, keepdims=True)              # row-side p^T W 1
    den_c = jnp.sum(wp, axis=0, keepdims=True)                      # mirrored col side

    num_ref[...] += fac * num_c
    den_ref[...] += den_r + off_diag * den_c


def soft_ncuts_loss_v1(patch, prob, k, *, std_position=1.0, std_intensity=3.0,
                       tile=512):
    """patch: (D, L, W) float; prob: (D, L, W, K) float; returns scalar f32 loss."""
    D, L, W = patch.shape
    n = D * L * W
    T = int(tile)
    assert T % 128 == 0, "tile must be a multiple of 128"
    # Centered coordinates must stay exactly representable in bf16 (half-integers).
    assert max(D, L, W) <= 256, "volume dims must be <= 256 per axis"

    n_pad = ((n + T - 1) // T) * T
    n_blocks = n_pad // T
    inv_sp2 = 1.0 / float(std_position) ** 2

    # Scaled feature vector u = [x, y, z, f*std_p/std_i] (coords centered so they
    # are exact half-integers in bf16). Then
    #   -(f_i-f_j)^2/std_i^2 - |p_i-p_j|^2/std_p^2
    #       = 2*inv_sp2*(u_i . u_j) - inv_sp2*|u_i|^2 - inv_sp2*|u_j|^2.
    gx, gy, gz = jnp.meshgrid(jnp.arange(D, dtype=jnp.float32),
                              jnp.arange(L, dtype=jnp.float32),
                              jnp.arange(W, dtype=jnp.float32),
                              indexing="ij")
    cx = gx.reshape(n) - (D - 1) / 2.0
    cy = gy.reshape(n) - (L - 1) / 2.0
    cz = gz.reshape(n) - (W - 1) / 2.0
    feat = patch.reshape(n).astype(jnp.float32)
    h = feat * (float(std_position) / float(std_intensity))
    q = jnp.stack([cx, cy, cz, h], axis=1)                                # (n, 4)
    q = jnp.concatenate([q, jnp.zeros((n, 4), jnp.float32)], axis=1)      # (n, 8)
    nrm = inv_sp2 * jnp.sum(q * q, axis=1)                                # (n,)
    prob2d = prob.reshape(n, k).astype(jnp.float32)                       # (n, K)

    # Padding so n need not divide the tile: padded voxels get a huge norm
    # (=> w = exp(-1e9) == 0) and zero probability -> contribute exactly 0.
    pad = n_pad - n
    q_rows = jnp.pad(q, ((0, pad), (0, 0))).astype(jnp.bfloat16)          # (n_pad, 8)
    q_cols = q_rows.T                                                     # (8, n_pad)
    nrm_p = jnp.pad(nrm, (0, pad), constant_values=1e9).astype(jnp.float32)
    nrm_rows = nrm_p.reshape(n_pad, 1)
    nrm_cols = nrm_p.reshape(1, n_pad)
    p_rows = jnp.pad(prob2d, ((0, pad), (0, 0)))                          # (n_pad, K)
    p_aug = jnp.concatenate(
        [p_rows, jnp.ones((n_pad, 1), jnp.float32)], axis=1).astype(jnp.bfloat16)

    # Upper-triangular tile-pair schedule (exploits symmetry of W).
    pairs = [(bi, bj) for bi in range(n_blocks) for bj in range(bi, n_blocks)]
    i_blk = jnp.asarray([p[0] for p in pairs], dtype=jnp.int32)
    j_blk = jnp.asarray([p[1] for p in pairs], dtype=jnp.int32)
    n_pairs = len(pairs)

    kernel = functools.partial(_ncuts_pair_kernel,
                               two_inv_sp2=float(2.0 * inv_sp2),
                               k_classes=int(k))

    num, den = pl.pallas_call(
        kernel,
        out_shape=(jax.ShapeDtypeStruct((1, k), jnp.float32),
                   jax.ShapeDtypeStruct((1, k), jnp.float32)),
        grid_spec=pltpu.PrefetchScalarGridSpec(
            num_scalar_prefetch=2,
            grid=(n_pairs,),
            in_specs=[
                pl.BlockSpec((T, 8), lambda g, ib, jb: (ib[g], 0)),      # u (i-side)
                pl.BlockSpec((8, T), lambda g, ib, jb: (0, jb[g])),      # u (j-side)
                pl.BlockSpec((T, 1), lambda g, ib, jb: (ib[g], 0)),      # |u_i|^2/sp^2
                pl.BlockSpec((1, T), lambda g, ib, jb: (0, jb[g])),      # |u_j|^2/sp^2
                pl.BlockSpec((T, k), lambda g, ib, jb: (ib[g], 0)),      # prob (i)
                pl.BlockSpec((T, k + 1), lambda g, ib, jb: (jb[g], 0)),  # [prob|1] (j)
            ],
            out_specs=[
                pl.BlockSpec((1, k), lambda g, ib, jb: (0, 0)),          # num acc
                pl.BlockSpec((1, k), lambda g, ib, jb: (0, 0)),          # den acc
            ],
        ),
        compiler_params=pltpu.CompilerParams(
            dimension_semantics=("arbitrary",),
            vmem_limit_bytes=48 * 1024 * 1024),
    )(i_blk, j_blk, q_rows, q_cols, nrm_rows, nrm_cols, p_rows, p_aug)

    # TODO(synk): v7x dual-TensorCore parallel accumulation (per-i-tile partial
    # outputs) is left out; the single resident accumulator keeps the 1-D grid
    # "arbitrary" on all generations.
    return jnp.float32(k) - jnp.sum(num[0] / den[0])


def reference_loss(patch, prob, k, std_position=1.0, std_intensity=3.0):
    """Dense pure-JAX reference matching SoftNCutsLoss_v1.forward."""
    D, L, W = patch.shape
    n = D * L * W
    f = patch.reshape(n).astype(jnp.float32)
    gx, gy, gz = jnp.meshgrid(jnp.arange(D, dtype=jnp.float32),
                              jnp.arange(L, dtype=jnp.float32),
                              jnp.arange(W, dtype=jnp.float32),
                              indexing="ij")
    coords = jnp.stack([gx.reshape(n), gy.reshape(n), gz.reshape(n)], axis=1)
    diff = coords[:, None, :] - coords[None, :, :]
    sq_dist = jnp.sum(diff * diff, axis=-1)
    intensity_w = jnp.exp(-jnp.square((f[:, None] - f[None, :]) / std_intensity))
    w = intensity_w * jnp.exp(-sq_dist / (std_position ** 2))
    p = prob.reshape(n, k).astype(jnp.float32)
    num = jnp.einsum("ik,ij,jk->k", p, w, p,
                     precision=jax.lax.Precision.HIGHEST)
    den = jnp.sum(p * jnp.sum(w, axis=1, keepdims=True), axis=0)
    return jnp.float32(k) - jnp.sum(num / den)


if __name__ == "__main__":
    key = jax.random.PRNGKey(0)
    # n = 5*16*16 = 1280 voxels (not a multiple of the 512 tile -> exercises the
    # padding/masking path), 4 classes.
    D, L, W, K = 5, 16, 16, 4
    k1, k2 = jax.random.split(key)
    patch = jax.random.uniform(k1, (D, L, W), dtype=jnp.float32)
    logits = jax.random.normal(k2, (D, L, W, K), dtype=jnp.float32)
    prob = jax.nn.softmax(logits, axis=-1)

    loss = jax.block_until_ready(soft_ncuts_loss_v1(patch, prob, K))
    ref = jax.block_until_ready(reference_loss(patch, prob, K))

    if not bool(jnp.isfinite(loss)):
        raise RuntimeError(f"non-finite loss: {loss}")
    if abs(float(loss) - float(ref)) > 1e-2 * max(1.0, abs(float(ref))):
        raise RuntimeError(f"mismatch: pallas={float(loss)} ref={float(ref)}")
    print("KERNEL_OK")
</pallas_src>

<mosaic_0001>
module attributes {stable_mosaic.version = 11 : i64} {
  func.func @_ncuts_pair_kernel(%arg0: i32, %arg1: memref<6xi32, #tpu.memory_space<smem>>, %arg2: memref<6xi32, #tpu.memory_space<smem>>, %arg3: memref<512x8xbf16, #tpu.memory_space<vmem>>, %arg4: memref<8x512xbf16, #tpu.memory_space<vmem>>, %arg5: memref<512x1xf32, #tpu.memory_space<vmem>>, %arg6: memref<1x512xf32, #tpu.memory_space<vmem>>, %arg7: memref<512x4xf32, #tpu.memory_space<vmem>>, %arg8: memref<512x5xbf16, #tpu.memory_space<vmem>>, %arg9: memref<1x4xf32, #tpu.memory_space<vmem>>, %arg10: memref<1x4xf32, #tpu.memory_space<vmem>>) attributes {dimension_semantics = [#tpu.dimension_semantics<arbitrary>], iteration_bounds = array<i64: 6>, scalar_prefetch = 2 : i64, scratch_operands = 0 : i64, tpu.core_type = #tpu.core_type<tc>, window_params = [{transform_indices = @transform_0, window_bounds = array<i64: 512, 8>}, {transform_indices = @transform_1, window_bounds = array<i64: 8, 512>}, {transform_indices = @transform_2, window_bounds = array<i64: 512, 1>}, {transform_indices = @transform_3, window_bounds = array<i64: 1, 512>}, {transform_indices = @transform_4, window_bounds = array<i64: 512, 4>}, {transform_indices = @transform_5, window_bounds = array<i64: 512, 5>}, {pipeline_mode = #tpu.pipeline_mode<synchronous>, transform_indices = @transform_6, window_bounds = array<i64: 1, 4>}, {pipeline_mode = #tpu.pipeline_mode<synchronous>, transform_indices = @transform_7, window_bounds = array<i64: 1, 4>}]} {
    %c0_i32 = arith.constant 0 : i32
    %0 = arith.cmpi eq, %arg0, %c0_i32 : i32
    %1 = arith.extui %0 : i1 to i32
    %c0_i32_0 = arith.constant 0 : i32
    %2 = arith.cmpi ne, %1, %c0_i32_0 : i32
    scf.if %2 {
      %cst_26 = arith.constant 0.000000e+00 : f32
      %49 = vector.broadcast %cst_26 : f32 to vector<1x4xf32>
      %c0_27 = arith.constant 0 : index
      %c0_28 = arith.constant 0 : index
      %50 = vector.load %arg9[%c0_27, %c0_28] : memref<1x4xf32, #tpu.memory_space<vmem>>, vector<1x4xf32>
      tpu.vector_store %arg9[%c0_27, %c0_28], %49 {strides = array<i32>} : memref<1x4xf32, #tpu.memory_space<vmem>>, vector<1x4xf32>,
      %cst_29 = arith.constant 0.000000e+00 : f32
      %51 = vector.broadcast %cst_29 : f32 to vector<1x4xf32>
      %c0_30 = arith.constant 0 : index
      %c0_31 = arith.constant 0 : index
      %52 = vector.load %arg10[%c0_30, %c0_31] : memref<1x4xf32, #tpu.memory_space<vmem>>, vector<1x4xf32>
      tpu.vector_store %arg10[%c0_30, %c0_31], %51 {strides = array<i32>} : memref<1x4xf32, #tpu.memory_space<vmem>>, vector<1x4xf32>,
    } else {
    }
    %3 = arith.index_cast %arg0 : i32 to index
    %4 = memref.load %arg1[%3] : memref<6xi32, #tpu.memory_space<smem>>
    %5 = arith.index_cast %arg0 : i32 to index
    %6 = memref.load %arg2[%5] : memref<6xi32, #tpu.memory_space<smem>>
    %7 = arith.cmpi ne, %4, %6 : i32
    %8 = arith.extui %7 : i1 to i32
    %9 = arith.sitofp %8 : i32 to f32
    %cst = arith.constant 1.000000e+00 : f32
    %10 = arith.addf %cst, %9 : f32
    %c0 = arith.constant 0 : index
    %c0_1 = arith.constant 0 : index
    %11 = vector.load %arg3[%c0, %c0_1] : memref<512x8xbf16, #tpu.memory_space<vmem>>, vector<512x8xbf16>
    %c0_2 = arith.constant 0 : index
    %c0_3 = arith.constant 0 : index
    %12 = vector.load %arg4[%c0_2, %c0_3] : memref<8x512xbf16, #tpu.memory_space<vmem>>, vector<8x512xbf16>
    %cst_4 = arith.constant dense<0.000000e+00> : vector<512x512xf32>
    %13 = tpu.matmul %11, %12, %cst_4 {dimension_numbers = #tpu.dot_dimension_numbers<[1], [0], [0], [1], [0, 0, 1, 1], [], []>} : vector<512x8xbf16>, vector<8x512xbf16>, vector<512x512xf32> -> vector<512x512xf32>
    %cst_5 = arith.constant 2.000000e+00 : f32
    %14 = vector.broadcast %cst_5 : f32 to vector<512x512xf32>
    %15 = arith.mulf %13, %14 : vector<512x512xf32>
    %c0_6 = arith.constant 0 : index
    %c0_7 = arith.constant 0 : index
    %16 = vector.load %arg5[%c0_6, %c0_7] : memref<512x1xf32, #tpu.memory_space<vmem>>, vector<512x1xf32>
    %17 = vector.broadcast %16 : vector<512x1xf32> to vector<512x512xf32>
    %18 = arith.subf %15, %17 : vector<512x512xf32>
    %c0_8 = arith.constant 0 : index
    %c0_9 = arith.constant 0 : index
    %19 = vector.load %arg6[%c0_8, %c0_9] : memref<1x512xf32, #tpu.memory_space<vmem>>, vector<1x512xf32>
    %20 = vector.broadcast %19 : vector<1x512xf32> to vector<512x512xf32>
    %21 = arith.subf %18, %20 : vector<512x512xf32>
    %22 = math.exp %21 : vector<512x512xf32>
    %23 = arith.truncf %22 : vector<512x512xf32> to vector<512x512xbf16>
    %c0_10 = arith.constant 0 : index
    %c0_11 = arith.constant 0 : index
    %24 = vector.load %arg8[%c0_10, %c0_11] : memref<512x5xbf16, #tpu.memory_space<vmem>>, vector<512x5xbf16>
    %cst_12 = arith.constant dense<0.000000e+00> : vector<512x5xf32>
    %25 = tpu.matmul %23, %24, %cst_12 {dimension_numbers = #tpu.dot_dimension_numbers<[1], [0], [0], [1], [0, 0, 1, 1], [], []>} : vector<512x512xbf16>, vector<512x5xbf16>, vector<512x5xf32> -> vector<512x5xf32>
    %26 = vector.extract_strided_slice %25 {offsets = [0, 0], sizes = [512, 4], strides = [1, 1]} : vector<512x5xf32> to vector<512x4xf32>
    %27 = vector.extract_strided_slice %25 {offsets = [0, 4], sizes = [512, 1], strides = [1, 1]} : vector<512x5xf32> to vector<512x1xf32>
    %c0_13 = arith.constant 0 : index
    %c0_14 = arith.constant 0 : index
    %28 = vector.load %arg7[%c0_13, %c0_14] : memref<512x4xf32, #tpu.memory_space<vmem>>, vector<512x4xf32>
    %29 = arith.mulf %28, %26 : vector<512x4xf32>
    %cst_15 = arith.constant dense<0.000000e+00> : vector<4xf32>
    %30 = vector.multi_reduction <add>, %29, %cst_15 [0] : vector<512x4xf32> to vector<4xf32>
    %31 = vector.shape_cast %30 : vector<4xf32> to vector<1x4xf32>
    %32 = vector.broadcast %27 : vector<512x1xf32> to vector<512x4xf32>
    %33 = arith.mulf %28, %32 : vector<512x4xf32>
    %cst_16 = arith.constant dense<0.000000e+00> : vector<4xf32>
    %34 = vector.multi_reduction <add>, %33, %cst_16 [0] : vector<512x4xf32> to vector<4xf32>
    %35 = vector.shape_cast %34 : vector<4xf32> to vector<1x4xf32>
    %cst_17 = arith.constant dense<0.000000e+00> : vector<4xf32>
    %36 = vector.multi_reduction <add>, %26, %cst_17 [0] : vector<512x4xf32> to vector<4xf32>
    %37 = vector.shape_cast %36 : vector<4xf32> to vector<1x4xf32>
    %c0_18 = arith.constant 0 : index
    %c0_19 = arith.constant 0 : index
    %38 = vector.load %arg9[%c0_18, %c0_19] : memref<1x4xf32, #tpu.memory_space<vmem>>, vector<1x4xf32>
    %39 = vector.broadcast %10 : f32 to vector<1x4xf32>
    %40 = arith.mulf %39, %31 : vector<1x4xf32>
    %41 = arith.addf %38, %40 : vector<1x4xf32>
    %c0_20 = arith.constant 0 : index
    %c0_21 = arith.constant 0 : index
    %42 = vector.load %arg9[%c0_20, %c0_21] : memref<1x4xf32, #tpu.memory_space<vmem>>, vector<1x4xf32>
    tpu.vector_store %arg9[%c0_20, %c0_21], %41 {strides = array<i32>} : memref<1x4xf32, #tpu.memory_space<vmem>>, vector<1x4xf32>,
    %c0_22 = arith.constant 0 : index
    %c0_23 = arith.constant 0 : index
    %43 = vector.load %arg10[%c0_22, %c0_23] : memref<1x4xf32, #tpu.memory_space<vmem>>, vector<1x4xf32>
    %44 = vector.broadcast %9 : f32 to vector<1x4xf32>
    %45 = arith.mulf %44, %37 : vector<1x4xf32>
    %46 = arith.addf %35, %45 : vector<1x4xf32>
    %47 = arith.addf %43, %46 : vector<1x4xf32>
    %c0_24 = arith.constant 0 : index
    %c0_25 = arith.constant 0 : index
    %48 = vector.load %arg10[%c0_24, %c0_25] : memref<1x4xf32, #tpu.memory_space<vmem>>, vector<1x4xf32>
    tpu.vector_store %arg10[%c0_24, %c0_25], %47 {strides = array<i32>} : memref<1x4xf32, #tpu.memory_space<vmem>>, vector<1x4xf32>,
    return
  }
  func.func @transform_0(%arg0: i32, %arg1: memref<6xi32, #tpu.memory_space<smem>>, %arg2: memref<6xi32, #tpu.memory_space<smem>>) -> (i32, i32) {
    %0 = arith.index_cast %arg0 : i32 to index
    %1 = memref.load %arg1[%0] : memref<6xi32, #tpu.memory_space<smem>>
    %c0_i32 = arith.constant 0 : i32
    %c0_i32_0 = arith.constant 0 : i32
    return %1, %c0_i32 : i32, i32
  }
  func.func @transform_1(%arg0: i32, %arg1: memref<6xi32, #tpu.memory_space<smem>>, %arg2: memref<6xi32, #tpu.memory_space<smem>>) -> (i32, i32) {
    %0 = arith.index_cast %arg0 : i32 to index
    %1 = memref.load %arg2[%0] : memref<6xi32, #tpu.memory_space<smem>>
    %c0_i32 = arith.constant 0 : i32
    %c0_i32_0 = arith.constant 0 : i32
    return %c0_i32, %1 : i32, i32
  }
  func.func @transform_2(%arg0: i32, %arg1: memref<6xi32, #tpu.memory_space<smem>>, %arg2: memref<6xi32, #tpu.memory_space<smem>>) -> (i32, i32) {
    %0 = arith.index_cast %arg0 : i32 to index
    %1 = memref.load %arg1[%0] : memref<6xi32, #tpu.memory_space<smem>>
    %c0_i32 = arith.constant 0 : i32
    %c0_i32_0 = arith.constant 0 : i32
    return %1, %c0_i32 : i32, i32
  }
  func.func @transform_3(%arg0: i32, %arg1: memref<6xi32, #tpu.memory_space<smem>>, %arg2: memref<6xi32, #tpu.memory_space<smem>>) -> (i32, i32) {
    %0 = arith.index_cast %arg0 : i32 to index
    %1 = memref.load %arg2[%0] : memref<6xi32, #tpu.memory_space<smem>>
    %c0_i32 = arith.constant 0 : i32
    %c0_i32_0 = arith.constant 0 : i32
    return %c0_i32, %1 : i32, i32
  }
  func.func @transform_4(%arg0: i32, %arg1: memref<6xi32, #tpu.memory_space<smem>>, %arg2: memref<6xi32, #tpu.memory_space<smem>>) -> (i32, i32) {
    %0 = arith.index_cast %arg0 : i32 to index
    %1 = memref.load %arg1[%0] : memref<6xi32, #tpu.memory_space<smem>>
    %c0_i32 = arith.constant 0 : i32
    %c0_i32_0 = arith.constant 0 : i32
    return %1, %c0_i32 : i32, i32
  }
  func.func @transform_5(%arg0: i32, %arg1: memref<6xi32, #tpu.memory_space<smem>>, %arg2: memref<6xi32, #tpu.memory_space<smem>>) -> (i32, i32) {
    %0 = arith.index_cast %arg0 : i32 to index
    %1 = memref.load %arg2[%0] : memref<6xi32, #tpu.memory_space<smem>>
    %c0_i32 = arith.constant 0 : i32
    %c0_i32_0 = arith.constant 0 : i32
    return %1, %c0_i32 : i32, i32
  }
  func.func @transform_6(%arg0: i32, %arg1: memref<6xi32, #tpu.memory_space<smem>>, %arg2: memref<6xi32, #tpu.memory_space<smem>>) -> (i32, i32) {
    %c0_i32 = arith.constant 0 : i32
    %c0_i32_0 = arith.constant 0 : i32
    %c0_i32_1 = arith.constant 0 : i32
    return %c0_i32, %c0_i32_0 : i32, i32
  }
  func.func @transform_7(%arg0: i32, %arg1: memref<6xi32, #tpu.memory_space<smem>>, %arg2: memref<6xi32, #tpu.memory_space<smem>>) -> (i32, i32) {
    %c0_i32 = arith.constant 0 : i32
    %c0_i32_0 = arith.constant 0 : i32
    %c0_i32_1 = arith.constant 0 : i32
    return %c0_i32, %c0_i32_0 : i32, i32
  }
}

</mosaic_0001>

<bundles_post_ra>
// kernel: tpu_custom_call.1
= control target key start
LH: loop header
LB: loop body
LE: loop exit
PB: predicated region body
PF: predicated region fallthrough
CT: control target
= control target key end

     0   :  { %s6407_s15 = smov [#allocation3]   ;;  %s6408_s16 = smov [#allocation4]   ;;  %s8863_s0 = inlined_call_operand.vmem [shape: s32[6], index: 0, kind: input, shape index: {}]   ;;  %s8864_s2 = inlined_call_operand.vmem [shape: bf16[1536,8], index: 2, kind: input, shape index: {}]   ;;  %s8865_s3 = inlined_call_operand.vmem [shape: bf16[8,1536], index: 3, kind: input, shape index: {}]   ;;  %s8866_s4 = inlined_call_operand.vmem [shape: f32[1536,1], index: 4, kind: input, shape index: {}]   ;;  %s8867_s5 = inlined_call_operand.vmem [shape: f32[1,1536], index: 5, kind: input, shape index: {}]   ;;  %s8868_s6 = inlined_call_operand.vmem [shape: f32[1536,4], index: 6, kind: input, shape index: {}]   ;;  %s8869_s7 = inlined_call_operand.vmem [shape: bf16[1536,5], index: 7, kind: input, shape index: {}]   ;;  %s8870_s8 = inlined_call_operand.hbm [shape: f32[1,4], index: 8, kind: output, shape index: {0}]   ;;  %s8871_s9 = inlined_call_operand.hbm [shape: f32[1,4], index: 9, kind: output, shape index: {1}]   ;;  %s8872_s1 = inlined_call_operand.vmem [shape: s32[6], index: 1, kind: input, shape index: {}]  }
   0x1   :  { %s16_s11 = sshll.u32 %s8863_s0, 4  ;;  %s21_s14 = sshll.u32 %s8872_s1, 4  ;;  %s17_s11 = int_to_ptr.vmem [resolvable:$true] %s16_s11  ;;  %s22_s14 = int_to_ptr.vmem [resolvable:$true] %s21_s14 }
   0x2   :  { %19 = dma.vmem_to_smem %s17_s11, 16, %s6407_s15, [#allocation2] }
   0x3   :  { %24 = dma.vmem_to_smem %s22_s14, 16, %s6408_s16, [#allocation2] }
   0x4   :  { %6393 = dma.done.wait [#allocation2], 32 }
   0x5   :  { %6394 = vsyncadd [#allocation2], 4294967264 }
   0x6   :  { %27 = sfence }
   0x7   :  { %28 = vsyncpa [#allocation6], 0 }
   0x8   :  { %29 = vsyncpa [#allocation8], 0  ;;  %s6470_s17 = smov 0  }
   0x9 LB: > { %s6476_s0 = sadd.s32 4294967295, %s6405_s17   ;;  %p5256_p0 = scmp.ge.s32.totalorder %s6405_s17, 1  ;;  %s6405_s17 = sphi %s6470_s17, %s35_s17  }
   0xa   : > { %p326_p1 = scmp.lt.s32.totalorder %s6405_s17, 7 }
   0xc   : > { %p327_p2 = pnand %p5256_p0, %p326_p1 }
   0xe   : > { %330 = sbr.rel (%p327_p2) target bundleno = 1345 (0x541), region = 44 }
  0x13   : > { %s383_s1 = sld [smem:[#allocation3 + %s6476_s0]]  ;;  %p5268_p9 = scmp.ne.s32.totalorder %s6476_s0, 0 }
  0x14   : > { %s391_s18 = sld [smem:[#allocation4 + %s6476_s0]] }
  0x15   : > { %s399_s19 = sld [smem:[#allocation3 + %s6476_s0]] }
  0x16   : > { %s407_s20 = sld [smem:[#allocation4 + %s6476_s0]] }
  0x17   : > { %s414_s21 = sld [smem:[#allocation3 + %s6476_s0]] }
  0x18   : > { %s422_s23 = sld [smem:[#allocation4 + %s6476_s0]] }
  0x19   : > { %s5257_s22 = sshll.u32 %s383_s1, 6 }
  0x1a   : > { %p385_p3 = scmp.lt.s32.totalorder %s5257_s22, 191  ;;  %s5259_s24 = sshll.u32 %s391_s18, 2 }
  0x1b   : > { %p393_p4 = scmp.lt.s32.totalorder %s5259_s24, 11  ;;  %s5261_s25 = sshll.u32 %s399_s19, 6 }
  0x1c   : > { %s9557_s22 = smov (!%p385_p3, %s5257_s22), 191  ;;  %p401_p5 = scmp.lt.s32.totalorder %s5261_s25, 191 }
  0x1d   : > { %s9559_s24 = smov (!%p393_p4, %s5259_s24), 11  ;;  %s5258_s26 = sshll.u32 %s9557_s22, 2 }
  0x1e   : > { %s6489_s29 = scalar_lea.vmem %s8864_s2, %s5258_s26  ;;  %s5260_s30 = sshll.u32 %s9559_s24, 2 }
  0x1f   : > { %s396_s12 = scalar_lea.vmem %s8865_s3, %s5260_s30  ;;  %s5263_s13 = sshll.u32 %s407_s20, 2 }
  0x20   : > { %s9561_s25 = smov (!%p401_p5, %s5261_s25), 191  ;;  %p409_p6 = scmp.lt.s32.totalorder %s5263_s13, 11 }
  0x21   : > { %s5264_s14 = sshll.u32 %s414_s21, 6  ;;  %s5262_s15 = sshll.u32 %s9561_s25, 3 }
  0x22   : > { %p416_p7 = scmp.lt.s32.totalorder %s5264_s14, 191  ;;  %s6497_s18 = scalar_lea.vmem %s8866_s4, %s5262_s15 }
  0x23   : > { %s5266_s19 = sshll.u32 %s422_s23, 6  ;;  %s9563_s13 = smov (!%p409_p6, %s5263_s13), 11 }
  0x24   : > { %s9565_s14 = smov (!%p416_p7, %s5264_s14), 191  ;;  %s411_s26 = scalar_lea.vmem %s8867_s5, %s9563_s13 }
  0x25   : > { %p424_p8 = scmp.lt.s32.totalorder %s5266_s19, 191  ;;  %s5265_s20 = sshll.u32 %s9565_s14, 3 }
  0x26   : > { %s6508_s25 = scalar_lea.vmem %s8868_s6, %s5265_s20  ;;  %434 = sbr.rel (%p5268_p9) target bundleno = 46 (0x2e), region = 48 }
  0x27   : > { %s9567_s19 = smov (!%p424_p8, %s5266_s19), 191 }
  0x28   : > { %s5267_s28 = sshll.u32 %s9567_s19, 2 }
  0x29   : > { %s6513_s23 = scalar_lea.vmem %s8869_s7, %s5267_s28 }
  0x2b   : > { %vm435_vm0 = vcmask 24576   ;;  %v6409_v0 = vmov 0.0  }
  0x2c   : > { %436 = vst.msk [vmem:[#allocation5] sm:$0x1] %vm435_vm0, %v6409_v0 }
  0x2d   : > { %437 = vst.msk [vmem:[#allocation7] sm:$0x1] %vm435_vm0, %v6409_v0 }
  0x2e PF: > { %v508_v1 = vld [vmem:[%s396_s12] sm:$0xff]  ;;  %v509_v2 = vld [vmem:[%s396_s12 + $0x8] sm:$0xff]  ;;  %v6410_v7 = vmov 0   ;;  %vm777_vm1 = vcmask 1043456   ;;  %v1724_v13 = vld [vmem:[%s6497_s18 + $0x10] sm:$0xff]  ;;  %vm680_vm2 = vcmask 64512  }
  0x2f   : > { %v672_v3 = vunpack.c.l.b16 %v508_v1  ;;  %v673_v4 = vunpack.c.h.b16 %v508_v1  ;;  %v674_v5 = vunpack.c.l.b16 %v509_v2  ;;  %v675_v6 = vunpack.c.h.b16 %v509_v2  ;;  %5750 = vset.pattern.permute.xlu0 %v6410_v7  ;;  %5751 = vset.pattern.permute.xlu1 %v6410_v7  ;;  %v1722_v8 = vld [vmem:[%s6497_s18] sm:$0xff]  ;;  %v5714_v14 = vld [vmem:[%s6513_s23 + $0xb8] sm:$0xff]  ;;  %v1723_v23 = vld [vmem:[%s6497_s18 + $0x8] sm:$0xff]  ;;  %s8715_s13 = sld [smem:[#allocation4 + %s6476_s0]]  ;;  %s6412_s1 = smov [#allocation5]  }
  0x30   : > { %5752 = vset.pattern.permute.xlu2 %v6410_v7  ;;  %1788 = vperm.xlu0 %5750, %v1722_v8   ;;  %v5722_v15 = vld [vmem:[%s6513_s23 + $0xf8] sm:$0xff]  ;;  %v5659_v20 = vld [vmem:[%s6489_s29] sm:$0xff]  ;;  %v5660_v25 = vld [vmem:[%s6489_s29 + $0x8] sm:$0xff]  ;;  %vm4328_vm3 = vcmask 31744   ;;  %s5132_s24 = sshll.u32 %s8870_s8, 4  ;;  %vm5116_vm4 = vcmask 24576   ;;  %s5133_s24 = int_to_ptr.hbm [resolvable:$true] %s5132_s24 }
  0x31   : > { %v676_v9 = vpack.c.b16 %v672_v3, %v672_v3  ;;  %v677_v10 = vpack.c.b16 %v673_v4, %v673_v4  ;;  %v678_v11 = vpack.c.b16 %v674_v5, %v674_v5  ;;  %v679_v12 = vpack.c.b16 %v675_v6, %v675_v6  ;;  %1798 = vperm.xlu1 %5751, %v1724_v13   ;;  %v5698_v21 = vld [vmem:[%s6513_s23 + $0x38] sm:$0xff]  ;;  %v5661_v26 = vld [vmem:[%s6489_s29 + $0x10] sm:$0xff]  ;;  %v1726_v32 = vld [vmem:[%s6497_s18 + $0x20] sm:$0xff]  ;;  %p5731_p11 = scmp.eq.s32.totalorder %s6476_s0, 5 }
  0x32   : > { %v5706_v22 = vld [vmem:[%s6513_s23 + $0x78] sm:$0xff]  ;;  %v5713_v27 = vld [vmem:[%s6513_s23 + $0xb0] sm:$0xff]  ;;  %1808 = vperm.xlu2 %5752, %v1726_v32   ;;  %v1727_v34 = vld [vmem:[%s6497_s18 + $0x28] sm:$0xff] }
  0x33   : > { %v779_v16 = vsel %vm777_vm1, %v676_v9, 0  ;;  %v782_v17 = vsel %vm777_vm1, %v677_v10, 0  ;;  %v785_v18 = vsel %vm777_vm1, %v678_v11, 0  ;;  %v788_v19 = vsel %vm777_vm1, %v679_v12, 0  ;;  %v1725_v24 = vld [vmem:[%s6497_s18 + $0x18] sm:$0xff]  ;;  %v1728_v28 = vld [vmem:[%s6497_s18 + $0x30] sm:$0xff] }
  0x34   : > { %797 = vmatpush.bf16.msra.mxu0 %v779_v16  ;;  %966 = vmatpush.bf16.msra.mxu1 %v782_v17  ;;  %v5721_v29 = vld [vmem:[%s6513_s23 + $0xf0] sm:$0xff]  ;;  %v1729_v33 = vld [vmem:[%s6497_s18 + $0x38] sm:$0xff]  ;;  %v1731_v36 = vld [vmem:[%s6497_s18 + $0x48] sm:$0xff] }
  0x35   : > { %1135 = vmatpush.bf16.msra.mxu2 %v785_v18  ;;  %1304 = vmatpush.bf16.msra.mxu3 %v788_v19  ;;  %v5697_v30 = vld [vmem:[%s6513_s23 + $0x30] sm:$0xff]  ;;  %v5662_v35 = vld [vmem:[%s6489_s29 + $0x18] sm:$0xff]  ;;  %v5663_v37 = vld [vmem:[%s6489_s29 + $0x20] sm:$0xff] }
  0x36   : > { %v5705_v31 = vld [vmem:[%s6513_s23 + $0x70] sm:$0xff]  ;;  %v1730_v39 = vld [vmem:[%s6497_s18 + $0x40] sm:$0xff]  ;;  %v5664_v40 = vld [vmem:[%s6489_s29 + $0x28] sm:$0xff] }
  0x37   : > { %5397 = vmatmul.msk.bf16.vlgmr.msra.gmra.mxu0 %vm680_vm2, %v5659_v20  ;;  %5429 = vmatmul.msk.bf16.vlgmr.msra.gmra.mxu1 %vm680_vm2, %v5659_v20  ;;  %v1732_v38 = vld [vmem:[%s6497_s18 + $0x50] sm:$0xff]  ;;  %v1734_v41 = vld [vmem:[%s6497_s18 + $0x60] sm:$0xff]  ;;  %v1735_v42 = vld [vmem:[%s6497_s18 + $0x68] sm:$0xff] }
  0x38   : > { %5461 = vmatmul.msk.bf16.vlgmr.msra.gmra.mxu2 %vm680_vm2, %v5659_v20  ;;  %5493 = vmatmul.msk.bf16.vlgmr.msra.gmra.mxu3 %vm680_vm2, %v5659_v20  ;;  %v1733_v43 = vld [vmem:[%s6497_s18 + $0x58] sm:$0xff]  ;;  %v5665_v44 = vld [vmem:[%s6489_s29 + $0x30] sm:$0xff]  ;;  %v5712_v46 = vld [vmem:[%s6513_s23 + $0xa8] sm:$0xff] }
  0x39   : > { %3862 = vmatpush.bf16.msrb.mxu2 %v5714_v14  ;;  %4031 = vmatpush.bf16.msrb.mxu3 %v5722_v15  ;;  %v1737_v45 = vld [vmem:[%s6497_s18 + $0x78] sm:$0xff]  ;;  %v5720_v47 = vld [vmem:[%s6513_s23 + $0xe8] sm:$0xff]  ;;  %v1738_v51 = vld [vmem:[%s6497_s18 + $0x80] sm:$0xff] }
  0x3a   : > { %3524 = vmatpush.bf16.msrb.mxu0 %v5698_v21  ;;  %3693 = vmatpush.bf16.msrb.mxu1 %v5706_v22  ;;  %v5666_v48 = vld [vmem:[%s6489_s29 + $0x38] sm:$0xff]  ;;  %v5696_v49 = vld [vmem:[%s6513_s23 + $0x28] sm:$0xff]  ;;  %v1736_v53 = vld [vmem:[%s6497_s18 + $0x70] sm:$0xff] }
  0x3b   : > { %1793 = vperm.xlu0 %5750, %v1723_v23   ;;  %1803 = vperm.xlu1 %5751, %v1725_v24   ;;  %v5704_v50 = vld [vmem:[%s6513_s23 + $0x68] sm:$0xff]  ;;  %v5667_v54 = vld [vmem:[%s6489_s29 + $0x40] sm:$0xff]  ;;  %v1740_v0 = vld [vmem:[%s6497_s18 + $0x90] sm:$0xff] }
  0x3c   : > { %1813 = vperm.xlu2 %5752, %v1727_v34   ;;  %v2362_v59 = vld [vmem:[%s411_s26] sm:$0xf]  ;;  %v1741_v12 = vld [vmem:[%s6497_s18 + $0x98] sm:$0xff]  ;;  %s6413_s26 = smov [#allocation7]  }
  0x3d   : > { %3863 = vmatpush.bf16.msrb.mxu2 %v5713_v27  ;;  %4032 = vmatpush.bf16.msrb.mxu3 %v5721_v29  ;;  %v6593_v60 = vperm.slane %v2362_v59, 0  ;;  %v6597_v62 = vperm.slane %v2362_v59, 1  ;;  %v6603_v14 = vperm.slane %v2362_v59, 2  ;;  %v6605_v16 = vperm.slane %v2362_v59, 3  ;;  %s5142_s20 = sshll.u32 %s6413_s26, 4  ;;  %s5143_s20 = int_to_ptr.vmem [resolvable:$true] %s5142_s20 }
  0x3e   : > { %3525 = vmatpush.bf16.msrb.mxu0 %v5697_v30  ;;  %3694 = vmatpush.bf16.msrb.mxu1 %v5705_v31  ;;  %v5668_v30 = vld [vmem:[%s6489_s29 + $0x48] sm:$0xff] }
  0x41   : > { %3864 = vmatpush.bf16.msrb.mxu2 %v5712_v46  ;;  %4033 = vmatpush.bf16.msrb.mxu3 %v5720_v47 }
  0x42   : > { %3526 = vmatpush.bf16.msrb.mxu0 %v5696_v49  ;;  %3695 = vmatpush.bf16.msrb.mxu1 %v5704_v50 }
  0x43   : > { %1818 = vperm.xlu0 %5750, %v1728_v28   ;;  %1823 = vperm.xlu1 %5751, %v1729_v33  }
  0x44   : > { %1828 = vperm.xlu2 %5752, %v1730_v39  }
  0x47   : > { %5398 = vmatmul.msk.bf16.gmra.mxu0 %vm680_vm2, %v5660_v25  ;;  %5430 = vmatmul.msk.bf16.gmra.mxu1 %vm680_vm2, %v5660_v25 }
  0x48   : > { %5462 = vmatmul.msk.bf16.gmra.mxu2 %vm680_vm2, %v5660_v25  ;;  %5494 = vmatmul.msk.bf16.gmra.mxu3 %vm680_vm2, %v5660_v25 }
  0x4b   : > { %1833 = vperm.xlu0 %5750, %v1731_v36   ;;  %1838 = vperm.xlu1 %5751, %v1732_v38  }
  0x4c   : > { %1843 = vperm.xlu2 %5752, %v1733_v43  }
  0x53   : > { %1848 = vperm.xlu0 %5750, %v1734_v41   ;;  %1853 = vperm.xlu1 %5751, %v1735_v42  }
  0x54   : > { %1858 = vperm.xlu2 %5752, %v1736_v53  }
  0x57   : > { %5399 = vmatmul.msk.bf16.gmra.mxu0 %vm680_vm2, %v5661_v26  ;;  %5431 = vmatmul.msk.bf16.gmra.mxu1 %vm680_vm2, %v5661_v26 }
  0x58   : > { %5463 = vmatmul.msk.bf16.gmra.mxu2 %vm680_vm2, %v5661_v26  ;;  %5495 = vmatmul.msk.bf16.gmra.mxu3 %vm680_vm2, %v5661_v26 }
  0x5b   : > { %1863 = vperm.xlu0 %5750, %v1737_v45   ;;  %1868 = vperm.xlu1 %5751, %v1738_v51  }
  0x63   : > { %1878 = vperm.xlu0 %5750, %v1740_v0   ;;  %1883 = vperm.xlu1 %5751, %v1741_v12  }
  0x67   : > { %5400 = vmatmul.msk.bf16.gmra.mxu0 %vm680_vm2, %v5662_v35  ;;  %5432 = vmatmul.msk.bf16.gmra.mxu1 %vm680_vm2, %v5662_v35 }
  0x68   : > { %5464 = vmatmul.msk.bf16.gmra.mxu2 %vm680_vm2, %v5662_v35  ;;  %5496 = vmatmul.msk.bf16.gmra.mxu3 %vm680_vm2, %v5662_v35 }
  0x77   : > { %5401 = vmatmul.msk.bf16.gmra.mxu0 %vm680_vm2, %v5663_v37  ;;  %5433 = vmatmul.msk.bf16.gmra.mxu1 %vm680_vm2, %v5663_v37 }
  0x78   : > { %5465 = vmatmul.msk.bf16.gmra.mxu2 %vm680_vm2, %v5663_v37  ;;  %5497 = vmatmul.msk.bf16.gmra.mxu3 %vm680_vm2, %v5663_v37  ;;  %v1739_v37 = vld [vmem:[%s6497_s18 + $0x88] sm:$0xff] }
  0x79   : > { %1873 = vperm.xlu2 %5752, %v1739_v37  }
  0x87   : > { %5402 = vmatmul.msk.bf16.gmra.mxu0 %vm680_vm2, %v5664_v40  ;;  %5434 = vmatmul.msk.bf16.gmra.mxu1 %vm680_vm2, %v5664_v40 }
  0x88   : > { %5466 = vmatmul.msk.bf16.gmra.mxu2 %vm680_vm2, %v5664_v40  ;;  %5498 = vmatmul.msk.bf16.gmra.mxu3 %vm680_vm2, %v5664_v40 }
  0x97   : > { %5403 = vmatmul.msk.bf16.gmra.mxu0 %vm680_vm2, %v5665_v44  ;;  %5435 = vmatmul.msk.bf16.gmra.mxu1 %vm680_vm2, %v5665_v44 }
  0x98   : > { %5467 = vmatmul.msk.bf16.gmra.mxu2 %vm680_vm2, %v5665_v44  ;;  %5499 = vmatmul.msk.bf16.gmra.mxu3 %vm680_vm2, %v5665_v44 }
  0xa2   : > { %v1789_v52 = vpop.permute.xlu0 %1788 }
  0xa3   : > { %v6607_v20 = vpop.permute.xlu1 %1798 }
  0xa7   : > { %5404 = vmatmul.msk.bf16.gmra.mxu0 %vm680_vm2, %v5666_v48  ;;  %5436 = vmatmul.msk.bf16.gmra.mxu1 %vm680_vm2, %v5666_v48 }
  0xa8   : > { %5468 = vmatmul.msk.bf16.gmra.mxu2 %vm680_vm2, %v5666_v48  ;;  %5500 = vmatmul.msk.bf16.gmra.mxu3 %vm680_vm2, %v5666_v48 }
  0xad   : > { %v1794_v1 = vpop.permute.xlu0 %1793  ;;  %v1804_v49 = vpop.permute.xlu1 %1803 }
  0xb4   : > { %v799_v55 = vpop.f32.mrf.mxu0  ;;  %v968_v56 = vpop.f32.mrf.mxu1 }
  0xb5   : > { %v1466_v57 = vmul.f32 2.0, %v799_v55  ;;  %v1467_v58 = vmul.f32 2.0, %v968_v56 }
  0xb7   : > { %5405 = vmatmul.msk.bf16.gmra.mxu0 %vm680_vm2, %v5667_v54  ;;  %5437 = vmatmul.msk.bf16.gmra.mxu1 %vm680_vm2, %v5667_v54  ;;  %v2106_v61 = vsub.f32 %v1466_v57, %v1789_v52  ;;  %v2107_v63 = vsub.f32 %v1467_v58, %v1789_v52 }
  0xb8   : > { %5469 = vmatmul.msk.bf16.gmra.mxu2 %vm680_vm2, %v5667_v54  ;;  %5501 = vmatmul.msk.bf16.gmra.mxu3 %vm680_vm2, %v5667_v54 }
  0xb9   : > { %v2372_v4 = vsub.f32 %v2106_v61, %v6593_v60  ;;  %v2373_v9 = vsub.f32 %v2107_v63, %v6597_v62 }
  0xbb   : > { %v1137_v2 = vpop.f32.mrf.mxu2  ;;  %v1306_v3 = vpop.f32.mrf.mxu3  ;;  %v2628_v19 = vmul.f32 1.442695, %v2372_v4  ;;  %v2630_v21 = vmul.f32 1.442695, %v2373_v9 }
  0xbc   : > { %v1468_v5 = vmul.f32 2.0, %v1137_v2  ;;  %v1469_v6 = vmul.f32 2.0, %v1306_v3  ;;  %v801_v7 = vpop.f32.mrf.mxu0  ;;  %v970_v8 = vpop.f32.mrf.mxu1 }
  0xbd   : > { %v1470_v10 = vmul.f32 2.0, %v801_v7  ;;  %v1471_v11 = vmul.f32 2.0, %v970_v8  ;;  %5756 = vpow2.f32 %v2628_v19 }
  0xbe   : > { %v2108_v13 = vsub.f32 %v1468_v5, %v1789_v52  ;;  %v2109_v15 = vsub.f32 %v1469_v6, %v1789_v52  ;;  %5758 = vpow2.f32 %v2630_v21 }
  0xbf   : > { %v2110_v17 = vsub.f32 %v1470_v10, %v1794_v1  ;;  %v2111_v18 = vsub.f32 %v1471_v11, %v1794_v1  ;;  %v6642_v10 = vpop.permute.xlu2 %1808 }
  0xc0   : > { %v2374_v24 = vsub.f32 %v2108_v13, %v6603_v14  ;;  %v2375_v25 = vsub.f32 %v2109_v15, %v6605_v16 }
  0xc1   : > { %v2376_v22 = vsub.f32 %v2110_v17, %v6593_v60  ;;  %v2377_v23 = vsub.f32 %v2111_v18, %v6597_v62 }
  0xc2   : > { %v2632_v38 = vmul.f32 1.442695, %v2374_v24  ;;  %v2634_v41 = vmul.f32 1.442695, %v2375_v25  ;;  %v5669_v25 = vld [vmem:[%s6489_s29 + $0x50] sm:$0xff] }
  0xc3   : > { %v2636_v26 = vmul.f32 1.442695, %v2376_v22  ;;  %v2638_v27 = vmul.f32 1.442695, %v2377_v23  ;;  %v1139_v28 = vpop.f32.mrf.mxu2  ;;  %v1308_v29 = vpop.f32.mrf.mxu3 }
  0xc4   : > { %v1472_v31 = vmul.f32 2.0, %v1139_v28  ;;  %v1473_v32 = vmul.f32 2.0, %v1308_v29  ;;  %v804_v33 = vpop.f32.mrf.mxu0  ;;  %v973_v34 = vpop.f32.mrf.mxu1 }
  0xc5   : > { %v1474_v35 = vmul.f32 2.0, %v804_v33  ;;  %v1475_v36 = vmul.f32 2.0, %v973_v34  ;;  %5760 = vpow2.f32 %v2636_v26  ;;  %v6623_v46 = vpop.eup %5756  ;;  %v5673_v26 = vld [vmem:[%s6489_s29 + $0x70] sm:$0xff] }
  0xc6   : > { %v2112_v39 = vsub.f32 %v1472_v31, %v1794_v1  ;;  %v2113_v40 = vsub.f32 %v1473_v32, %v1794_v1  ;;  %5762 = vpow2.f32 %v2638_v27  ;;  %v6625_v50 = vpop.eup %5758  ;;  %v1743_v1 = vld [vmem:[%s6497_s18 + $0xa8] sm:$0xff] }
  0xc7   : > { %v2114_v42 = vsub.f32 %v1474_v35, %v6607_v20  ;;  %5406 = vmatmul.msk.bf16.gmra.mxu0 %vm680_vm2, %v5668_v30  ;;  %5438 = vmatmul.msk.bf16.gmra.mxu1 %vm680_vm2, %v5668_v30  ;;  %v2115_v45 = vsub.f32 %v1475_v36, %v6607_v20  ;;  %5764 = vpow2.f32 %v2632_v38 }
  0xc8   : > { %v2378_v43 = vsub.f32 %v2112_v39, %v6603_v14  ;;  %v2379_v44 = vsub.f32 %v2113_v40, %v6605_v16  ;;  %5470 = vmatmul.msk.bf16.gmra.mxu2 %vm680_vm2, %v5668_v30  ;;  %5502 = vmatmul.msk.bf16.gmra.mxu3 %vm680_vm2, %v5668_v30  ;;  %5766 = vpow2.f32 %v2634_v41 }
  0xc9   : > { %v2380_v51 = vsub.f32 %v2114_v42, %v6593_v60  ;;  %v2381_v55 = vsub.f32 %v2115_v45, %v6597_v62  ;;  %1893 = vperm.xlu0 %5750, %v1743_v1   ;;  %v1744_v42 = vld [vmem:[%s6497_s18 + $0xb0] sm:$0xff] }
  0xca   : > { %v2640_v47 = vmul.f32 1.442695, %v2378_v43  ;;  %v2642_v48 = vmul.f32 1.442695, %v2379_v44  ;;  %1898 = vperm.xlu1 %5751, %v1744_v42  }
  0xcb   : > { %v1142_v52 = vpop.f32.mrf.mxu2  ;;  %v1311_v53 = vpop.f32.mrf.mxu3  ;;  %v2644_v9 = vmul.f32 1.442695, %v2380_v51  ;;  %v2646_v12 = vmul.f32 1.442695, %v2381_v55 }
  0xcc   : > { %v6628_v54 = vpop.eup %5760  ;;  %5768 = vpow2.f32 %v2640_v47  ;;  %v1476_v56 = vmul.f32 2.0, %v1142_v52  ;;  %v1477_v57 = vmul.f32 2.0, %v1311_v53  ;;  %v806_v58 = vpop.f32.mrf.mxu0 }
  0xcd   : > { %v975_v59 = vpop.f32.mrf.mxu1  ;;  %v6631_v61 = vpop.eup %5762  ;;  %5770 = vpow2.f32 %v2642_v48  ;;  %v1478_v63 = vmul.f32 2.0, %v806_v58 }
  0xce   : > { %v1479_v0 = vmul.f32 2.0, %v975_v59  ;;  %v2116_v3 = vsub.f32 %v1476_v56, %v6607_v20  ;;  %v2117_v5 = vsub.f32 %v1477_v57, %v6607_v20  ;;  %v6640_v8 = vpop.eup %5764  ;;  %5772 = vpow2.f32 %v2644_v9  ;;  %v6670_v47 = vpop.permute.xlu2 %1813 }
  0xcf   : > { %v2118_v6 = vsub.f32 %v1478_v63, %v1804_v49  ;;  %v6644_v11 = vpop.eup %5766  ;;  %5774 = vpow2.f32 %v2646_v12 }
  0xd0   : > { %v2119_v7 = vsub.f32 %v1479_v0, %v1804_v49  ;;  %v2382_v18 = vsub.f32 %v2116_v3, %v6603_v14  ;;  %v2383_v20 = vsub.f32 %v2117_v5, %v6605_v16  ;;  %v5711_v3 = vld [vmem:[%s6513_s23 + $0xa0] sm:$0xff] }
  0xd1   : > { %v2384_v13 = vsub.f32 %v2118_v6, %v6593_v60  ;;  %v5719_v5 = vld [vmem:[%s6513_s23 + $0xe0] sm:$0xff]  ;;  %3865 = vmatpush.bf16.msrb.mxu2 %v5711_v3 }
  0xd2   : > { %v2385_v15 = vsub.f32 %v2119_v7, %v6597_v62  ;;  %v6648_v17 = vpop.eup %5768  ;;  %v2648_v34 = vmul.f32 1.442695, %v2382_v18  ;;  %v2650_v37 = vmul.f32 1.442695, %v2383_v20  ;;  %4034 = vmatpush.bf16.msrb.mxu3 %v5719_v5 }
  0xd3   : > { %v6651_v19 = vpop.eup %5770  ;;  %v2652_v21 = vmul.f32 1.442695, %v2384_v13  ;;  %v1144_v23 = vpop.f32.mrf.mxu2 }
  0xd4   : > { %v2654_v22 = vmul.f32 1.442695, %v2385_v15  ;;  %v1313_v24 = vpop.f32.mrf.mxu3  ;;  %v1480_v27 = vmul.f32 2.0, %v1144_v23  ;;  %v809_v29 = vpop.f32.mrf.mxu0 }
  0xd5   : > { %v1481_v28 = vmul.f32 2.0, %v1313_v24  ;;  %v978_v30 = vpop.f32.mrf.mxu1  ;;  %v1482_v32 = vmul.f32 2.0, %v809_v29  ;;  %5776 = vpow2.f32 %v2652_v21  ;;  %v6668_v43 = vpop.eup %5772 }
  0xd6   : > { %v1483_v33 = vmul.f32 2.0, %v978_v30  ;;  %v2120_v35 = vsub.f32 %v1480_v27, %v1804_v49  ;;  %5778 = vpow2.f32 %v2654_v22  ;;  %v6672_v48 = vpop.eup %5774 }
  0xd7   : > { %v2121_v36 = vsub.f32 %v1481_v28, %v1804_v49  ;;  %v2122_v38 = vsub.f32 %v1482_v32, %v6642_v10  ;;  %5407 = vmatmul.msk.bf16.gmra.mxu0 %vm680_vm2, %v5669_v25  ;;  %5439 = vmatmul.msk.bf16.gmra.mxu1 %vm680_vm2, %v5669_v25  ;;  %5780 = vpow2.f32 %v2648_v34  ;;  %v6700_v28 = vpop.permute.xlu0 %1818 }
  0xd8   : > { %v2386_v39 = vsub.f32 %v2120_v35, %v6603_v14  ;;  %v2123_v41 = vsub.f32 %v1483_v33, %v6642_v10  ;;  %5471 = vmatmul.msk.bf16.gmra.mxu2 %vm680_vm2, %v5669_v25  ;;  %5503 = vmatmul.msk.bf16.gmra.mxu3 %vm680_vm2, %v5669_v25  ;;  %5782 = vpow2.f32 %v2650_v37  ;;  %v1742_v25 = vld [vmem:[%s6497_s18 + $0xa0] sm:$0xff] }
  0xd9   : > { %v2387_v40 = vsub.f32 %v2121_v36, %v6605_v16  ;;  %v2388_v49 = vsub.f32 %v2122_v38, %v6593_v60  ;;  %1888 = vperm.xlu2 %5752, %v1742_v25   ;;  %v5670_v36 = vld [vmem:[%s6489_s29 + $0x58] sm:$0xff] }
  0xda   : > { %v2656_v44 = vmul.f32 1.442695, %v2386_v39  ;;  %v2389_v55 = vsub.f32 %v2123_v41, %v6597_v62 }
  0xdb   : > { %v2658_v45 = vmul.f32 1.442695, %v2387_v40  ;;  %v1147_v51 = vpop.f32.mrf.mxu2  ;;  %v6675_v53 = vpop.eup %5776  ;;  %v2660_v20 = vmul.f32 1.442695, %v2388_v49  ;;  %v5695_v49 = vld [vmem:[%s6513_s23 + $0x20] sm:$0xff] }
  0xdc   : > { %v1316_v52 = vpop.f32.mrf.mxu3  ;;  %5784 = vpow2.f32 %v2656_v44  ;;  %v1484_v56 = vmul.f32 2.0, %v1147_v51  ;;  %v811_v58 = vpop.f32.mrf.mxu0  ;;  %v2662_v22 = vmul.f32 1.442695, %v2389_v55  ;;  %v5703_v51 = vld [vmem:[%s6513_s23 + $0x60] sm:$0xff]  ;;  %3527 = vmatpush.bf16.msrb.mxu0 %v5695_v49 }
  0xdd   : > { %v1485_v57 = vmul.f32 2.0, %v1316_v52  ;;  %v980_v59 = vpop.f32.mrf.mxu1  ;;  %v6678_v63 = vpop.eup %5778  ;;  %5786 = vpow2.f32 %v2658_v45  ;;  %v1486_v0 = vmul.f32 2.0, %v811_v58  ;;  %3696 = vmatpush.bf16.msrb.mxu1 %v5703_v51 }
  0xde   : > { %v1487_v1 = vmul.f32 2.0, %v980_v59  ;;  %v2124_v7 = vsub.f32 %v1484_v56, %v6642_v10  ;;  %v6690_v18 = vpop.eup %5780  ;;  %5788 = vpow2.f32 %v2660_v20 }
  0xdf   : > { %v2125_v12 = vsub.f32 %v1485_v57, %v6642_v10  ;;  %v2126_v13 = vsub.f32 %v1486_v0, %v6670_v47  ;;  %v6692_v21 = vpop.eup %5782  ;;  %5790 = vpow2.f32 %v2662_v22 }
  0xe0   : > { %v2127_v15 = vsub.f32 %v1487_v1, %v6670_v47  ;;  %v2390_v10 = vsub.f32 %v2124_v7, %v6603_v14 }
  0xe1   : > { %v2392_v23 = vsub.f32 %v2126_v13, %v6593_v60  ;;  %v2391_v30 = vsub.f32 %v2125_v12, %v6605_v16  ;;  %v6725_v12 = vpop.permute.xlu1 %1823 }
  0xe2   : > { %v2393_v24 = vsub.f32 %v2127_v15, %v6597_v62  ;;  %v6697_v27 = vpop.eup %5784  ;;  %v2664_v52 = vmul.f32 1.442695, %v2390_v10 }
  0xe3   : > { %v6702_v29 = vpop.eup %5786  ;;  %v2668_v32 = vmul.f32 1.442695, %v2392_v23  ;;  %v1149_v34 = vpop.f32.mrf.mxu2  ;;  %v2666_v57 = vmul.f32 1.442695, %v2391_v30 }
  0xe4   : > { %v2670_v33 = vmul.f32 1.442695, %v2393_v24  ;;  %v1318_v35 = vpop.f32.mrf.mxu3  ;;  %v1488_v38 = vmul.f32 2.0, %v1149_v34  ;;  %v814_v40 = vpop.f32.mrf.mxu0 }
  0xe5   : > { %v1489_v39 = vmul.f32 2.0, %v1318_v35  ;;  %v983_v41 = vpop.f32.mrf.mxu1  ;;  %v1490_v44 = vmul.f32 2.0, %v814_v40  ;;  %5792 = vpow2.f32 %v2668_v32  ;;  %v6723_v3 = vpop.eup %5788 }
  0xe6   : > { %v1491_v45 = vmul.f32 2.0, %v983_v41  ;;  %v2128_v55 = vsub.f32 %v1488_v38, %v6670_v47  ;;  %5794 = vpow2.f32 %v2670_v33  ;;  %v6727_v13 = vpop.eup %5790 }
  0xe7   : > { %v2129_v56 = vsub.f32 %v1489_v39, %v6670_v47  ;;  %5408 = vmatmul.msk.bf16.gmra.mxu0 %vm680_vm2, %v5670_v36  ;;  %5440 = vmatmul.msk.bf16.gmra.mxu1 %vm680_vm2, %v5670_v36  ;;  %v2130_v58 = vsub.f32 %v1490_v44, %v6700_v28  ;;  %v1746_v47 = vld [vmem:[%s6497_s18 + $0xc0] sm:$0xff]  ;;  %5796 = vpow2.f32 %v2664_v52 }
  0xe8   : > { %v2394_v59 = vsub.f32 %v2128_v55, %v6603_v14  ;;  %5472 = vmatmul.msk.bf16.gmra.mxu2 %vm680_vm2, %v5670_v36  ;;  %5504 = vmatmul.msk.bf16.gmra.mxu3 %vm680_vm2, %v5670_v36  ;;  %v2131_v1 = vsub.f32 %v1491_v45, %v6700_v28  ;;  %5798 = vpow2.f32 %v2666_v57  ;;  %v1747_v36 = vld [vmem:[%s6497_s18 + $0xc8] sm:$0xff] }
  0xe9   : > { %v2395_v0 = vsub.f32 %v2129_v56, %v6605_v16  ;;  %1908 = vperm.xlu0 %5750, %v1746_v47   ;;  %v2396_v15 = vsub.f32 %v2130_v58, %v6593_v60  ;;  %1913 = vperm.xlu1 %5751, %v1747_v36   ;;  %v1745_v36 = vld [vmem:[%s6497_s18 + $0xb8] sm:$0xff] }
  0xea   : > { %v2672_v5 = vmul.f32 1.442695, %v2394_v59  ;;  %v2397_v24 = vsub.f32 %v2131_v1, %v6597_v62  ;;  %1903 = vperm.xlu2 %5752, %v1745_v36  }
  0xeb   : > { %v2674_v7 = vmul.f32 1.442695, %v2395_v0  ;;  %v1152_v20 = vpop.f32.mrf.mxu2  ;;  %v6730_v23 = vpop.eup %5792  ;;  %v2676_v51 = vmul.f32 1.442695, %v2396_v15 }
  0xec   : > { %v1321_v22 = vpop.f32.mrf.mxu3  ;;  %5800 = vpow2.f32 %v2672_v5  ;;  %v1492_v25 = vmul.f32 2.0, %v1152_v20  ;;  %v816_v30 = vpop.f32.mrf.mxu0  ;;  %v2678_v55 = vmul.f32 1.442695, %v2397_v24  ;;  %v5671_v20 = vld [vmem:[%s6489_s29 + $0x60] sm:$0xff] }
  0xed   : > { %v1493_v10 = vmul.f32 2.0, %v1321_v22  ;;  %v985_v32 = vpop.f32.mrf.mxu1  ;;  %v6733_v33 = vpop.eup %5794  ;;  %5802 = vpow2.f32 %v2674_v7  ;;  %v1494_v34 = vmul.f32 2.0, %v816_v30  ;;  %v5672_v22 = vld [vmem:[%s6489_s29 + $0x68] sm:$0xff] }
  0xee   : > { %v1495_v35 = vmul.f32 2.0, %v985_v32  ;;  %v2132_v39 = vsub.f32 %v1492_v25, %v6700_v28  ;;  %v6744_v49 = vpop.eup %5796  ;;  %5804 = vpow2.f32 %v2676_v51 }
  0xef   : > { %v2133_v41 = vsub.f32 %v1493_v10, %v6700_v28  ;;  %v2134_v44 = vsub.f32 %v1494_v34, %v6725_v12  ;;  %v6746_v52 = vpop.eup %5798  ;;  %v6753_v28 = vpop.permute.xlu2 %1828  ;;  %5806 = vpow2.f32 %v2678_v55 }
  0xf0   : > { %v2135_v45 = vsub.f32 %v1495_v35, %v6725_v12  ;;  %v2398_v59 = vsub.f32 %v2132_v39, %v6603_v14 }
  0xf1   : > { %v2400_v56 = vsub.f32 %v2134_v44, %v6593_v60  ;;  %v2399_v1 = vsub.f32 %v2133_v41, %v6605_v16 }
  0xf2   : > { %v2401_v57 = vsub.f32 %v2135_v45, %v6597_v62  ;;  %v6750_v58 = vpop.eup %5800  ;;  %v2680_v39 = vmul.f32 1.442695, %v2398_v59 }
  0xf3   : > { %v6755_v0 = vpop.eup %5802  ;;  %v2684_v47 = vmul.f32 1.442695, %v2400_v56  ;;  %v1154_v7 = vpop.f32.mrf.mxu2  ;;  %v2682_v45 = vmul.f32 1.442695, %v2399_v1 }
  0xf4   : > { %v2686_v5 = vmul.f32 1.442695, %v2401_v57  ;;  %v1323_v15 = vpop.f32.mrf.mxu3  ;;  %v1496_v24 = vmul.f32 2.0, %v1154_v7  ;;  %v819_v10 = vpop.f32.mrf.mxu0 }
  0xf5   : > { %v1497_v25 = vmul.f32 2.0, %v1323_v15  ;;  %v988_v30 = vpop.f32.mrf.mxu1  ;;  %v1498_v34 = vmul.f32 2.0, %v819_v10  ;;  %5808 = vpow2.f32 %v2684_v47  ;;  %v1834_v47 = vpop.permute.xlu0 %1833 }
  0xf6   : > { %v1499_v35 = vmul.f32 2.0, %v988_v30  ;;  %v2136_v41 = vsub.f32 %v1496_v24, %v6725_v12  ;;  %5810 = vpow2.f32 %v2686_v5 }
  0xf7   : > { %v2137_v44 = vsub.f32 %v1497_v25, %v6725_v12  ;;  %5409 = vmatmul.msk.bf16.gmra.mxu0 %vm680_vm2, %v5671_v20  ;;  %5441 = vmatmul.msk.bf16.gmra.mxu1 %vm680_vm2, %v5671_v20  ;;  %v2138_v51 = vsub.f32 %v1498_v34, %v6753_v28  ;;  %v6774_v12 = vpop.eup %5804  ;;  %5812 = vpow2.f32 %v2680_v39 }
  0xf8   : > { %v2402_v55 = vsub.f32 %v2136_v41, %v6603_v14  ;;  %5473 = vmatmul.msk.bf16.gmra.mxu2 %vm680_vm2, %v5671_v20  ;;  %5505 = vmatmul.msk.bf16.gmra.mxu3 %vm680_vm2, %v5671_v20  ;;  %v2139_v57 = vsub.f32 %v1499_v35, %v6753_v28  ;;  %v6776_v5 = vpop.eup %5806  ;;  %5814 = vpow2.f32 %v2682_v45 }
  0xf9   : > { %v2403_v56 = vsub.f32 %v2137_v44, %v6605_v16  ;;  %v2404_v7 = vsub.f32 %v2138_v51, %v6593_v60  ;;  %v1749_v44 = vld [vmem:[%s6497_s18 + $0xd8] sm:$0xff] }
  0xfa   : > { %v2688_v59 = vmul.f32 1.442695, %v2402_v55  ;;  %v2405_v20 = vsub.f32 %v2139_v57, %v6597_v62  ;;  %1923 = vperm.xlu0 %5750, %v1749_v44   ;;  %v6800_v55 = vpop.permute.xlu1 %1838 }
  0xfb   : > { %v2690_v1 = vmul.f32 1.442695, %v2403_v56  ;;  %v1157_v15 = vpop.f32.mrf.mxu2  ;;  %v6779_v25 = vpop.eup %5808 }
  0xfc   : > { %v1326_v24 = vpop.f32.mrf.mxu3  ;;  %5816 = vpow2.f32 %v2688_v59  ;;  %v1500_v10 = vmul.f32 2.0, %v1157_v15  ;;  %v821_v34 = vpop.f32.mrf.mxu0 }
  0xfd   : > { %v1501_v30 = vmul.f32 2.0, %v1326_v24  ;;  %v990_v35 = vpop.f32.mrf.mxu1  ;;  %v6782_v36 = vpop.eup %5810  ;;  %5818 = vpow2.f32 %v2690_v1  ;;  %v1502_v39 = vmul.f32 2.0, %v821_v34  ;;  %v2692_v1 = vmul.f32 1.442695, %v2404_v7 }
  0xfe   : > { %v1503_v41 = vmul.f32 2.0, %v990_v35  ;;  %v2140_v51 = vsub.f32 %v1500_v10, %v6753_v28  ;;  %v6791_v15 = vpop.eup %5812  ;;  %v2694_v34 = vmul.f32 1.442695, %v2405_v20 }
  0xff   : > { %v2141_v56 = vsub.f32 %v1501_v30, %v6753_v28  ;;  %v2142_v57 = vsub.f32 %v1502_v39, %v1834_v47  ;;  %v6793_v24 = vpop.eup %5814  ;;  %5820 = vpow2.f32 %v2692_v1 }
 0x100   : > { %v2143_v59 = vsub.f32 %v1503_v41, %v1834_v47  ;;  %v2406_v44 = vsub.f32 %v2140_v51, %v6603_v14  ;;  %5822 = vpow2.f32 %v2694_v34 }
 0x101   : > { %v2408_v35 = vsub.f32 %v2142_v57, %v6593_v60  ;;  %v2407_v30 = vsub.f32 %v2141_v56, %v6605_v16 }
 0x102   : > { %v2409_v45 = vsub.f32 %v2143_v59, %v6597_v62  ;;  %v6797_v10 = vpop.eup %5816 }
 0x103   : > { %v6802_v28 = vpop.eup %5818  ;;  %v2700_v39 = vmul.f32 1.442695, %v2408_v35  ;;  %v1159_v7 = vpop.f32.mrf.mxu2  ;;  %v2696_v35 = vmul.f32 1.442695, %v2406_v44  ;;  %v2698_v9 = vmul.f32 1.442695, %v2407_v30 }
 0x104   : > { %v2702_v41 = vmul.f32 1.442695, %v2409_v45  ;;  %v1328_v32 = vpop.f32.mrf.mxu3  ;;  %v1504_v57 = vmul.f32 2.0, %v1159_v7  ;;  %v824_v40 = vpop.f32.mrf.mxu0 }
 0x105   : > { %v1505_v59 = vmul.f32 2.0, %v1328_v32  ;;  %v993_v38 = vpop.f32.mrf.mxu1  ;;  %v1506_v42 = vmul.f32 2.0, %v824_v40  ;;  %5824 = vpow2.f32 %v2700_v39  ;;  %v1750_v40 = vld [vmem:[%s6497_s18 + $0xe0] sm:$0xff]  ;;  %v6821_v30 = vpop.permute.xlu2 %1843 }
 0x106   : > { %v1507_v56 = vmul.f32 2.0, %v993_v38  ;;  %v2144_v45 = vsub.f32 %v1504_v57, %v1834_v47  ;;  %5826 = vpow2.f32 %v2702_v41  ;;  %1928 = vperm.xlu1 %5751, %v1750_v40  }
 0x107   : > { %v2145_v37 = vsub.f32 %v1505_v59, %v1834_v47  ;;  %5410 = vmatmul.msk.bf16.gmra.mxu0 %vm680_vm2, %v5672_v22  ;;  %5442 = vmatmul.msk.bf16.gmra.mxu1 %vm680_vm2, %v5672_v22  ;;  %v2146_v32 = vsub.f32 %v1506_v42, %v6800_v55  ;;  %v6819_v47 = vpop.eup %5820  ;;  %5828 = vpow2.f32 %v2696_v35 }
 0x108   : > { %v2410_v1 = vsub.f32 %v2144_v45, %v6603_v14  ;;  %5474 = vmatmul.msk.bf16.gmra.mxu2 %vm680_vm2, %v5672_v22  ;;  %5506 = vmatmul.msk.bf16.gmra.mxu3 %vm680_vm2, %v5672_v22  ;;  %v2147_v38 = vsub.f32 %v1507_v56, %v6800_v55  ;;  %9058 = vst [vmem:[#allocation12_spill] sm:$0xff] %v6819_v47  ;;  %v6823_v42 = vpop.eup %5822  ;;  %5830 = vpow2.f32 %v2698_v9  ;;  %v1748_v9 = vld [vmem:[%s6497_s18 + $0xd0] sm:$0xff] }
 0x109   : > { %v2411_v7 = vsub.f32 %v2145_v37, %v6605_v16  ;;  %9059 = vst [vmem:[#allocation13_spill] sm:$0xff] %v6823_v42  ;;  %v2412_v37 = vsub.f32 %v2146_v32, %v6593_v60  ;;  %1918 = vperm.xlu2 %5752, %v1748_v9   ;;  %v5718_v9 = vld [vmem:[%s6513_s23 + $0xd8] sm:$0xff] }
 0x10a   : > { %v2704_v34 = vmul.f32 1.442695, %v2410_v1  ;;  %v2413_v22 = vsub.f32 %v2147_v38, %v6597_v62  ;;  %4035 = vmatpush.bf16.msrb.mxu3 %v5718_v9 }
 0x10b   : > { %v2706_v44 = vmul.f32 1.442695, %v2411_v7  ;;  %v1162_v39 = vpop.f32.mrf.mxu2  ;;  %v6826_v57 = vpop.eup %5824  ;;  %v2708_v20 = vmul.f32 1.442695, %v2412_v37 }
 0x10c   : > { %v1331_v41 = vpop.f32.mrf.mxu3  ;;  %9060 = vst [vmem:[#allocation14_spill] sm:$0xff] %v6826_v57  ;;  %5832 = vpow2.f32 %v2704_v34  ;;  %v1508_v59 = vmul.f32 2.0, %v1162_v39  ;;  %v826_v35 = vpop.f32.mrf.mxu0 }
 0x10d   : > { %v1509_v56 = vmul.f32 2.0, %v1331_v41  ;;  %v995_v45 = vpop.f32.mrf.mxu1  ;;  %v6829_v1 = vpop.eup %5826  ;;  %5834 = vpow2.f32 %v2706_v44  ;;  %v1510_v7 = vmul.f32 2.0, %v826_v35  ;;  %v2710_v35 = vmul.f32 1.442695, %v2413_v22 }
 0x10e   : > { %9061 = vst [vmem:[#allocation15_spill] sm:$0xff] %v6829_v1  ;;  %v1511_v40 = vmul.f32 2.0, %v995_v45  ;;  %v2148_v32 = vsub.f32 %v1508_v59, %v6800_v55  ;;  %v6839_v51 = vpop.eup %5828  ;;  %5836 = vpow2.f32 %v2708_v20 }
 0x10f   : > { %v2149_v38 = vsub.f32 %v1509_v56, %v6800_v55  ;;  %v2150_v39 = vsub.f32 %v1510_v7, %v6821_v30  ;;  %9062 = vst [vmem:[#allocation16_spill] sm:$0xff] %v6839_v51  ;;  %v6841_v44 = vpop.eup %5830  ;;  %v6849_v56 = vpop.permute.xlu0 %1848  ;;  %5838 = vpow2.f32 %v2710_v35  ;;  %v1751_v51 = vld [vmem:[%s6497_s18 + $0xe8] sm:$0xff] }
 0x110   : > { %v2151_v41 = vsub.f32 %v1511_v40, %v6821_v30  ;;  %9063 = vst [vmem:[#allocation17_spill] sm:$0xff] %v6841_v44  ;;  %v2414_v55 = vsub.f32 %v2148_v32, %v6603_v14 }
 0x111   : > { %v2416_v45 = vsub.f32 %v2150_v39, %v6593_v60  ;;  %v2415_v37 = vsub.f32 %v2149_v38, %v6605_v16  ;;  %1933 = vperm.xlu2 %5752, %v1751_v51  }
 0x112   : > { %v2417_v59 = vsub.f32 %v2151_v41, %v6597_v62  ;;  %v6846_v6 = vpop.eup %5832 }
 0x113   : > { %9064 = vst [vmem:[#allocation18_spill] sm:$0xff] %v6846_v6  ;;  %v6851_v7 = vpop.eup %5834  ;;  %v2716_v40 = vmul.f32 1.442695, %v2416_v45  ;;  %v1164_v31 = vpop.f32.mrf.mxu2  ;;  %v2712_v45 = vmul.f32 1.442695, %v2414_v55  ;;  %v1752_v55 = vld [vmem:[%s6497_s18 + $0xf0] sm:$0xff] }
 0x114   : > { %9065 = vst [vmem:[#allocation19_spill] sm:$0xff] %v6851_v7  ;;  %v2718_v34 = vmul.f32 1.442695, %v2417_v59  ;;  %v1333_v22 = vpop.f32.mrf.mxu3  ;;  %v1512_v41 = vmul.f32 2.0, %v1164_v31  ;;  %v829_v2 = vpop.f32.mrf.mxu0  ;;  %v2714_v47 = vmul.f32 1.442695, %v2415_v37  ;;  %1938 = vperm.xlu0 %5750, %v1752_v55  }
 0x115   : > { %v1513_v4 = vmul.f32 2.0, %v1333_v22  ;;  %v998_v32 = vpop.f32.mrf.mxu1  ;;  %v1514_v42 = vmul.f32 2.0, %v829_v2  ;;  %5840 = vpow2.f32 %v2716_v40  ;;  %v6872_v37 = vpop.permute.xlu1 %1853  ;;  %v5710_v55 = vld [vmem:[%s6513_s23 + $0x98] sm:$0xff] }
 0x116   : > { %v1515_v38 = vmul.f32 2.0, %v998_v32  ;;  %v2152_v59 = vsub.f32 %v1512_v41, %v6821_v30  ;;  %5842 = vpow2.f32 %v2718_v34  ;;  %3866 = vmatpush.bf16.msrb.mxu2 %v5710_v55  ;;  %v5694_v7 = vld [vmem:[%s6513_s23 + $0x18] sm:$0xff] }
 0x117   : > { %v2153_v1 = vsub.f32 %v1513_v4, %v6821_v30  ;;  %5411 = vmatmul.msk.bf16.gmra.mxu0 %vm680_vm2, %v5673_v26  ;;  %5443 = vmatmul.msk.bf16.gmra.mxu1 %vm680_vm2, %v5673_v26  ;;  %v2154_v31 = vsub.f32 %v1514_v42, %v6849_v56  ;;  %v6870_v4 = vpop.eup %5836  ;;  %5844 = vpow2.f32 %v2712_v45 }
 0x118   : > { %v2418_v20 = vsub.f32 %v2152_v59, %v6603_v14  ;;  %5475 = vmatmul.msk.bf16.gmra.mxu2 %vm680_vm2, %v5673_v26  ;;  %5507 = vmatmul.msk.bf16.gmra.mxu3 %vm680_vm2, %v5673_v26  ;;  %v2155_v35 = vsub.f32 %v1515_v38, %v6849_v56  ;;  %9066 = vst [vmem:[#allocation20_spill] sm:$0xff] %v6870_v4  ;;  %v6874_v42 = vpop.eup %5838  ;;  %5846 = vpow2.f32 %v2714_v47 }
 0x119   : > { %v2419_v2 = vsub.f32 %v2153_v1, %v6605_v16  ;;  %9067 = vst [vmem:[#allocation21_spill] sm:$0xff] %v6874_v42  ;;  %v2420_v1 = vsub.f32 %v2154_v31, %v6593_v60  ;;  %v1753_v31 = vld [vmem:[%s6497_s18 + $0xf8] sm:$0xff]  ;;  %3528 = vmatpush.bf16.msrb.mxu0 %v5694_v7 }
 0x11a   : > { %v2720_v30 = vmul.f32 1.442695, %v2418_v20  ;;  %v2421_v41 = vsub.f32 %v2155_v35, %v6597_v62  ;;  %1943 = vperm.xlu1 %5751, %v1753_v31  }
 0x11b   : > { %v2722_v34 = vmul.f32 1.442695, %v2419_v2  ;;  %v1167_v26 = vpop.f32.mrf.mxu2  ;;  %v6877_v22 = vpop.eup %5840 }
 0x11c   : > { %v1336_v40 = vpop.f32.mrf.mxu3  ;;  %9068 = vst [vmem:[#allocation22_spill] sm:$0xff] %v6877_v22  ;;  %5848 = vpow2.f32 %v2720_v30  ;;  %v1516_v32 = vmul.f32 2.0, %v1167_v26  ;;  %v831_v45 = vpop.f32.mrf.mxu0  ;;  %v2726_v39 = vmul.f32 1.442695, %v2421_v41 }
 0x11d   : > { %v1517_v38 = vmul.f32 2.0, %v1336_v40  ;;  %v1000_v59 = vpop.f32.mrf.mxu1  ;;  %v6880_v20 = vpop.eup %5842  ;;  %5850 = vpow2.f32 %v2722_v34  ;;  %v1518_v2 = vmul.f32 2.0, %v831_v45  ;;  %v2724_v45 = vmul.f32 1.442695, %v2420_v1 }
 0x11e   : > { %9069 = vst [vmem:[#allocation23_spill] sm:$0xff] %v6880_v20  ;;  %v1519_v47 = vmul.f32 2.0, %v1000_v59  ;;  %v2156_v44 = vsub.f32 %v1516_v32, %v6849_v56  ;;  %v6893_v40 = vpop.eup %5844 }
 0x11f   : > { %v2157_v30 = vsub.f32 %v1517_v38, %v6849_v56  ;;  %v2158_v26 = vsub.f32 %v1518_v2, %v6872_v37  ;;  %9070 = vst [vmem:[#allocation24_spill] sm:$0xff] %v6893_v40  ;;  %v6895_v59 = vpop.eup %5846  ;;  %v6902_v38 = vpop.permute.xlu2 %1858  ;;  %5852 = vpow2.f32 %v2724_v45 }
 0x120   : > { %v2159_v34 = vsub.f32 %v1519_v47, %v6872_v37  ;;  %9071 = vst [vmem:[#allocation25_spill] sm:$0xff] %v6895_v59  ;;  %v2422_v56 = vsub.f32 %v2156_v44, %v6603_v14  ;;  %5854 = vpow2.f32 %v2726_v39 }
 0x121   : > { %v2424_v32 = vsub.f32 %v2158_v26, %v6593_v60  ;;  %v2423_v9 = vsub.f32 %v2157_v30, %v6605_v16  ;;  %v5674_v26 = vld [vmem:[%s6489_s29 + $0x78] sm:$0xff] }
 0x122   : > { %v2425_v31 = vsub.f32 %v2159_v34, %v6597_v62  ;;  %v6899_v35 = vpop.eup %5848  ;;  %v2728_v6 = vmul.f32 1.442695, %v2422_v56 }
 0x123   : > { %9072 = vst [vmem:[#allocation26_spill] sm:$0xff] %v6899_v35  ;;  %v6904_v2 = vpop.eup %5850  ;;  %v2732_v47 = vmul.f32 1.442695, %v2424_v32  ;;  %v1169_v41 = vpop.f32.mrf.mxu2  ;;  %v2730_v45 = vmul.f32 1.442695, %v2423_v9 }
 0x124   : > { %9073 = vst [vmem:[#allocation27_spill] sm:$0xff] %v6904_v2  ;;  %v2734_v1 = vmul.f32 1.442695, %v2425_v31  ;;  %v1338_v55 = vpop.f32.mrf.mxu3  ;;  %v1520_v42 = vmul.f32 2.0, %v1169_v41  ;;  %v834_v20 = vpop.f32.mrf.mxu0  ;;  %v5702_v31 = vld [vmem:[%s6513_s23 + $0x58] sm:$0xff] }
 0x125   : > { %v1521_v44 = vmul.f32 2.0, %v1338_v55  ;;  %v1003_v4 = vpop.f32.mrf.mxu1  ;;  %v1522_v30 = vmul.f32 2.0, %v834_v20  ;;  %5856 = vpow2.f32 %v2732_v47  ;;  %3697 = vmatpush.bf16.msrb.mxu1 %v5702_v31  ;;  %v6925_v51 = vpop.eup %5852 }
 0x126   : > { %v1523_v32 = vmul.f32 2.0, %v1003_v4  ;;  %v2160_v57 = vsub.f32 %v1520_v42, %v6872_v37  ;;  %5858 = vpow2.f32 %v2734_v1  ;;  %9074 = vst [vmem:[#allocation28_spill] sm:$0xff] %v6925_v51  ;;  %v1864_v9 = vpop.permute.xlu0 %1863  ;;  %v6927_v47 = vpop.eup %5854 }
 0x127   : > { %v2161_v34 = vsub.f32 %v1521_v44, %v6872_v37  ;;  %5412 = vmatmul.msk.bf16.gmra.mxu0 %vm680_vm2, %v5674_v26  ;;  %5444 = vmatmul.msk.bf16.gmra.mxu1 %vm680_vm2, %v5674_v26  ;;  %v2162_v39 = vsub.f32 %v1522_v30, %v6902_v38  ;;  %5860 = vpow2.f32 %v2728_v6  ;;  %9075 = vst [vmem:[#allocation29_spill] sm:$0xff] %v6927_v47 }
 0x128   : > { %v2426_v4 = vsub.f32 %v2160_v57, %v6603_v14  ;;  %5476 = vmatmul.msk.bf16.gmra.mxu2 %vm680_vm2, %v5674_v26  ;;  %5508 = vmatmul.msk.bf16.gmra.mxu3 %vm680_vm2, %v5674_v26  ;;  %v2163_v42 = vsub.f32 %v1523_v32, %v6902_v38  ;;  %5862 = vpow2.f32 %v2730_v45 }
 0x129   : > { %v2427_v20 = vsub.f32 %v2161_v34, %v6605_v16  ;;  %v2428_v57 = vsub.f32 %v2162_v39, %v6593_v60 }
 0x12a   : > { %v2736_v37 = vmul.f32 1.442695, %v2426_v4  ;;  %v2429_v7 = vsub.f32 %v2163_v42, %v6597_v62  ;;  %v1755_v4 = vld [vmem:[%s6497_s18 + $0x108] sm:$0xff] }
 0x12b   : > { %v2738_v56 = vmul.f32 1.442695, %v2427_v20  ;;  %v1172_v1 = vpop.f32.mrf.mxu2  ;;  %v6930_v55 = vpop.eup %5856  ;;  %1953 = vperm.xlu0 %5750, %v1755_v4  }
 0x12c   : > { %v1341_v41 = vpop.f32.mrf.mxu3  ;;  %9076 = vst [vmem:[#allocation30_spill] sm:$0xff] %v6930_v55  ;;  %5864 = vpow2.f32 %v2736_v37  ;;  %v1524_v26 = vmul.f32 2.0, %v1172_v1  ;;  %v836_v44 = vpop.f32.mrf.mxu0 }
 0x12d   : > { %v1525_v34 = vmul.f32 2.0, %v1341_v41  ;;  %v1005_v6 = vpop.f32.mrf.mxu1  ;;  %v6933_v30 = vpop.eup %5858  ;;  %5866 = vpow2.f32 %v2738_v56  ;;  %v1526_v32 = vmul.f32 2.0, %v836_v44  ;;  %v2740_v56 = vmul.f32 1.442695, %v2428_v57 }
 0x12e   : > { %9077 = vst [vmem:[#allocation31_spill] sm:$0xff] %v6933_v30  ;;  %v1527_v31 = vmul.f32 2.0, %v1005_v6  ;;  %v2164_v39 = vsub.f32 %v1524_v26, %v6902_v38  ;;  %v6942_v41 = vpop.eup %5860  ;;  %v2742_v6 = vmul.f32 1.442695, %v2429_v7  ;;  %v6951_v20 = vpop.permute.xlu1 %1868  ;;  %v5675_v30 = vld [vmem:[%s6489_s29 + $0x80] sm:$0xff] }
 0x12f   : > { %v2165_v42 = vsub.f32 %v1525_v34, %v6902_v38  ;;  %v2166_v37 = vsub.f32 %v1526_v32, %v1864_v9  ;;  %9078 = vst [vmem:[#allocation32_spill] sm:$0xff] %v6942_v41  ;;  %v6944_v44 = vpop.eup %5862  ;;  %5868 = vpow2.f32 %v2740_v56 }
 0x130   : > { %v2167_v1 = vsub.f32 %v1527_v31, %v1864_v9  ;;  %9079 = vst [vmem:[#allocation33_spill] sm:$0xff] %v6944_v44  ;;  %v2430_v4 = vsub.f32 %v2164_v39, %v6603_v14  ;;  %5870 = vpow2.f32 %v2742_v6 }
 0x131   : > { %v2432_v22 = vsub.f32 %v2166_v37, %v6593_v60  ;;  %v2431_v34 = vsub.f32 %v2165_v42, %v6605_v16 }
 0x132   : > { %v2433_v45 = vsub.f32 %v2167_v1, %v6597_v62  ;;  %v6948_v26 = vpop.eup %5864 }
 0x133   : > { %9080 = vst [vmem:[#allocation34_spill] sm:$0xff] %v6948_v26  ;;  %v6953_v38 = vpop.eup %5866  ;;  %v2748_v32 = vmul.f32 1.442695, %v2432_v22  ;;  %v1174_v57 = vpop.f32.mrf.mxu2  ;;  %v2744_v22 = vmul.f32 1.442695, %v2430_v4  ;;  %v1758_v26 = vld [vmem:[%s6497_s18 + $0x120] sm:$0xff] }
 0x134   : > { %9081 = vst [vmem:[#allocation35_spill] sm:$0xff] %v6953_v38  ;;  %v2750_v31 = vmul.f32 1.442695, %v2433_v45  ;;  %v1343_v47 = vpop.f32.mrf.mxu3  ;;  %v1528_v37 = vmul.f32 2.0, %v1174_v57  ;;  %v839_v51 = vpop.f32.mrf.mxu0  ;;  %v2746_v40 = vmul.f32 1.442695, %v2431_v34  ;;  %1968 = vperm.xlu0 %5750, %v1758_v26  }
 0x135   : > { %v1529_v1 = vmul.f32 2.0, %v1343_v47  ;;  %v1008_v55 = vpop.f32.mrf.mxu1  ;;  %v1530_v59 = vmul.f32 2.0, %v839_v51  ;;  %5872 = vpow2.f32 %v2748_v32  ;;  %v6972_v34 = vpop.permute.xlu2 %1873 }
 0x136   : > { %v1531_v42 = vmul.f32 2.0, %v1008_v55  ;;  %v2168_v45 = vsub.f32 %v1528_v37, %v1864_v9  ;;  %5874 = vpow2.f32 %v2750_v31  ;;  %v1756_v55 = vld [vmem:[%s6497_s18 + $0x110] sm:$0xff] }
 0x137   : > { %v2169_v2 = vsub.f32 %v1529_v1, %v1864_v9  ;;  %5413 = vmatmul.msk.bf16.gmra.mxu0 %vm680_vm2, %v5675_v30  ;;  %5445 = vmatmul.msk.bf16.gmra.mxu1 %vm680_vm2, %v5675_v30  ;;  %v2170_v47 = vsub.f32 %v1530_v59, %v6951_v20  ;;  %v6970_v9 = vpop.eup %5868  ;;  %5876 = vpow2.f32 %v2744_v22 }
 0x138   : > { %v2434_v56 = vsub.f32 %v2168_v45, %v6603_v14  ;;  %5477 = vmatmul.msk.bf16.gmra.mxu2 %vm680_vm2, %v5675_v30  ;;  %5509 = vmatmul.msk.bf16.gmra.mxu3 %vm680_vm2, %v5675_v30  ;;  %v2171_v51 = vsub.f32 %v1531_v42, %v6951_v20  ;;  %9082 = vst [vmem:[#allocation36_spill] sm:$0xff] %v6970_v9  ;;  %v6974_v59 = vpop.eup %5870  ;;  %5878 = vpow2.f32 %v2746_v40  ;;  %v1754_v40 = vld [vmem:[%s6497_s18 + $0x100] sm:$0xff] }
 0x139   : > { %v2435_v57 = vsub.f32 %v2169_v2, %v6605_v16  ;;  %1958 = vperm.xlu1 %5751, %v1756_v55   ;;  %9083 = vst [vmem:[#allocation37_spill] sm:$0xff] %v6974_v59  ;;  %v2436_v2 = vsub.f32 %v2170_v47, %v6593_v60  ;;  %1948 = vperm.xlu2 %5752, %v1754_v40   ;;  %v1761_v40 = vld [vmem:[%s6497_s18 + $0x138] sm:$0xff] }
 0x13a   : > { %v2752_v6 = vmul.f32 1.442695, %v2434_v56  ;;  %v2437_v30 = vsub.f32 %v2171_v51, %v6597_v62 }
 0x13b   : > { %v2754_v4 = vmul.f32 1.442695, %v2435_v57  ;;  %v1177_v32 = vpop.f32.mrf.mxu2  ;;  %v6977_v37 = vpop.eup %5872  ;;  %v2756_v7 = vmul.f32 1.442695, %v2436_v2 }
 0x13c   : > { %v1346_v31 = vpop.f32.mrf.mxu3  ;;  %9084 = vst [vmem:[#allocation38_spill] sm:$0xff] %v6977_v37  ;;  %5880 = vpow2.f32 %v2752_v6  ;;  %v1532_v1 = vmul.f32 2.0, %v1177_v32  ;;  %v841_v22 = vpop.f32.mrf.mxu0  ;;  %1983 = vperm.xlu0 %5750, %v1761_v40  }
 0x13d   : > { %v1533_v42 = vmul.f32 2.0, %v1346_v31  ;;  %v1010_v45 = vpop.f32.mrf.mxu1  ;;  %v6980_v56 = vpop.eup %5874  ;;  %5882 = vpow2.f32 %v2754_v4  ;;  %v1534_v57 = vmul.f32 2.0, %v841_v22  ;;  %v2758_v22 = vmul.f32 1.442695, %v2437_v30 }
 0x13e   : > { %9085 = vst [vmem:[#allocation39_spill] sm:$0xff] %v6980_v56  ;;  %v1535_v55 = vmul.f32 2.0, %v1010_v45  ;;  %v2172_v47 = vsub.f32 %v1532_v1, %v6951_v20  ;;  %v6990_v39 = vpop.eup %5876  ;;  %5884 = vpow2.f32 %v2756_v7 }
 0x13f   : > { %v2173_v51 = vsub.f32 %v1533_v42, %v6951_v20  ;;  %v2174_v32 = vsub.f32 %v1534_v57, %v6972_v34  ;;  %9086 = vst [vmem:[#allocation40_spill] sm:$0xff] %v6990_v39  ;;  %v6992_v4 = vpop.eup %5878  ;;  %v7000_v42 = vpop.permute.xlu0 %1878  ;;  %5886 = vpow2.f32 %v2758_v22 }
 0x140   : > { %v2175_v31 = vsub.f32 %v1535_v55, %v6972_v34  ;;  %9087 = vst [vmem:[#allocation41_spill] sm:$0xff] %v6992_v4  ;;  %v2438_v20 = vsub.f32 %v2172_v47, %v6603_v14 }
 0x141   : > { %v2440_v45 = vsub.f32 %v2174_v32, %v6593_v60  ;;  %v2439_v2 = vsub.f32 %v2173_v51, %v6605_v16  ;;  %v5676_v32 = vld [vmem:[%s6489_s29 + $0x88] sm:$0xff] }
 0x142   : > { %v2441_v1 = vsub.f32 %v2175_v31, %v6597_v62  ;;  %v6997_v9 = vpop.eup %5880 }
 0x143   : > { %9088 = vst [vmem:[#allocation42_spill] sm:$0xff] %v6997_v9  ;;  %v7002_v57 = vpop.eup %5882  ;;  %v2764_v55 = vmul.f32 1.442695, %v2440_v45  ;;  %v1179_v59 = vpop.f32.mrf.mxu2  ;;  %v2760_v45 = vmul.f32 1.442695, %v2438_v20 }
 0x144   : > { %9089 = vst [vmem:[#allocation43_spill] sm:$0xff] %v7002_v57  ;;  %v2766_v6 = vmul.f32 1.442695, %v2441_v1  ;;  %v1348_v30 = vpop.f32.mrf.mxu3  ;;  %v1536_v56 = vmul.f32 2.0, %v1179_v59  ;;  %v844_v47 = vpop.f32.mrf.mxu0  ;;  %v2762_v35 = vmul.f32 1.442695, %v2439_v2 }
 0x145   : > { %v1537_v37 = vmul.f32 2.0, %v1348_v30  ;;  %v1013_v44 = vpop.f32.mrf.mxu1  ;;  %v1538_v38 = vmul.f32 2.0, %v844_v47  ;;  %5888 = vpow2.f32 %v2764_v55 }
 0x146   : > { %v1539_v51 = vmul.f32 2.0, %v1013_v44  ;;  %v2176_v1 = vsub.f32 %v1536_v56, %v6972_v34  ;;  %5890 = vpow2.f32 %v2766_v6  ;;  %v7023_v6 = vpop.permute.xlu1 %1883 }
 0x147   : > { %v2177_v41 = vsub.f32 %v1537_v37, %v6972_v34  ;;  %5414 = vmatmul.msk.bf16.gmra.mxu0 %vm680_vm2, %v5676_v32  ;;  %5446 = vmatmul.msk.bf16.gmra.mxu1 %vm680_vm2, %v5676_v32  ;;  %v2178_v7 = vsub.f32 %v1538_v38, %v7000_v42  ;;  %v7021_v34 = vpop.eup %5884  ;;  %5892 = vpow2.f32 %v2760_v45 }
 0x148   : > { %v2442_v59 = vsub.f32 %v2176_v1, %v6603_v14  ;;  %5478 = vmatmul.msk.bf16.gmra.mxu2 %vm680_vm2, %v5676_v32  ;;  %5510 = vmatmul.msk.bf16.gmra.mxu3 %vm680_vm2, %v5676_v32  ;;  %v2179_v44 = vsub.f32 %v1539_v51, %v7000_v42  ;;  %9090 = vst [vmem:[#allocation44_spill] sm:$0xff] %v7021_v34  ;;  %v7025_v20 = vpop.eup %5886  ;;  %5894 = vpow2.f32 %v2762_v35  ;;  %v1759_v35 = vld [vmem:[%s6497_s18 + $0x128] sm:$0xff] }
 0x149   : > { %v2443_v22 = vsub.f32 %v2177_v41, %v6605_v16  ;;  %9091 = vst [vmem:[#allocation45_spill] sm:$0xff] %v7025_v20  ;;  %v2444_v41 = vsub.f32 %v2178_v7, %v6593_v60  ;;  %1973 = vperm.xlu1 %5751, %v1759_v35  }
 0x14a   : > { %v2768_v37 = vmul.f32 1.442695, %v2442_v59  ;;  %v2445_v26 = vsub.f32 %v2179_v44, %v6597_v62 }
 0x14b   : > { %v2770_v56 = vmul.f32 1.442695, %v2443_v22  ;;  %v1182_v38 = vpop.f32.mrf.mxu2  ;;  %v7028_v55 = vpop.eup %5888 }
 0x14c   : > { %v1351_v2 = vpop.f32.mrf.mxu3  ;;  %9092 = vst [vmem:[#allocation46_spill] sm:$0xff] %v7028_v55  ;;  %5896 = vpow2.f32 %v2768_v37  ;;  %v1540_v30 = vmul.f32 2.0, %v1182_v38  ;;  %v846_v47 = vpop.f32.mrf.mxu0  ;;  %v2774_v7 = vmul.f32 1.442695, %v2445_v26 }
 0x14d   : > { %v1541_v32 = vmul.f32 2.0, %v1351_v2  ;;  %v1015_v51 = vpop.f32.mrf.mxu1  ;;  %v7031_v45 = vpop.eup %5890  ;;  %5898 = vpow2.f32 %v2770_v56  ;;  %v1542_v1 = vmul.f32 2.0, %v846_v47  ;;  %v2772_v47 = vmul.f32 1.442695, %v2444_v41 }
 0x14e   : > { %9093 = vst [vmem:[#allocation47_spill] sm:$0xff] %v7031_v45  ;;  %v1543_v59 = vmul.f32 2.0, %v1015_v51  ;;  %v2180_v22 = vsub.f32 %v1540_v30, %v7000_v42  ;;  %v7043_v56 = vpop.eup %5892  ;;  %v5677_v45 = vld [vmem:[%s6489_s29 + $0x90] sm:$0xff] }
 0x14f   : > { %v2181_v37 = vsub.f32 %v1541_v32, %v7000_v42  ;;  %v2182_v38 = vsub.f32 %v1542_v1, %v7023_v6  ;;  %9094 = vst [vmem:[#allocation48_spill] sm:$0xff] %v7043_v56  ;;  %v7045_v51 = vpop.eup %5894  ;;  %v7052_v32 = vpop.permute.xlu2 %1888  ;;  %5900 = vpow2.f32 %v2772_v47 }
 0x150   : > { %v2183_v2 = vsub.f32 %v1543_v59, %v7023_v6  ;;  %9095 = vst [vmem:[#allocation49_spill] sm:$0xff] %v7045_v51  ;;  %v2446_v42 = vsub.f32 %v2180_v22, %v6603_v14  ;;  %5902 = vpow2.f32 %v2774_v7  ;;  %v1767_v51 = vld [vmem:[%s6497_s18 + $0x168] sm:$0xff] }
 0x151   : > { %v2448_v30 = vsub.f32 %v2182_v38, %v6593_v60  ;;  %v2447_v59 = vsub.f32 %v2181_v37, %v6605_v16  ;;  %v1764_v38 = vld [vmem:[%s6497_s18 + $0x150] sm:$0xff] }
 0x152   : > { %v2449_v35 = vsub.f32 %v2183_v2, %v6597_v62  ;;  %v7049_v31 = vpop.eup %5896  ;;  %1998 = vperm.xlu0 %5750, %v1764_v38  }
 0x153   : > { %9096 = vst [vmem:[#allocation50_spill] sm:$0xff] %v7049_v31  ;;  %v7054_v1 = vpop.eup %5898  ;;  %v2780_v41 = vmul.f32 1.442695, %v2448_v30  ;;  %v1184_v20 = vpop.f32.mrf.mxu2  ;;  %v1757_v30 = vld [vmem:[%s6497_s18 + $0x118] sm:$0xff]  ;;  %v2778_v47 = vmul.f32 1.442695, %v2447_v59 }
 0x154   : > { %9097 = vst [vmem:[#allocation51_spill] sm:$0xff] %v7054_v1  ;;  %v2782_v44 = vmul.f32 1.442695, %v2449_v35  ;;  %v1353_v26 = vpop.f32.mrf.mxu3  ;;  %v1544_v40 = vmul.f32 2.0, %v1184_v20  ;;  %v849_v22 = vpop.f32.mrf.mxu0  ;;  %v2776_v35 = vmul.f32 1.442695, %v2446_v42  ;;  %1963 = vperm.xlu2 %5752, %v1757_v30  }
 0x155   : > { %v1545_v2 = vmul.f32 2.0, %v1353_v26  ;;  %v1018_v34 = vpop.f32.mrf.mxu1  ;;  %v1546_v37 = vmul.f32 2.0, %v849_v22  ;;  %5904 = vpow2.f32 %v2780_v41  ;;  %v7074_v42 = vpop.eup %5900  ;;  %v5701_v1 = vld [vmem:[%s6513_s23 + $0x50] sm:$0xff] }
 0x156   : > { %v1547_v4 = vmul.f32 2.0, %v1018_v34  ;;  %v2184_v57 = vsub.f32 %v1544_v40, %v7023_v6  ;;  %5906 = vpow2.f32 %v2782_v44  ;;  %9098 = vst [vmem:[#allocation52_spill] sm:$0xff] %v7074_v42  ;;  %v7076_v41 = vpop.permute.xlu0 %1893  ;;  %v7078_v26 = vpop.eup %5902  ;;  %3698 = vmatpush.bf16.msrb.mxu1 %v5701_v1 }
 0x157   : > { %v2185_v39 = vsub.f32 %v1545_v2, %v7023_v6  ;;  %5415 = vmatmul.msk.bf16.gmra.mxu0 %vm680_vm2, %v5677_v45  ;;  %5447 = vmatmul.msk.bf16.gmra.mxu1 %vm680_vm2, %v5677_v45  ;;  %v2186_v20 = vsub.f32 %v1546_v37, %v7052_v32  ;;  %5908 = vpow2.f32 %v2776_v35  ;;  %9099 = vst [vmem:[#allocation53_spill] sm:$0xff] %v7078_v26 }
 0x158   : > { %v2450_v7 = vsub.f32 %v2184_v57, %v6603_v14  ;;  %5479 = vmatmul.msk.bf16.gmra.mxu2 %vm680_vm2, %v5677_v45  ;;  %5511 = vmatmul.msk.bf16.gmra.mxu3 %vm680_vm2, %v5677_v45  ;;  %v2187_v6 = vsub.f32 %v1547_v4, %v7052_v32  ;;  %5910 = vpow2.f32 %v2778_v47 }
 0x159   : > { %v2451_v34 = vsub.f32 %v2185_v39, %v6605_v16  ;;  %v2452_v39 = vsub.f32 %v2186_v20, %v6593_v60 }
 0x15a   : > { %v2784_v44 = vmul.f32 1.442695, %v2450_v7  ;;  %v2453_v4 = vsub.f32 %v2187_v6, %v6597_v62  ;;  %v5709_v7 = vld [vmem:[%s6513_s23 + $0x90] sm:$0xff]  ;;  %2013 = vperm.xlu0 %5750, %v1767_v51   ;;  %v1773_v51 = vld [vmem:[%s6497_s18 + $0x198] sm:$0xff] }
 0x15b   : > { %v2786_v59 = vmul.f32 1.442695, %v2451_v34  ;;  %v1187_v57 = vpop.f32.mrf.mxu2  ;;  %v7081_v45 = vpop.eup %5904  ;;  %v5717_v34 = vld [vmem:[%s6513_s23 + $0xd0] sm:$0xff]  ;;  %3867 = vmatpush.bf16.msrb.mxu2 %v5709_v7 }
 0x15c   : > { %v1356_v40 = vpop.f32.mrf.mxu3  ;;  %9100 = vst [vmem:[#allocation54_spill] sm:$0xff] %v7081_v45  ;;  %5912 = vpow2.f32 %v2784_v44  ;;  %v1548_v38 = vmul.f32 2.0, %v1187_v57  ;;  %v851_v22 = vpop.f32.mrf.mxu0  ;;  %4036 = vmatpush.bf16.msrb.mxu3 %v5717_v34  ;;  %v2790_v20 = vmul.f32 1.442695, %v2453_v4  ;;  %v1762_v45 = vld [vmem:[%s6497_s18 + $0x140] sm:$0xff] }
 0x15d   : > { %v1549_v2 = vmul.f32 2.0, %v1356_v40  ;;  %v1020_v37 = vpop.f32.mrf.mxu1  ;;  %v7084_v30 = vpop.eup %5906  ;;  %5914 = vpow2.f32 %v2786_v59  ;;  %v1550_v35 = vmul.f32 2.0, %v851_v22  ;;  %v2788_v22 = vmul.f32 1.442695, %v2452_v39  ;;  %1988 = vperm.xlu1 %5751, %v1762_v45  }
 0x15e   : > { %9101 = vst [vmem:[#allocation55_spill] sm:$0xff] %v7084_v30  ;;  %v1551_v47 = vmul.f32 2.0, %v1020_v37  ;;  %v2188_v55 = vsub.f32 %v1548_v38, %v7052_v32  ;;  %v7097_v59 = vpop.eup %5908 }
 0x15f   : > { %v2189_v44 = vsub.f32 %v1549_v2, %v7052_v32  ;;  %v2190_v57 = vsub.f32 %v1550_v35, %v7076_v41  ;;  %9102 = vst [vmem:[#allocation56_spill] sm:$0xff] %v7097_v59  ;;  %v7099_v37 = vpop.eup %5910  ;;  %v7106_v2 = vpop.permute.xlu1 %1898  ;;  %5916 = vpow2.f32 %v2788_v22 }
 0x160   : > { %v2191_v40 = vsub.f32 %v1551_v47, %v7076_v41  ;;  %9103 = vst [vmem:[#allocation57_spill] sm:$0xff] %v7099_v37  ;;  %v2454_v32 = vsub.f32 %v2188_v55, %v6603_v14  ;;  %5918 = vpow2.f32 %v2790_v20  ;;  %v1770_v20 = vld [vmem:[%s6497_s18 + $0x180] sm:$0xff] }
 0x161   : > { %v2456_v38 = vsub.f32 %v2190_v57, %v6593_v60  ;;  %v2455_v47 = vsub.f32 %v2189_v44, %v6605_v16  ;;  %v5678_v57 = vld [vmem:[%s6489_s29 + $0x98] sm:$0xff] }
 0x162   : > { %v2457_v42 = vsub.f32 %v2191_v40, %v6597_v62  ;;  %v7103_v6 = vpop.eup %5912  ;;  %v2792_v56 = vmul.f32 1.442695, %v2454_v32  ;;  %2028 = vperm.xlu0 %5750, %v1770_v20  }
 0x163   : > { %9104 = vst [vmem:[#allocation58_spill] sm:$0xff] %v7103_v6  ;;  %v7108_v35 = vpop.eup %5914  ;;  %v2796_v39 = vmul.f32 1.442695, %v2456_v38  ;;  %v1189_v4 = vpop.f32.mrf.mxu2  ;;  %v1766_v6 = vld [vmem:[%s6497_s18 + $0x160] sm:$0xff] }
 0x164   : > { %9105 = vst [vmem:[#allocation59_spill] sm:$0xff] %v7108_v35  ;;  %v2798_v7 = vmul.f32 1.442695, %v2457_v42  ;;  %v1358_v34 = vpop.f32.mrf.mxu3  ;;  %v1552_v40 = vmul.f32 2.0, %v1189_v4  ;;  %v854_v55 = vpop.f32.mrf.mxu0  ;;  %v5693_v42 = vld [vmem:[%s6513_s23 + $0x10] sm:$0xff] }
 0x165   : > { %v1553_v26 = vmul.f32 2.0, %v1358_v34  ;;  %v1023_v30 = vpop.f32.mrf.mxu1  ;;  %v1554_v44 = vmul.f32 2.0, %v854_v55  ;;  %5920 = vpow2.f32 %v2796_v39  ;;  %v2794_v4 = vmul.f32 1.442695, %v2455_v47  ;;  %3529 = vmatpush.bf16.msrb.mxu0 %v5693_v42  ;;  %v7132_v39 = vpop.permute.xlu2 %1903 }
 0x166   : > { %v1555_v38 = vmul.f32 2.0, %v1023_v30  ;;  %v2192_v31 = vsub.f32 %v1552_v40, %v7076_v41  ;;  %5922 = vpow2.f32 %v2798_v7 }
 0x167   : > { %v2193_v22 = vsub.f32 %v1553_v26, %v7076_v41  ;;  %5416 = vmatmul.msk.bf16.gmra.mxu0 %vm680_vm2, %v5678_v57  ;;  %5448 = vmatmul.msk.bf16.gmra.mxu1 %vm680_vm2, %v5678_v57  ;;  %v2194_v34 = vsub.f32 %v1554_v44, %v7106_v2  ;;  %v7130_v26 = vpop.eup %5916  ;;  %5924 = vpow2.f32 %v2792_v56 }
 0x168   : > { %v2458_v30 = vsub.f32 %v2192_v31, %v6603_v14  ;;  %5480 = vmatmul.msk.bf16.gmra.mxu2 %vm680_vm2, %v5678_v57  ;;  %5512 = vmatmul.msk.bf16.gmra.mxu3 %vm680_vm2, %v5678_v57  ;;  %v2195_v41 = vsub.f32 %v1555_v38, %v7106_v2  ;;  %9106 = vst [vmem:[#allocation60_spill] sm:$0xff] %v7130_v26  ;;  %v7134_v31 = vpop.eup %5918  ;;  %5926 = vpow2.f32 %v2794_v4 }
 0x169   : > { %v2459_v55 = vsub.f32 %v2193_v22, %v6605_v16  ;;  %9107 = vst [vmem:[#allocation61_spill] sm:$0xff] %v7134_v31  ;;  %v2460_v7 = vsub.f32 %v2194_v34, %v6593_v60 }
 0x16a   : > { %v2800_v32 = vmul.f32 1.442695, %v2458_v30  ;;  %v2461_v1 = vsub.f32 %v2195_v41, %v6597_v62  ;;  %2043 = vperm.xlu0 %5750, %v1773_v51  }
 0x16b   : > { %v2802_v47 = vmul.f32 1.442695, %v2459_v55  ;;  %v1192_v40 = vpop.f32.mrf.mxu2  ;;  %v7137_v44 = vpop.eup %5920  ;;  %v1760_v55 = vld [vmem:[%s6497_s18 + $0x130] sm:$0xff] }
 0x16c   : > { %v1361_v57 = vpop.f32.mrf.mxu3  ;;  %9108 = vst [vmem:[#allocation62_spill] sm:$0xff] %v7137_v44  ;;  %5928 = vpow2.f32 %v2800_v32  ;;  %v1556_v56 = vmul.f32 2.0, %v1192_v40  ;;  %v856_v42 = vpop.f32.mrf.mxu0  ;;  %v2806_v34 = vmul.f32 1.442695, %v2461_v1  ;;  %1978 = vperm.xlu2 %5752, %v1760_v55  }
 0x16d   : > { %v1557_v38 = vmul.f32 2.0, %v1361_v57  ;;  %v1025_v22 = vpop.f32.mrf.mxu1  ;;  %v7140_v45 = vpop.eup %5922  ;;  %5930 = vpow2.f32 %v2802_v47  ;;  %v1558_v20 = vmul.f32 2.0, %v856_v42  ;;  %v1765_v57 = vld [vmem:[%s6497_s18 + $0x158] sm:$0xff]  ;;  %v2804_v42 = vmul.f32 1.442695, %v2460_v7 }
 0x16e   : > { %9109 = vst [vmem:[#allocation63_spill] sm:$0xff] %v7140_v45  ;;  %v1559_v4 = vmul.f32 2.0, %v1025_v22  ;;  %v2196_v30 = vsub.f32 %v1556_v56, %v7106_v2  ;;  %v7152_v47 = vpop.eup %5924  ;;  %2003 = vperm.xlu1 %5751, %v1765_v57   ;;  %v1771_v57 = vld [vmem:[%s6497_s18 + $0x188] sm:$0xff] }
 0x16f   : > { %v2197_v41 = vsub.f32 %v1557_v38, %v7106_v2  ;;  %v2198_v32 = vsub.f32 %v1558_v20, %v7132_v39  ;;  %9110 = vst [vmem:[#allocation64_spill] sm:$0xff] %v7152_v47  ;;  %v7154_v22 = vpop.eup %5926  ;;  %v7162_v38 = vpop.permute.xlu0 %1908  ;;  %5932 = vpow2.f32 %v2804_v42  ;;  %v1768_v42 = vld [vmem:[%s6497_s18 + $0x170] sm:$0xff] }
 0x170   : > { %v2199_v40 = vsub.f32 %v1559_v4, %v7132_v39  ;;  %9111 = vst [vmem:[#allocation65_spill] sm:$0xff] %v7154_v22  ;;  %v2462_v2 = vsub.f32 %v2196_v30, %v6603_v14  ;;  %5934 = vpow2.f32 %v2806_v34  ;;  %v1779_v22 = vld [vmem:[%s6497_s18 + $0x1c8] sm:$0xff] }
 0x171   : > { %v2464_v56 = vsub.f32 %v2198_v32, %v6593_v60  ;;  %v2463_v7 = vsub.f32 %v2197_v41, %v6605_v16  ;;  %v5679_v32 = vld [vmem:[%s6489_s29 + $0xa0] sm:$0xff] }
 0x172   : > { %v2465_v26 = vsub.f32 %v2199_v40, %v6597_v62  ;;  %v7159_v31 = vpop.eup %5928 }
 0x173   : > { %9112 = vst [vmem:[#allocation66_spill] sm:$0xff] %v7159_v31  ;;  %v7164_v20 = vpop.eup %5930  ;;  %v2812_v4 = vmul.f32 1.442695, %v2464_v56  ;;  %v1194_v1 = vpop.f32.mrf.mxu2  ;;  %v2808_v56 = vmul.f32 1.442695, %v2462_v2 }
 0x174   : > { %9113 = vst [vmem:[#allocation67_spill] sm:$0xff] %v7164_v20  ;;  %v2814_v45 = vmul.f32 1.442695, %v2465_v26  ;;  %v1363_v44 = vpop.f32.mrf.mxu3  ;;  %v1560_v37 = vmul.f32 2.0, %v1194_v1  ;;  %v859_v35 = vpop.f32.mrf.mxu0  ;;  %v2810_v40 = vmul.f32 1.442695, %v2463_v7 }
 0x175   : > { %v1561_v30 = vmul.f32 2.0, %v1363_v44  ;;  %v1028_v51 = vpop.f32.mrf.mxu1  ;;  %v1562_v41 = vmul.f32 2.0, %v859_v35  ;;  %5936 = vpow2.f32 %v2812_v4  ;;  %v1776_v1 = vld [vmem:[%s6497_s18 + $0x1b0] sm:$0xff]  ;;  %v7186_v7 = vpop.permute.xlu1 %1913 }
 0x176   : > { %v1563_v26 = vmul.f32 2.0, %v1028_v51  ;;  %v2200_v55 = vsub.f32 %v1560_v37, %v7132_v39  ;;  %5938 = vpow2.f32 %v2814_v45  ;;  %2018 = vperm.xlu1 %5751, %v1768_v42   ;;  %2058 = vperm.xlu0 %5750, %v1776_v1  }
 0x177   : > { %v2201_v59 = vsub.f32 %v1561_v30, %v7132_v39  ;;  %5417 = vmatmul.msk.bf16.gmra.mxu0 %vm680_vm2, %v5679_v32  ;;  %5449 = vmatmul.msk.bf16.gmra.mxu1 %vm680_vm2, %v5679_v32  ;;  %v2202_v44 = vsub.f32 %v1562_v41, %v7162_v38  ;;  %v7184_v39 = vpop.eup %5932  ;;  %5940 = vpow2.f32 %v2808_v56 }
 0x178   : > { %v2466_v34 = vsub.f32 %v2200_v55, %v6603_v14  ;;  %5481 = vmatmul.msk.bf16.gmra.mxu2 %vm680_vm2, %v5679_v32  ;;  %5513 = vmatmul.msk.bf16.gmra.mxu3 %vm680_vm2, %v5679_v32  ;;  %v2203_v37 = vsub.f32 %v1563_v26, %v7162_v38  ;;  %9114 = vst [vmem:[#allocation68_spill] sm:$0xff] %v7184_v39  ;;  %v7188_v4 = vpop.eup %5934  ;;  %5942 = vpow2.f32 %v2810_v40 }
 0x179   : > { %v2467_v35 = vsub.f32 %v2201_v59, %v6605_v16  ;;  %9115 = vst [vmem:[#allocation69_spill] sm:$0xff] %v7188_v4  ;;  %v2468_v59 = vsub.f32 %v2202_v44, %v6593_v60 }
 0x17a   : > { %v2816_v45 = vmul.f32 1.442695, %v2466_v34  ;;  %v2469_v32 = vsub.f32 %v2203_v37, %v6597_v62 }
 0x17b   : > { %v2818_v2 = vmul.f32 1.442695, %v2467_v35  ;;  %v1197_v30 = vpop.f32.mrf.mxu2  ;;  %v7191_v41 = vpop.eup %5936 }
 0x17c   : > { %v1366_v51 = vpop.f32.mrf.mxu3  ;;  %9116 = vst [vmem:[#allocation70_spill] sm:$0xff] %v7191_v41  ;;  %5944 = vpow2.f32 %v2816_v45  ;;  %v1564_v26 = vmul.f32 2.0, %v1197_v30  ;;  %v861_v55 = vpop.f32.mrf.mxu0 }
 0x17d   : > { %v1565_v56 = vmul.f32 2.0, %v1366_v51  ;;  %v1030_v34 = vpop.f32.mrf.mxu1  ;;  %v7194_v42 = vpop.eup %5938  ;;  %5946 = vpow2.f32 %v2818_v2  ;;  %v1566_v1 = vmul.f32 2.0, %v861_v55  ;;  %v2820_v2 = vmul.f32 1.442695, %v2468_v59 }
 0x17e   : > { %9117 = vst [vmem:[#allocation71_spill] sm:$0xff] %v7194_v42  ;;  %v1567_v40 = vmul.f32 2.0, %v1030_v34  ;;  %v2204_v35 = vsub.f32 %v1564_v26, %v7162_v38  ;;  %v7206_v20 = vpop.eup %5940  ;;  %v2822_v34 = vmul.f32 1.442695, %v2469_v32  ;;  %2033 = vperm.xlu1 %5751, %v1771_v57   ;;  %2073 = vperm.xlu0 %5750, %v1779_v22   ;;  %v1777_v22 = vld [vmem:[%s6497_s18 + $0x1b8] sm:$0xff] }
 0x17f   : > { %v2205_v37 = vsub.f32 %v1565_v56, %v7162_v38  ;;  %v2206_v30 = vsub.f32 %v1566_v1, %v7186_v7  ;;  %9118 = vst [vmem:[#allocation72_spill] sm:$0xff] %v7206_v20  ;;  %v7208_v55 = vpop.eup %5942  ;;  %v7215_v56 = vpop.permute.xlu2 %1918  ;;  %5948 = vpow2.f32 %v2820_v2 }
 0x180   : > { %v2207_v51 = vsub.f32 %v1567_v40, %v7186_v7  ;;  %9119 = vst [vmem:[#allocation73_spill] sm:$0xff] %v7208_v55  ;;  %v2470_v38 = vsub.f32 %v2204_v35, %v6603_v14  ;;  %5950 = vpow2.f32 %v2822_v34  ;;  %v1782_v34 = vld [vmem:[%s6497_s18 + $0x1e0] sm:$0xff]  ;;  %v1785_v55 = vld [vmem:[%s6497_s18 + $0x1f8] sm:$0xff] }
 0x181   : > { %v2472_v26 = vsub.f32 %v2206_v30, %v6593_v60  ;;  %v2471_v59 = vsub.f32 %v2205_v37, %v6605_v16  ;;  %v5680_v30 = vld [vmem:[%s6489_s29 + $0xa8] sm:$0xff] }
 0x182   : > { %v2473_v44 = vsub.f32 %v2207_v51, %v6597_v62  ;;  %v7212_v45 = vpop.eup %5944 }
 0x183   : > { %9120 = vst [vmem:[#allocation74_spill] sm:$0xff] %v7212_v45  ;;  %v7217_v1 = vpop.eup %5946  ;;  %v2828_v40 = vmul.f32 1.442695, %v2472_v26  ;;  %v1199_v32 = vpop.f32.mrf.mxu2  ;;  %v2824_v26 = vmul.f32 1.442695, %v2470_v38 }
 0x184   : > { %9121 = vst [vmem:[#allocation75_spill] sm:$0xff] %v7217_v1  ;;  %v2830_v4 = vmul.f32 1.442695, %v2473_v44  ;;  %v1368_v42 = vpop.f32.mrf.mxu3  ;;  %v1568_v39 = vmul.f32 2.0, %v1199_v32  ;;  %v864_v41 = vpop.f32.mrf.mxu0  ;;  %v1763_v44 = vld [vmem:[%s6497_s18 + $0x148] sm:$0xff]  ;;  %v1774_v32 = vld [vmem:[%s6497_s18 + $0x1a0] sm:$0xff] }
 0x185   : > { %v1569_v35 = vmul.f32 2.0, %v1368_v42  ;;  %v1033_v47 = vpop.f32.mrf.mxu1  ;;  %v1570_v57 = vmul.f32 2.0, %v864_v41  ;;  %5952 = vpow2.f32 %v2828_v40  ;;  %1993 = vperm.xlu2 %5752, %v1763_v44   ;;  %v2826_v2 = vmul.f32 1.442695, %v2471_v59  ;;  %v7240_v59 = vpop.permute.xlu0 %1923 }
 0x186   : > { %v1571_v37 = vmul.f32 2.0, %v1033_v47  ;;  %v2208_v31 = vsub.f32 %v1568_v39, %v7186_v7  ;;  %5954 = vpow2.f32 %v2830_v4  ;;  %2048 = vperm.xlu1 %5751, %v1774_v32   ;;  %2088 = vperm.xlu0 %5750, %v1782_v34  }
 0x187   : > { %v2209_v51 = vsub.f32 %v1569_v35, %v7186_v7  ;;  %5418 = vmatmul.msk.bf16.gmra.mxu0 %vm680_vm2, %v5680_v30  ;;  %5450 = vmatmul.msk.bf16.gmra.mxu1 %vm680_vm2, %v5680_v30  ;;  %v2210_v42 = vsub.f32 %v1570_v57, %v7215_v56  ;;  %v7238_v7 = vpop.eup %5948  ;;  %5956 = vpow2.f32 %v2824_v26 }
 0x188   : > { %v2474_v47 = vsub.f32 %v2208_v31, %v6603_v14  ;;  %5482 = vmatmul.msk.bf16.gmra.mxu2 %vm680_vm2, %v5680_v30  ;;  %5514 = vmatmul.msk.bf16.gmra.mxu3 %vm680_vm2, %v5680_v30  ;;  %v2211_v39 = vsub.f32 %v1571_v37, %v7215_v56  ;;  %9122 = vst [vmem:[#allocation76_spill] sm:$0xff] %v7238_v7  ;;  %v7242_v40 = vpop.eup %5950  ;;  %5958 = vpow2.f32 %v2826_v2 }
 0x189   : > { %v2475_v41 = vsub.f32 %v2209_v51, %v6605_v16  ;;  %9123 = vst [vmem:[#allocation77_spill] sm:$0xff] %v7242_v40  ;;  %v2476_v31 = vsub.f32 %v2210_v42, %v6593_v60 }
 0x18a   : > { %v2832_v4 = vmul.f32 1.442695, %v2474_v47  ;;  %v2477_v30 = vsub.f32 %v2211_v39, %v6597_v62 }
 0x18b   : > { %v2834_v38 = vmul.f32 1.442695, %v2475_v41  ;;  %v1202_v51 = vpop.f32.mrf.mxu2  ;;  %v7245_v57 = vpop.eup %5952 }
 0x18c   : > { %v1371_v35 = vpop.f32.mrf.mxu3  ;;  %9124 = vst [vmem:[#allocation78_spill] sm:$0xff] %v7245_v57  ;;  %5960 = vpow2.f32 %v2832_v4  ;;  %v1572_v37 = vmul.f32 2.0, %v1202_v51  ;;  %v866_v26 = vpop.f32.mrf.mxu0 }
 0x18d   : > { %v1573_v44 = vmul.f32 2.0, %v1371_v35  ;;  %v1035_v47 = vpop.f32.mrf.mxu1  ;;  %v7248_v32 = vpop.eup %5954  ;;  %5962 = vpow2.f32 %v2834_v38  ;;  %v1574_v34 = vmul.f32 2.0, %v866_v26  ;;  %v2836_v38 = vmul.f32 1.442695, %v2476_v31  ;;  %2008 = vperm.xlu2 %5752, %v1766_v6  }
 0x18e   : > { %9125 = vst [vmem:[#allocation79_spill] sm:$0xff] %v7248_v32  ;;  %v1575_v2 = vmul.f32 2.0, %v1035_v47  ;;  %v2212_v41 = vsub.f32 %v1572_v37, %v7215_v56  ;;  %v7260_v1 = vpop.eup %5956  ;;  %v2838_v47 = vmul.f32 1.442695, %v2477_v30  ;;  %2063 = vperm.xlu1 %5751, %v1777_v22   ;;  %2103 = vperm.xlu0 %5750, %v1785_v55  }
 0x18f   : > { %v2213_v39 = vsub.f32 %v1573_v44, %v7215_v56  ;;  %v2214_v51 = vsub.f32 %v1574_v34, %v7240_v59  ;;  %9126 = vst [vmem:[#allocation80_spill] sm:$0xff] %v7260_v1  ;;  %v7262_v26 = vpop.eup %5958  ;;  %v7269_v44 = vpop.permute.xlu1 %1928  ;;  %5964 = vpow2.f32 %v2836_v38  ;;  %v1780_v38 = vld [vmem:[%s6497_s18 + $0x1d0] sm:$0xff] }
 0x190   : > { %v2215_v35 = vsub.f32 %v1575_v2, %v7240_v59  ;;  %9127 = vst [vmem:[#allocation81_spill] sm:$0xff] %v7262_v26  ;;  %v2478_v56 = vsub.f32 %v2212_v41, %v6603_v14  ;;  %5966 = vpow2.f32 %v2838_v47 }
 0x191   : > { %v2480_v37 = vsub.f32 %v2214_v51, %v6593_v60  ;;  %v2479_v31 = vsub.f32 %v2213_v39, %v6605_v16  ;;  %v5681_v51 = vld [vmem:[%s6489_s29 + $0xb0] sm:$0xff] }
 0x192   : > { %v2481_v42 = vsub.f32 %v2215_v35, %v6597_v62  ;;  %v7266_v4 = vpop.eup %5960 }
 0x193   : > { %9128 = vst [vmem:[#allocation82_spill] sm:$0xff] %v7266_v4  ;;  %v7271_v34 = vpop.eup %5962  ;;  %v2844_v2 = vmul.f32 1.442695, %v2480_v37  ;;  %v1204_v32 = vpop.f32.mrf.mxu2  ;;  %v2842_v35 = vmul.f32 1.442695, %v2479_v31 }
 0x194   : > { %9129 = vst [vmem:[#allocation83_spill] sm:$0xff] %v7271_v34  ;;  %v2846_v40 = vmul.f32 1.442695, %v2481_v42  ;;  %v1373_v30 = vpop.f32.mrf.mxu3  ;;  %v1576_v7 = vmul.f32 2.0, %v1204_v32  ;;  %v869_v57 = vpop.f32.mrf.mxu0  ;;  %v2840_v42 = vmul.f32 1.442695, %v2478_v56 }
 0x195   : > { %v1577_v41 = vmul.f32 2.0, %v1373_v30  ;;  %v1038_v22 = vpop.f32.mrf.mxu1  ;;  %v1578_v39 = vmul.f32 2.0, %v869_v57  ;;  %5968 = vpow2.f32 %v2844_v2  ;;  %v7293_v31 = vpop.permute.xlu2 %1933  ;;  %v5692_v34 = vld [vmem:[%s6513_s23 + $0x8] sm:$0xff] }
 0x196   : > { %v1579_v37 = vmul.f32 2.0, %v1038_v22  ;;  %v2216_v20 = vsub.f32 %v1576_v7, %v7240_v59  ;;  %5970 = vpow2.f32 %v2846_v40  ;;  %2078 = vperm.xlu1 %5751, %v1780_v38   ;;  %3530 = vmatpush.bf16.msrb.mxu0 %v5692_v34 }
 0x197   : > { %v2217_v45 = vsub.f32 %v1577_v41, %v7240_v59  ;;  %5419 = vmatmul.msk.bf16.gmra.mxu0 %vm680_vm2, %v5681_v51  ;;  %5451 = vmatmul.msk.bf16.gmra.mxu1 %vm680_vm2, %v5681_v51  ;;  %v2218_v32 = vsub.f32 %v1578_v39, %v7269_v44  ;;  %v7291_v59 = vpop.eup %5964  ;;  %5972 = vpow2.f32 %v2840_v42 }
 0x198   : > { %v2482_v47 = vsub.f32 %v2216_v20, %v6603_v14  ;;  %5483 = vmatmul.msk.bf16.gmra.mxu2 %vm680_vm2, %v5681_v51  ;;  %5515 = vmatmul.msk.bf16.gmra.mxu3 %vm680_vm2, %v5681_v51  ;;  %v2219_v7 = vsub.f32 %v1579_v37, %v7269_v44  ;;  %9130 = vst [vmem:[#allocation84_spill] sm:$0xff] %v7291_v59  ;;  %v7295_v2 = vpop.eup %5966  ;;  %5974 = vpow2.f32 %v2842_v35 }
 0x199   : > { %v2483_v57 = vsub.f32 %v2217_v45, %v6605_v16  ;;  %9131 = vst [vmem:[#allocation85_spill] sm:$0xff] %v7295_v2  ;;  %v2484_v20 = vsub.f32 %v2218_v32, %v6593_v60  ;;  %v5716_v32 = vld [vmem:[%s6513_s23 + $0xc8] sm:$0xff]  ;;  %v5682_v2 = vld [vmem:[%s6489_s29 + $0xb8] sm:$0xff] }
 0x19a   : > { %v2848_v40 = vmul.f32 1.442695, %v2482_v47  ;;  %v2485_v6 = vsub.f32 %v2219_v7, %v6597_v62  ;;  %v5708_v47 = vld [vmem:[%s6513_s23 + $0x88] sm:$0xff]  ;;  %4037 = vmatpush.bf16.msrb.mxu3 %v5716_v32 }
 0x19b   : > { %v2850_v56 = vmul.f32 1.442695, %v2483_v57  ;;  %v1207_v45 = vpop.f32.mrf.mxu2  ;;  %v7298_v51 = vpop.eup %5968  ;;  %3868 = vmatpush.bf16.msrb.mxu2 %v5708_v47 }
 0x19c   : > { %v1376_v30 = vpop.f32.mrf.mxu3  ;;  %9132 = vst [vmem:[#allocation86_spill] sm:$0xff] %v7298_v51  ;;  %5976 = vpow2.f32 %v2848_v40  ;;  %v1580_v41 = vmul.f32 2.0, %v1207_v45  ;;  %v871_v39 = vpop.f32.mrf.mxu0  ;;  %v1769_v40 = vld [vmem:[%s6497_s18 + $0x178] sm:$0xff] }
 0x19d   : > { %v1581_v22 = vmul.f32 2.0, %v1376_v30  ;;  %v1040_v37 = vpop.f32.mrf.mxu1  ;;  %v7301_v42 = vpop.eup %5970  ;;  %5978 = vpow2.f32 %v2850_v56  ;;  %v1582_v35 = vmul.f32 2.0, %v871_v39  ;;  %v1783_v56 = vld [vmem:[%s6497_s18 + $0x1e8] sm:$0xff]  ;;  %2023 = vperm.xlu2 %5752, %v1769_v40  }
 0x19e   : > { %9133 = vst [vmem:[#allocation87_spill] sm:$0xff] %v7301_v42  ;;  %v1583_v38 = vmul.f32 2.0, %v1040_v37  ;;  %v2220_v55 = vsub.f32 %v1580_v41, %v7269_v44  ;;  %v7315_v39 = vpop.eup %5972  ;;  %v2852_v37 = vmul.f32 1.442695, %v2484_v20  ;;  %v2854_v41 = vmul.f32 1.442695, %v2485_v6  ;;  %2093 = vperm.xlu1 %5751, %v1783_v56  }
 0x19f   : > { %v2221_v45 = vsub.f32 %v1581_v22, %v7269_v44  ;;  %v2222_v30 = vsub.f32 %v1582_v35, %v7293_v31  ;;  %9134 = vst [vmem:[#allocation88_spill] sm:$0xff] %v7315_v39  ;;  %v7317_v57 = vpop.eup %5974  ;;  %v7324_v35 = vpop.permute.xlu0 %1938 }
 0x1a0   : > { %v2223_v26 = vsub.f32 %v1583_v38, %v7293_v31  ;;  %9135 = vst [vmem:[#allocation89_spill] sm:$0xff] %v7317_v57  ;;  %v2486_v22 = vsub.f32 %v2220_v55, %v6603_v14  ;;  %5980 = vpow2.f32 %v2852_v37 }
 0x1a1   : > { %v2488_v59 = vsub.f32 %v2222_v30, %v6593_v60  ;;  %v2487_v20 = vsub.f32 %v2221_v45, %v6605_v16  ;;  %5982 = vpow2.f32 %v2854_v41 }
 0x1a2   : > { %v2489_v7 = vsub.f32 %v2223_v26, %v6597_v62  ;;  %v7321_v44 = vpop.eup %5976  ;;  %v2856_v1 = vmul.f32 1.442695, %v2486_v22 }
 0x1a3   : > { %9136 = vst [vmem:[#allocation90_spill] sm:$0xff] %v7321_v44  ;;  %v7326_v38 = vpop.eup %5978  ;;  %v2860_v47 = vmul.f32 1.442695, %v2488_v59  ;;  %v1209_v32 = vpop.f32.mrf.mxu2  ;;  %v2858_v37 = vmul.f32 1.442695, %v2487_v20 }
 0x1a4   : > { %9137 = vst [vmem:[#allocation91_spill] sm:$0xff] %v7326_v38  ;;  %v2862_v6 = vmul.f32 1.442695, %v2489_v7  ;;  %v1378_v30 = vpop.f32.mrf.mxu3  ;;  %v1584_v40 = vmul.f32 2.0, %v1209_v32  ;;  %v874_v42 = vpop.f32.mrf.mxu0  ;;  %v5700_v7 = vld [vmem:[%s6513_s23 + $0x48] sm:$0xff] }
 0x1a5   : > { %v1585_v55 = vmul.f32 2.0, %v1378_v30  ;;  %v1043_v51 = vpop.f32.mrf.mxu1  ;;  %v1586_v45 = vmul.f32 2.0, %v874_v42  ;;  %5984 = vpow2.f32 %v2860_v47  ;;  %v1772_v30 = vld [vmem:[%s6497_s18 + $0x190] sm:$0xff]  ;;  %3699 = vmatpush.bf16.msrb.mxu1 %v5700_v7  ;;  %v7349_v47 = vpop.permute.xlu1 %1943 }
 0x1a6   : > { %v1587_v59 = vmul.f32 2.0, %v1043_v51  ;;  %v2224_v4 = vsub.f32 %v1584_v40, %v7293_v31  ;;  %5986 = vpow2.f32 %v2862_v6  ;;  %2038 = vperm.xlu2 %5752, %v1772_v30  }
 0x1a7   : > { %v2225_v26 = vsub.f32 %v1585_v55, %v7293_v31  ;;  %5420 = vmatmul.msk.bf16.gmra.mxu0 %vm680_vm2, %v5682_v2  ;;  %5452 = vmatmul.msk.bf16.gmra.mxu1 %vm680_vm2, %v5682_v2  ;;  %v2226_v32 = vsub.f32 %v1586_v45, %v7324_v35  ;;  %v7347_v31 = vpop.eup %5980  ;;  %5988 = vpow2.f32 %v2856_v1 }
 0x1a8   : > { %v2490_v42 = vsub.f32 %v2224_v4, %v6603_v14  ;;  %5484 = vmatmul.msk.bf16.gmra.mxu2 %vm680_vm2, %v5682_v2  ;;  %5516 = vmatmul.msk.bf16.gmra.mxu3 %vm680_vm2, %v5682_v2  ;;  %v2227_v41 = vsub.f32 %v1587_v59, %v7324_v35  ;;  %9138 = vst [vmem:[#allocation92_spill] sm:$0xff] %v7347_v31  ;;  %v7351_v6 = vpop.eup %5982  ;;  %5990 = vpow2.f32 %v2858_v37 }
 0x1a9   : > { %v2491_v51 = vsub.f32 %v2225_v26, %v6605_v16  ;;  %9139 = vst [vmem:[#allocation93_spill] sm:$0xff] %v7351_v6  ;;  %v2492_v4 = vsub.f32 %v2226_v32, %v6593_v60 }
 0x1aa   : > { %v2864_v22 = vmul.f32 1.442695, %v2490_v42  ;;  %v2493_v34 = vsub.f32 %v2227_v41, %v6597_v62 }
 0x1ab   : > { %v2866_v20 = vmul.f32 1.442695, %v2491_v51  ;;  %v1212_v26 = vpop.f32.mrf.mxu2  ;;  %v7354_v2 = vpop.eup %5984 }
 0x1ac   : > { %v1381_v40 = vpop.f32.mrf.mxu3  ;;  %9140 = vst [vmem:[#allocation94_spill] sm:$0xff] %v7354_v2  ;;  %5992 = vpow2.f32 %v2864_v22  ;;  %v1588_v55 = vmul.f32 2.0, %v1212_v26  ;;  %v876_v45 = vpop.f32.mrf.mxu0 }
 0x1ad   : > { %v1589_v1 = vmul.f32 2.0, %v1381_v40  ;;  %v1045_v59 = vpop.f32.mrf.mxu1  ;;  %v7357_v7 = vpop.eup %5986  ;;  %5994 = vpow2.f32 %v2866_v20  ;;  %v1590_v30 = vmul.f32 2.0, %v876_v45  ;;  %v1775_v40 = vld [vmem:[%s6497_s18 + $0x1a8] sm:$0xff]  ;;  %v2868_v20 = vmul.f32 1.442695, %v2492_v4 }
 0x1ae   : > { %9141 = vst [vmem:[#allocation95_spill] sm:$0xff] %v7357_v7  ;;  %v1591_v42 = vmul.f32 2.0, %v1045_v59  ;;  %v2228_v32 = vsub.f32 %v1588_v55, %v7324_v35  ;;  %v7368_v56 = vpop.eup %5988  ;;  %v2870_v59 = vmul.f32 1.442695, %v2493_v34  ;;  %2053 = vperm.xlu2 %5752, %v1775_v40   ;;  %v5683_v34 = vld [vmem:[%s6489_s29 + $0xc0] sm:$0xff] }
 0x1af   : > { %v2229_v22 = vsub.f32 %v1589_v1, %v7324_v35  ;;  %v2230_v41 = vsub.f32 %v1590_v30, %v7349_v47  ;;  %9142 = vst [vmem:[#allocation96_spill] sm:$0xff] %v7368_v56  ;;  %v7370_v45 = vpop.eup %5990  ;;  %v7377_v1 = vpop.permute.xlu2 %1948  ;;  %5996 = vpow2.f32 %v2868_v20 }
 0x1b0   : > { %v2231_v26 = vsub.f32 %v1591_v42, %v7349_v47  ;;  %9143 = vst [vmem:[#allocation97_spill] sm:$0xff] %v7370_v45  ;;  %v2494_v35 = vsub.f32 %v2228_v32, %v6603_v14  ;;  %5998 = vpow2.f32 %v2870_v59 }
 0x1b1   : > { %v2496_v37 = vsub.f32 %v2230_v41, %v6593_v60  ;;  %v2495_v42 = vsub.f32 %v2229_v22, %v6605_v16 }
 0x1b2   : > { %v2497_v55 = vsub.f32 %v2231_v26, %v6597_v62  ;;  %v7374_v31 = vpop.eup %5992 }
 0x1b3   : > { %9144 = vst [vmem:[#allocation98_spill] sm:$0xff] %v7374_v31  ;;  %v7379_v30 = vpop.eup %5994  ;;  %v2876_v51 = vmul.f32 1.442695, %v2496_v37  ;;  %v1214_v6 = vpop.f32.mrf.mxu2  ;;  %v2872_v37 = vmul.f32 1.442695, %v2494_v35 }
 0x1b4   : > { %9145 = vst [vmem:[#allocation99_spill] sm:$0xff] %v7379_v30  ;;  %v2878_v4 = vmul.f32 1.442695, %v2497_v55  ;;  %v1383_v7 = vpop.f32.mrf.mxu3  ;;  %v1592_v26 = vmul.f32 2.0, %v1214_v6  ;;  %v879_v32 = vpop.f32.mrf.mxu0  ;;  %v2874_v44 = vmul.f32 1.442695, %v2495_v42 }
 0x1b5   : > { %v1593_v2 = vmul.f32 2.0, %v1383_v7  ;;  %v1048_v57 = vpop.f32.mrf.mxu1  ;;  %v1594_v38 = vmul.f32 2.0, %v879_v32  ;;  %6000 = vpow2.f32 %v2876_v51  ;;  %v1778_v7 = vld [vmem:[%s6497_s18 + $0x1c0] sm:$0xff]  ;;  %v7400_v35 = vpop.permute.xlu0 %1953 }
 0x1b6   : > { %v1595_v22 = vmul.f32 2.0, %v1048_v57  ;;  %v2232_v55 = vsub.f32 %v1592_v26, %v7349_v47  ;;  %6002 = vpow2.f32 %v2878_v4  ;;  %2068 = vperm.xlu2 %5752, %v1778_v7  }
 0x1b7   : > { %v2233_v39 = vsub.f32 %v1593_v2, %v7349_v47  ;;  %5421 = vmatmul.msk.bf16.gmra.mxu0 %vm680_vm2, %v5683_v34  ;;  %5453 = vmatmul.msk.bf16.gmra.mxu1 %vm680_vm2, %v5683_v34  ;;  %v2234_v6 = vsub.f32 %v1594_v38, %v7377_v1  ;;  %v7398_v47 = vpop.eup %5996  ;;  %6004 = vpow2.f32 %v2872_v37 }
 0x1b8   : > { %v2498_v20 = vsub.f32 %v2232_v55, %v6603_v14  ;;  %5485 = vmatmul.msk.bf16.gmra.mxu2 %vm680_vm2, %v5683_v34  ;;  %5517 = vmatmul.msk.bf16.gmra.mxu3 %vm680_vm2, %v5683_v34  ;;  %v2235_v57 = vsub.f32 %v1595_v22, %v7377_v1  ;;  %9146 = vst [vmem:[#allocation100_spill] sm:$0xff] %v7398_v47  ;;  %v7402_v38 = vpop.eup %5998  ;;  %6006 = vpow2.f32 %v2874_v44 }
 0x1b9   : > { %v2499_v59 = vsub.f32 %v2233_v39, %v6605_v16  ;;  %9147 = vst [vmem:[#allocation101_spill] sm:$0xff] %v7402_v38  ;;  %v2500_v42 = vsub.f32 %v2234_v6, %v6593_v60 }
 0x1ba   : > { %v2880_v2 = vmul.f32 1.442695, %v2498_v20  ;;  %v2501_v34 = vsub.f32 %v2235_v57, %v6597_v62 }
 0x1bb   : > { %v2882_v51 = vmul.f32 1.442695, %v2499_v59  ;;  %v1217_v39 = vpop.f32.mrf.mxu2  ;;  %v7405_v26 = vpop.eup %6000 }
 0x1bc   : > { %v1386_v4 = vpop.f32.mrf.mxu3  ;;  %9148 = vst [vmem:[#allocation102_spill] sm:$0xff] %v7405_v26  ;;  %6008 = vpow2.f32 %v2880_v2  ;;  %v1596_v32 = vmul.f32 2.0, %v1217_v39  ;;  %v881_v37 = vpop.f32.mrf.mxu0 }
 0x1bd   : > { %v1597_v22 = vmul.f32 2.0, %v1386_v4  ;;  %v1050_v55 = vpop.f32.mrf.mxu1  ;;  %v7408_v20 = vpop.eup %6002  ;;  %6010 = vpow2.f32 %v2882_v51  ;;  %v1598_v7 = vmul.f32 2.0, %v881_v37  ;;  %v1781_v4 = vld [vmem:[%s6497_s18 + $0x1d8] sm:$0xff]  ;;  %v2884_v51 = vmul.f32 1.442695, %v2500_v42 }
 0x1be   : > { %9149 = vst [vmem:[#allocation103_spill] sm:$0xff] %v7408_v20  ;;  %v1599_v59 = vmul.f32 2.0, %v1050_v55  ;;  %v2236_v6 = vsub.f32 %v1596_v32, %v7377_v1  ;;  %v7419_v41 = vpop.eup %6004  ;;  %v2886_v55 = vmul.f32 1.442695, %v2501_v34  ;;  %2083 = vperm.xlu2 %5752, %v1781_v4   ;;  %v5684_v34 = vld [vmem:[%s6489_s29 + $0xc8] sm:$0xff] }
 0x1bf   : > { %v2237_v40 = vsub.f32 %v1597_v22, %v7377_v1  ;;  %v2238_v57 = vsub.f32 %v1598_v7, %v7400_v35  ;;  %9150 = vst [vmem:[#allocation104_spill] sm:$0xff] %v7419_v41  ;;  %v7421_v37 = vpop.eup %6006  ;;  %v7428_v22 = vpop.permute.xlu1 %1958  ;;  %6012 = vpow2.f32 %v2884_v51 }
 0x1c0   : > { %v2239_v39 = vsub.f32 %v1599_v59, %v7400_v35  ;;  %9151 = vst [vmem:[#allocation105_spill] sm:$0xff] %v7421_v37  ;;  %v2502_v1 = vsub.f32 %v2236_v6, %v6603_v14  ;;  %6014 = vpow2.f32 %v2886_v55  ;;  %v1969_v41 = vpop.permute.xlu0 %1968 }
 0x1c1   : > { %v2504_v44 = vsub.f32 %v2238_v57, %v6593_v60  ;;  %v2503_v59 = vsub.f32 %v2237_v40, %v6605_v16 }
 0x1c2   : > { %v2505_v32 = vsub.f32 %v2239_v39, %v6597_v62  ;;  %v7425_v47 = vpop.eup %6008 }
 0x1c3   : > { %9152 = vst [vmem:[#allocation106_spill] sm:$0xff] %v7425_v47  ;;  %v7430_v7 = vpop.eup %6010  ;;  %v2892_v2 = vmul.f32 1.442695, %v2504_v44  ;;  %v1219_v38 = vpop.f32.mrf.mxu2  ;;  %v2888_v44 = vmul.f32 1.442695, %v2502_v1 }
 0x1c4   : > { %9153 = vst [vmem:[#allocation107_spill] sm:$0xff] %v7430_v7  ;;  %v2894_v42 = vmul.f32 1.442695, %v2505_v32  ;;  %v1388_v20 = vpop.f32.mrf.mxu3  ;;  %v1600_v39 = vmul.f32 2.0, %v1219_v38  ;;  %v884_v6 = vpop.f32.mrf.mxu0  ;;  %v2890_v31 = vmul.f32 1.442695, %v2503_v59 }
 0x1c5   : > { %v1601_v26 = vmul.f32 2.0, %v1388_v20  ;;  %v1053_v45 = vpop.f32.mrf.mxu1  ;;  %v1602_v30 = vmul.f32 2.0, %v884_v6  ;;  %6016 = vpow2.f32 %v2892_v2  ;;  %v1784_v20 = vld [vmem:[%s6497_s18 + $0x1f0] sm:$0xff]  ;;  %v1964_v1 = vpop.permute.xlu2 %1963  ;;  %s5130_s18 = sshll.u32 %s6412_s1, 4  ;;  %s5131_s18 = int_to_ptr.vmem [resolvable:$true] %s5130_s18 }
 0x1c6   : > { %v1603_v40 = vmul.f32 2.0, %v1053_v45  ;;  %v2240_v32 = vsub.f32 %v1600_v39, %v7400_v35  ;;  %6018 = vpow2.f32 %v2894_v42  ;;  %2098 = vperm.xlu2 %5752, %v1784_v20  }
 0x1c7   : > { %v2241_v56 = vsub.f32 %v1601_v26, %v7400_v35  ;;  %5422 = vmatmul.msk.bf16.gmra.mxu0 %vm680_vm2, %v5684_v34  ;;  %5454 = vmatmul.msk.bf16.gmra.mxu1 %vm680_vm2, %v5684_v34  ;;  %v2242_v38 = vsub.f32 %v1602_v30, %v7428_v22  ;;  %v7449_v35 = vpop.eup %6012  ;;  %6020 = vpow2.f32 %v2888_v44 }
 0x1c8   : > { %v2506_v51 = vsub.f32 %v2240_v32, %v6603_v14  ;;  %5486 = vmatmul.msk.bf16.gmra.mxu2 %vm680_vm2, %v5684_v34  ;;  %5518 = vmatmul.msk.bf16.gmra.mxu3 %vm680_vm2, %v5684_v34  ;;  %v2243_v45 = vsub.f32 %v1603_v40, %v7428_v22  ;;  %9154 = vst [vmem:[#allocation108_spill] sm:$0xff] %v7449_v35  ;;  %v7451_v59 = vpop.eup %6014  ;;  %6022 = vpow2.f32 %v2890_v31 }
 0x1c9   : > { %v2507_v55 = vsub.f32 %v2241_v56, %v6605_v16  ;;  %9155 = vst [vmem:[#allocation109_spill] sm:$0xff] %v7451_v59  ;;  %v2508_v30 = vsub.f32 %v2242_v38, %v6593_v60 }
 0x1ca   : > { %v2896_v26 = vmul.f32 1.442695, %v2506_v51  ;;  %v2509_v34 = vsub.f32 %v2243_v45, %v6597_v62 }
 0x1cb   : > { %v2898_v2 = vmul.f32 1.442695, %v2507_v55  ;;  %v1222_v42 = vpop.f32.mrf.mxu2  ;;  %v7454_v39 = vpop.eup %6016  ;;  %v2900_v57 = vmul.f32 1.442695, %v2508_v30  ;;  %v5685_v30 = vld [vmem:[%s6489_s29 + $0xd0] sm:$0xff] }
 0x1cc   : > { %v1391_v56 = vpop.f32.mrf.mxu3  ;;  %9156 = vst [vmem:[#allocation110_spill] sm:$0xff] %v7454_v39  ;;  %6024 = vpow2.f32 %v2896_v26  ;;  %v1604_v6 = vmul.f32 2.0, %v1222_v42  ;;  %v886_v32 = vpop.f32.mrf.mxu0 }
 0x1cd   : > { %v1605_v40 = vmul.f32 2.0, %v1391_v56  ;;  %v1055_v44 = vpop.f32.mrf.mxu1  ;;  %v7457_v51 = vpop.eup %6018  ;;  %6026 = vpow2.f32 %v2898_v2  ;;  %v1606_v20 = vmul.f32 2.0, %v886_v32  ;;  %v2902_v2 = vmul.f32 1.442695, %v2509_v34 }
 0x1ce   : > { %9157 = vst [vmem:[#allocation111_spill] sm:$0xff] %v7457_v51  ;;  %v1607_v55 = vmul.f32 2.0, %v1055_v44  ;;  %v2244_v38 = vsub.f32 %v1604_v6, %v7428_v22  ;;  %v7465_v56 = vpop.eup %6020  ;;  %6028 = vpow2.f32 %v2900_v57 }
 0x1cf   : > { %v2245_v26 = vsub.f32 %v1605_v40, %v7428_v22  ;;  %v2246_v45 = vsub.f32 %v1606_v20, %v1964_v1  ;;  %9158 = vst [vmem:[#allocation112_spill] sm:$0xff] %v7465_v56  ;;  %v7467_v37 = vpop.eup %6022  ;;  %6030 = vpow2.f32 %v2902_v2  ;;  %v7490_v2 = vpop.permute.xlu1 %1973 }
 0x1d0   : > { %v2247_v42 = vsub.f32 %v1607_v55, %v1964_v1  ;;  %9159 = vst [vmem:[#allocation113_spill] sm:$0xff] %v7467_v37  ;;  %v2510_v6 = vsub.f32 %v2244_v38, %v6603_v14  ;;  %v5715_v38 = vld [vmem:[%s6513_s23 + $0xc0] sm:$0xff] }
 0x1d1   : > { %v2512_v32 = vsub.f32 %v2246_v45, %v6593_v60  ;;  %v2511_v22 = vsub.f32 %v2245_v26, %v6605_v16  ;;  %4038 = vmatpush.bf16.msrb.mxu3 %v5715_v38 }
 0x1d2   : > { %v2513_v44 = vsub.f32 %v2247_v42, %v6597_v62  ;;  %v7471_v31 = vpop.eup %6024  ;;  %v2904_v26 = vmul.f32 1.442695, %v2510_v6 }
 0x1d3   : > { %9160 = vst [vmem:[#allocation114_spill] sm:$0xff] %v7471_v31  ;;  %v7474_v4 = vpop.eup %6026  ;;  %v2908_v40 = vmul.f32 1.442695, %v2512_v32  ;;  %v1224_v55 = vpop.f32.mrf.mxu2  ;;  %v2906_v47 = vmul.f32 1.442695, %v2511_v22 }
 0x1d4   : > { %9161 = vst [vmem:[#allocation115_spill] sm:$0xff] %v7474_v4  ;;  %v2910_v20 = vmul.f32 1.442695, %v2513_v44  ;;  %v1393_v59 = vpop.f32.mrf.mxu3  ;;  %v1608_v45 = vmul.f32 2.0, %v1224_v55  ;;  %v889_v42 = vpop.f32.mrf.mxu0  ;;  %v5699_v4 = vld [vmem:[%s6513_s23 + $0x40] sm:$0xff] }
 0x1d5   : > { %v1609_v51 = vmul.f32 2.0, %v1393_v59  ;;  %v1058_v35 = vpop.f32.mrf.mxu1  ;;  %v1610_v39 = vmul.f32 2.0, %v889_v42  ;;  %6032 = vpow2.f32 %v2908_v40  ;;  %3700 = vmatpush.bf16.msrb.mxu1 %v5699_v4 }
 0x1d6   : > { %v1611_v7 = vmul.f32 2.0, %v1058_v35  ;;  %v2248_v32 = vsub.f32 %v1608_v45, %v1964_v1  ;;  %6034 = vpow2.f32 %v2910_v20  ;;  %v7488_v35 = vpop.eup %6028 }
 0x1d7   : > { %v2249_v44 = vsub.f32 %v1609_v51, %v1964_v1  ;;  %v2250_v9 = vsub.f32 %v1610_v39, %v1969_v41  ;;  %5423 = vmatmul.msk.bf16.gmra.mxu0 %vm680_vm2, %v5685_v30  ;;  %5455 = vmatmul.msk.bf16.gmra.mxu1 %vm680_vm2, %v5685_v30  ;;  %9162 = vst [vmem:[#allocation116_spill] sm:$0xff] %v7488_v35  ;;  %6036 = vpow2.f32 %v2904_v26  ;;  %v7492_v39 = vpop.eup %6030 }
 0x1d8   : > { %v2514_v57 = vsub.f32 %v2248_v32, %v6603_v14  ;;  %v2251_v55 = vsub.f32 %v1611_v7, %v1969_v41  ;;  %5487 = vmatmul.msk.bf16.gmra.mxu2 %vm680_vm2, %v5685_v30  ;;  %5519 = vmatmul.msk.bf16.gmra.mxu3 %vm680_vm2, %v5685_v30  ;;  %9163 = vst [vmem:[#allocation117_spill] sm:$0xff] %v7492_v39  ;;  %6038 = vpow2.f32 %v2906_v47  ;;  %v5686_v39 = vld [vmem:[%s6489_s29 + $0xd8] sm:$0xff] }
 0x1d9   : > { %v2515_v59 = vsub.f32 %v2249_v44, %v6605_v16  ;;  %v2516_v6 = vsub.f32 %v2250_v9, %v6593_v60 }
 0x1da   : > { %v2912_v1 = vmul.f32 1.442695, %v2514_v57  ;;  %v2517_v7 = vsub.f32 %v2251_v55, %v6597_v62 }
 0x1db   : > { %v2914_v51 = vmul.f32 1.442695, %v2515_v59  ;;  %v1227_v22 = vpop.f32.mrf.mxu2  ;;  %v7495_v20 = vpop.eup %6032  ;;  %v2916_v37 = vmul.f32 1.442695, %v2516_v6 }
 0x1dc   : > { %v1396_v40 = vpop.f32.mrf.mxu3  ;;  %9164 = vst [vmem:[#allocation118_spill] sm:$0xff] %v7495_v20  ;;  %6040 = vpow2.f32 %v2912_v1  ;;  %v1612_v30 = vmul.f32 2.0, %v1227_v22  ;;  %v891_v42 = vpop.f32.mrf.mxu0 }
 0x1dd   : > { %v1613_v45 = vmul.f32 2.0, %v1396_v40  ;;  %v1060_v26 = vpop.f32.mrf.mxu1  ;;  %v7498_v32 = vpop.eup %6034  ;;  %6042 = vpow2.f32 %v2914_v51  ;;  %v1614_v44 = vmul.f32 2.0, %v891_v42  ;;  %v5707_v40 = vld [vmem:[%s6513_s23 + $0x80] sm:$0xff]  ;;  %v2918_v42 = vmul.f32 1.442695, %v2517_v7 }
 0x1de   : > { %9165 = vst [vmem:[#allocation119_spill] sm:$0xff] %v7498_v32  ;;  %v1615_v47 = vmul.f32 2.0, %v1060_v26  ;;  %v2252_v57 = vsub.f32 %v1612_v30, %v1969_v41  ;;  %v7508_v34 = vpop.eup %6036  ;;  %3869 = vmatpush.bf16.msrb.mxu2 %v5707_v40  ;;  %6044 = vpow2.f32 %v2916_v37 }
 0x1df   : > { %v2253_v1 = vsub.f32 %v1613_v45, %v1969_v41  ;;  %v2254_v55 = vsub.f32 %v1614_v44, %v7490_v2  ;;  %9166 = vst [vmem:[#allocation120_spill] sm:$0xff] %v7508_v34  ;;  %v7510_v51 = vpop.eup %6038  ;;  %v7517_v44 = vpop.permute.xlu2 %1978  ;;  %6046 = vpow2.f32 %v2918_v42 }
 0x1e0   : > { %v2255_v22 = vsub.f32 %v1615_v47, %v7490_v2  ;;  %9167 = vst [vmem:[#allocation121_spill] sm:$0xff] %v7510_v51  ;;  %v2518_v45 = vsub.f32 %v2252_v57, %v6603_v14 }
 0x1e1   : > { %v2520_v26 = vsub.f32 %v2254_v55, %v6593_v60  ;;  %v2519_v6 = vsub.f32 %v2253_v1, %v6605_v16 }
 0x1e2   : > { %v2521_v30 = vsub.f32 %v2255_v22, %v6597_v62  ;;  %v7514_v41 = vpop.eup %6040 }
 0x1e3   : > { %9168 = vst [vmem:[#allocation122_spill] sm:$0xff] %v7514_v41  ;;  %v7519_v47 = vpop.eup %6042  ;;  %v2924_v59 = vmul.f32 1.442695, %v2520_v26  ;;  %v1229_v9 = vpop.f32.mrf.mxu2  ;;  %v5691_v26 = vld [vmem:[%s6513_s23] sm:$0xff]  ;;  %v2922_v38 = vmul.f32 1.442695, %v2519_v6 }
 0x1e4   : > { %9169 = vst [vmem:[#allocation123_spill] sm:$0xff] %v7519_v47  ;;  %v2926_v7 = vmul.f32 1.442695, %v2521_v30  ;;  %v1398_v55 = vpop.f32.mrf.mxu3  ;;  %v1616_v22 = vmul.f32 2.0, %v1229_v9  ;;  %v894_v57 = vpop.f32.mrf.mxu0  ;;  %v2920_v30 = vmul.f32 1.442695, %v2518_v45  ;;  %3531 = vmatpush.bf16.msrb.mxu0 %v5691_v26 }
 0x1e5   : > { %v1617_v40 = vmul.f32 2.0, %v1398_v55  ;;  %v1063_v32 = vpop.f32.mrf.mxu1  ;;  %v1618_v1 = vmul.f32 2.0, %v894_v57  ;;  %6048 = vpow2.f32 %v2924_v59  ;;  %v1989_v47 = vpop.permute.xlu1 %1988 }
 0x1e6   : > { %v1619_v20 = vmul.f32 2.0, %v1063_v32  ;;  %v2256_v56 = vsub.f32 %v1616_v22, %v7490_v2  ;;  %6050 = vpow2.f32 %v2926_v7 }
 0x1e7   : > { %v2257_v31 = vsub.f32 %v1617_v40, %v7490_v2  ;;  %5424 = vmatmul.msk.bf16.gmra.mxu0 %vm680_vm2, %v5686_v39  ;;  %5456 = vmatmul.msk.bf16.gmra.mxu1 %vm680_vm2, %v5686_v39  ;;  %v2258_v37 = vsub.f32 %v1618_v1, %v7517_v44  ;;  %v7539_v2 = vpop.eup %6044  ;;  %6052 = vpow2.f32 %v2920_v30  ;;  %v1984_v30 = vpop.permute.xlu0 %1983 }
 0x1e8   : > { %v2522_v9 = vsub.f32 %v2256_v56, %v6603_v14  ;;  %5488 = vmatmul.msk.bf16.gmra.mxu2 %vm680_vm2, %v5686_v39  ;;  %5520 = vmatmul.msk.bf16.gmra.mxu3 %vm680_vm2, %v5686_v39  ;;  %v2259_v59 = vsub.f32 %v1619_v20, %v7517_v44  ;;  %9170 = vst [vmem:[#allocation124_spill] sm:$0xff] %v7539_v2  ;;  %v7541_v6 = vpop.eup %6046  ;;  %6054 = vpow2.f32 %v2922_v38 }
 0x1e9   : > { %v2523_v32 = vsub.f32 %v2257_v31, %v6605_v16  ;;  %9171 = vst [vmem:[#allocation125_spill] sm:$0xff] %v7541_v6  ;;  %v2524_v56 = vsub.f32 %v2258_v37, %v6593_v60 }
 0x1ea   : > { %v2928_v42 = vmul.f32 1.442695, %v2522_v9  ;;  %v2525_v39 = vsub.f32 %v2259_v59, %v6597_v62 }
 0x1eb   : > { %v2930_v45 = vmul.f32 1.442695, %v2523_v32  ;;  %v1232_v7 = vpop.f32.mrf.mxu2  ;;  %v7544_v55 = vpop.eup %6048 }
 0x1ec   : > { %v1401_v31 = vpop.f32.mrf.mxu3  ;;  %9172 = vst [vmem:[#allocation126_spill] sm:$0xff] %v7544_v55  ;;  %6056 = vpow2.f32 %v2928_v42  ;;  %v1620_v20 = vmul.f32 2.0, %v1232_v7  ;;  %v896_v4 = vpop.f32.mrf.mxu0 }
 0x1ed   : > { %v1621_v22 = vmul.f32 2.0, %v1401_v31  ;;  %v1065_v40 = vpop.f32.mrf.mxu1  ;;  %v7547_v57 = vpop.eup %6050  ;;  %6058 = vpow2.f32 %v2930_v45  ;;  %v1622_v1 = vmul.f32 2.0, %v896_v4  ;;  %v2932_v31 = vmul.f32 1.442695, %v2524_v56  ;;  %v5687_v56 = vld [vmem:[%s6489_s29 + $0xe0] sm:$0xff] }
 0x1ee   : > { %9173 = vst [vmem:[#allocation127_spill] sm:$0xff] %v7547_v57  ;;  %v1623_v26 = vmul.f32 2.0, %v1065_v40  ;;  %v2260_v37 = vsub.f32 %v1620_v20, %v7517_v44  ;;  %v7555_v7 = vpop.eup %6052  ;;  %v2934_v4 = vmul.f32 1.442695, %v2525_v39 }
 0x1ef   : > { %v2261_v32 = vsub.f32 %v1621_v22, %v7517_v44  ;;  %v2262_v59 = vsub.f32 %v1622_v1, %v1984_v30  ;;  %9174 = vst [vmem:[#allocation128_spill] sm:$0xff] %v7555_v7  ;;  %v7557_v45 = vpop.eup %6054  ;;  %6060 = vpow2.f32 %v2932_v31 }
 0x1f0   : > { %v2263_v42 = vsub.f32 %v1623_v26, %v1984_v30  ;;  %9175 = vst [vmem:[#allocation129_spill] sm:$0xff] %v7557_v45  ;;  %v2526_v20 = vsub.f32 %v2260_v37, %v6603_v14  ;;  %6062 = vpow2.f32 %v2934_v4  ;;  %v1994_v4 = vpop.permute.xlu2 %1993 }
 0x1f1   : > { %v2528_v40 = vsub.f32 %v2262_v59, %v6593_v60  ;;  %v2527_v44 = vsub.f32 %v2261_v32, %v6605_v16 }
 0x1f2   : > { %v2529_v38 = vsub.f32 %v2263_v42, %v6597_v62  ;;  %v7561_v35 = vpop.eup %6056  ;;  %v2936_v32 = vmul.f32 1.442695, %v2526_v20 }
 0x1f3   : > { %9176 = vst [vmem:[#allocation130_spill] sm:$0xff] %v7561_v35  ;;  %v7564_v9 = vpop.eup %6058  ;;  %v2940_v22 = vmul.f32 1.442695, %v2528_v40  ;;  %v1234_v26 = vpop.f32.mrf.mxu2  ;;  %v2938_v34 = vmul.f32 1.442695, %v2527_v44 }
 0x1f4   : > { %9177 = vst [vmem:[#allocation131_spill] sm:$0xff] %v7564_v9  ;;  %v2942_v1 = vmul.f32 1.442695, %v2529_v38  ;;  %v1403_v6 = vpop.f32.mrf.mxu3  ;;  %v1624_v59 = vmul.f32 2.0, %v1234_v26  ;;  %v899_v42 = vpop.f32.mrf.mxu0 }
 0x1f5   : > { %v1625_v57 = vmul.f32 2.0, %v1403_v6  ;;  %v1068_v2 = vpop.f32.mrf.mxu1  ;;  %v1626_v55 = vmul.f32 2.0, %v899_v42  ;;  %6064 = vpow2.f32 %v2940_v22 }
 0x1f6   : > { %v1627_v51 = vmul.f32 2.0, %v1068_v2  ;;  %v2264_v38 = vsub.f32 %v1624_v59, %v1984_v30  ;;  %6066 = vpow2.f32 %v2942_v1  ;;  %v7578_v2 = vpop.eup %6060 }
 0x1f7   : > { %v2265_v40 = vsub.f32 %v1625_v57, %v1984_v30  ;;  %v2266_v41 = vsub.f32 %v1626_v55, %v1989_v47  ;;  %5425 = vmatmul.msk.bf16.gmra.mxu0 %vm680_vm2, %v5687_v56  ;;  %5457 = vmatmul.msk.bf16.gmra.mxu1 %vm680_vm2, %v5687_v56  ;;  %9178 = vst [vmem:[#allocation132_spill] sm:$0xff] %v7578_v2  ;;  %6068 = vpow2.f32 %v2936_v32  ;;  %v7580_v55 = vpop.eup %6062 }
 0x1f8   : > { %v2530_v6 = vsub.f32 %v2264_v38, %v6603_v14  ;;  %v2267_v26 = vsub.f32 %v1627_v51, %v1989_v47  ;;  %5489 = vmatmul.msk.bf16.gmra.mxu2 %vm680_vm2, %v5687_v56  ;;  %5521 = vmatmul.msk.bf16.gmra.mxu3 %vm680_vm2, %v5687_v56  ;;  %9179 = vst [vmem:[#allocation133_spill] sm:$0xff] %v7580_v55  ;;  %6070 = vpow2.f32 %v2938_v34 }
 0x1f9   : > { %v2531_v31 = vsub.f32 %v2265_v40, %v6605_v16  ;;  %v2532_v20 = vsub.f32 %v2266_v41, %v6593_v60 }
 0x1fa   : > { %v2944_v57 = vmul.f32 1.442695, %v2530_v6  ;;  %v2533_v51 = vsub.f32 %v2267_v26, %v6597_v62 }
 0x1fb   : > { %v2946_v30 = vmul.f32 1.442695, %v2531_v31  ;;  %v1237_v44 = vpop.f32.mrf.mxu2  ;;  %v7583_v1 = vpop.eup %6064 }
 0x1fc   : > { %v1406_v22 = vpop.f32.mrf.mxu3  ;;  %9180 = vst [vmem:[#allocation134_spill] sm:$0xff] %v7583_v1  ;;  %6072 = vpow2.f32 %v2944_v57  ;;  %v1628_v59 = vmul.f32 2.0, %v1237_v44  ;;  %v901_v42 = vpop.f32.mrf.mxu0  ;;  %v2950_v45 = vmul.f32 1.442695, %v2533_v51 }
 0x1fd   : > { %v1629_v56 = vmul.f32 2.0, %v1406_v22  ;;  %v1070_v38 = vpop.f32.mrf.mxu1  ;;  %v7586_v32 = vpop.eup %6066  ;;  %6074 = vpow2.f32 %v2946_v30  ;;  %v1630_v40 = vmul.f32 2.0, %v901_v42  ;;  %v2948_v22 = vmul.f32 1.442695, %v2532_v20  ;;  %v5688_v20 = vld [vmem:[%s6489_s29 + $0xe8] sm:$0xff] }
 0x1fe   : > { %9181 = vst [vmem:[#allocation135_spill] sm:$0xff] %v7586_v32  ;;  %v1631_v6 = vmul.f32 2.0, %v1070_v38  ;;  %v2268_v41 = vsub.f32 %v1628_v59, %v1989_v47  ;;  %v7592_v44 = vpop.eup %6068 }
 0x1ff   : > { %v2269_v37 = vsub.f32 %v1629_v56, %v1989_v47  ;;  %v2270_v57 = vsub.f32 %v1630_v40, %v1994_v4  ;;  %9182 = vst [vmem:[#allocation136_spill] sm:$0xff] %v7592_v44  ;;  %v7594_v39 = vpop.eup %6070  ;;  %6076 = vpow2.f32 %v2948_v22 }
 0x200   : > { %v2271_v26 = vsub.f32 %v1631_v6, %v1994_v4  ;;  %9183 = vst [vmem:[#allocation137_spill] sm:$0xff] %v7594_v39  ;;  %v2534_v59 = vsub.f32 %v2268_v41, %v6603_v14  ;;  %6078 = vpow2.f32 %v2950_v45 }
 0x201   : > { %v2536_v30 = vsub.f32 %v2270_v57, %v6593_v60  ;;  %v2535_v47 = vsub.f32 %v2269_v37, %v6605_v16  ;;  %v1999_v37 = vpop.permute.xlu0 %1998 }
 0x202   : > { %v2537_v42 = vsub.f32 %v2271_v26, %v6597_v62  ;;  %v7598_v38 = vpop.eup %6072 }
 0x203   : > { %9184 = vst [vmem:[#allocation138_spill] sm:$0xff] %v7598_v38  ;;  %v7601_v34 = vpop.eup %6074  ;;  %v2956_v56 = vmul.f32 1.442695, %v2536_v30  ;;  %v1239_v6 = vpop.f32.mrf.mxu2  ;;  %v2952_v30 = vmul.f32 1.442695, %v2534_v59 }
 0x204   : > { %9185 = vst [vmem:[#allocation139_spill] sm:$0xff] %v7601_v34  ;;  %v2958_v40 = vmul.f32 1.442695, %v2537_v42  ;;  %v1408_v31 = vpop.f32.mrf.mxu3  ;;  %v1632_v57 = vmul.f32 2.0, %v1239_v6  ;;  %v904_v26 = vpop.f32.mrf.mxu0  ;;  %v2954_v7 = vmul.f32 1.442695, %v2535_v47 }
 0x205   : > { %v1633_v55 = vmul.f32 2.0, %v1408_v31  ;;  %v1073_v32 = vpop.f32.mrf.mxu1  ;;  %v1634_v2 = vmul.f32 2.0, %v904_v26  ;;  %6080 = vpow2.f32 %v2956_v56  ;;  %v7615_v45 = vpop.eup %6076 }
 0x206   : > { %v1635_v1 = vmul.f32 2.0, %v1073_v32  ;;  %v2272_v42 = vsub.f32 %v1632_v57, %v1994_v4  ;;  %6082 = vpow2.f32 %v2958_v40  ;;  %9186 = vst [vmem:[#allocation140_spill] sm:$0xff] %v7615_v45  ;;  %v7617_v32 = vpop.eup %6078 }
 0x207   : > { %v2273_v9 = vsub.f32 %v1633_v55, %v1994_v4  ;;  %v2274_v35 = vsub.f32 %v1634_v2, %v1999_v37  ;;  %5426 = vmatmul.msk.bf16.gmra.mxu0 %vm680_vm2, %v5688_v20  ;;  %5458 = vmatmul.msk.bf16.gmra.mxu1 %vm680_vm2, %v5688_v20  ;;  %6084 = vpow2.f32 %v2952_v30  ;;  %9187 = vst [vmem:[#allocation141_spill] sm:$0xff] %v7617_v32 }
 0x208   : > { %v2538_v31 = vsub.f32 %v2272_v42, %v6603_v14  ;;  %v2275_v6 = vsub.f32 %v1635_v1, %v1999_v37  ;;  %5490 = vmatmul.msk.bf16.gmra.mxu2 %vm680_vm2, %v5688_v20  ;;  %5522 = vmatmul.msk.bf16.gmra.mxu3 %vm680_vm2, %v5688_v20  ;;  %6086 = vpow2.f32 %v2954_v7 }
 0x209   : > { %v2539_v22 = vsub.f32 %v2273_v9, %v6605_v16  ;;  %v2540_v2 = vsub.f32 %v2274_v35, %v6593_v60  ;;  %v2004_v35 = vpop.permute.xlu1 %2003 }
 0x20a   : > { %v2960_v4 = vmul.f32 1.442695, %v2538_v31  ;;  %v2541_v9 = vsub.f32 %v2275_v6, %v6597_v62 }
 0x20b   : > { %v2962_v55 = vmul.f32 1.442695, %v2539_v22  ;;  %v1242_v59 = vpop.f32.mrf.mxu2  ;;  %v7620_v56 = vpop.eup %6080 }
 0x20c   : > { %v1411_v47 = vpop.f32.mrf.mxu3  ;;  %9188 = vst [vmem:[#allocation142_spill] sm:$0xff] %v7620_v56  ;;  %6088 = vpow2.f32 %v2960_v4  ;;  %v1636_v1 = vmul.f32 2.0, %v1242_v59  ;;  %v906_v20 = vpop.f32.mrf.mxu0 }
 0x20d   : > { %v1637_v40 = vmul.f32 2.0, %v1411_v47  ;;  %v1075_v57 = vpop.f32.mrf.mxu1  ;;  %v7623_v26 = vpop.eup %6082  ;;  %6090 = vpow2.f32 %v2962_v55  ;;  %v1638_v30 = vmul.f32 2.0, %v906_v20  ;;  %v2964_v47 = vmul.f32 1.442695, %v2540_v2  ;;  %v5689_v2 = vld [vmem:[%s6489_s29 + $0xf0] sm:$0xff] }
 0x20e   : > { %9189 = vst [vmem:[#allocation143_spill] sm:$0xff] %v7623_v26  ;;  %v1639_v42 = vmul.f32 2.0, %v1075_v57  ;;  %v2276_v31 = vsub.f32 %v1636_v1, %v1999_v37  ;;  %v7629_v59 = vpop.eup %6084  ;;  %v2966_v55 = vmul.f32 1.442695, %v2541_v9 }
 0x20f   : > { %v2277_v4 = vsub.f32 %v1637_v40, %v1999_v37  ;;  %v2278_v41 = vsub.f32 %v1638_v30, %v2004_v35  ;;  %9190 = vst [vmem:[#allocation144_spill] sm:$0xff] %v7629_v59  ;;  %v7631_v51 = vpop.eup %6086  ;;  %6092 = vpow2.f32 %v2964_v47 }
 0x210   : > { %v2279_v6 = vsub.f32 %v1639_v42, %v2004_v35  ;;  %9191 = vst [vmem:[#allocation145_spill] sm:$0xff] %v7631_v51  ;;  %v2542_v1 = vsub.f32 %v2276_v31, %v6603_v14  ;;  %6094 = vpow2.f32 %v2966_v55 }
 0x211   : > { %v2544_v20 = vsub.f32 %v2278_v41, %v6593_v60  ;;  %v2543_v37 = vsub.f32 %v2277_v4, %v6605_v16 }
 0x212   : > { %v2545_v57 = vsub.f32 %v2279_v6, %v6597_v62  ;;  %v7635_v7 = vpop.eup %6088  ;;  %v2968_v4 = vmul.f32 1.442695, %v2542_v1 }
 0x213   : > { %9192 = vst [vmem:[#allocation146_spill] sm:$0xff] %v7635_v7  ;;  %v7638_v45 = vpop.eup %6090  ;;  %v2972_v40 = vmul.f32 1.442695, %v2544_v20  ;;  %v1244_v42 = vpop.f32.mrf.mxu2  ;;  %v2970_v44 = vmul.f32 1.442695, %v2543_v37 }
 0x214   : > { %9193 = vst [vmem:[#allocation147_spill] sm:$0xff] %v7638_v45  ;;  %v2974_v30 = vmul.f32 1.442695, %v2545_v57  ;;  %v1413_v22 = vpop.f32.mrf.mxu3  ;;  %v1640_v41 = vmul.f32 2.0, %v1244_v42  ;;  %v909_v6 = vpop.f32.mrf.mxu0 }
 0x215   : > { %v1641_v32 = vmul.f32 2.0, %v1413_v22  ;;  %v1078_v26 = vpop.f32.mrf.mxu1  ;;  %v1642_v56 = vmul.f32 2.0, %v909_v6  ;;  %6096 = vpow2.f32 %v2972_v40  ;;  %v2009_v20 = vpop.permute.xlu2 %2008 }
 0x216   : > { %v1643_v39 = vmul.f32 2.0, %v1078_v26  ;;  %v2280_v57 = vsub.f32 %v1640_v41, %v2004_v35  ;;  %6098 = vpow2.f32 %v2974_v30  ;;  %v7652_v26 = vpop.eup %6092 }
 0x217   : > { %v2281_v34 = vsub.f32 %v1641_v32, %v2004_v35  ;;  %v2282_v38 = vsub.f32 %v1642_v56, %v2009_v20  ;;  %5427 = vmatmul.msk.bf16.gmra.mxu0 %vm680_vm2, %v5689_v2  ;;  %5459 = vmatmul.msk.bf16.gmra.mxu1 %vm680_vm2, %v5689_v2  ;;  %9194 = vst [vmem:[#allocation148_spill] sm:$0xff] %v7652_v26  ;;  %6100 = vpow2.f32 %v2968_v4  ;;  %v7654_v55 = vpop.eup %6094 }
 0x218   : > { %v2546_v22 = vsub.f32 %v2280_v57, %v6603_v14  ;;  %v2283_v42 = vsub.f32 %v1643_v39, %v2009_v20  ;;  %5491 = vmatmul.msk.bf16.gmra.mxu2 %vm680_vm2, %v5689_v2  ;;  %5523 = vmatmul.msk.bf16.gmra.mxu3 %vm680_vm2, %v5689_v2  ;;  %9195 = vst [vmem:[#allocation149_spill] sm:$0xff] %v7654_v55  ;;  %6102 = vpow2.f32 %v2970_v44 }
 0x219   : > { %v2547_v47 = vsub.f32 %v2281_v34, %v6605_v16  ;;  %v2548_v56 = vsub.f32 %v2282_v38, %v6593_v60  ;;  %v2014_v38 = vpop.permute.xlu0 %2013 }
 0x21a   : > { %v2976_v32 = vmul.f32 1.442695, %v2546_v22  ;;  %v2549_v39 = vsub.f32 %v2283_v42, %v6597_v62 }
 0x21b   : > { %v2978_v35 = vmul.f32 1.442695, %v2547_v47  ;;  %v1247_v1 = vpop.f32.mrf.mxu2  ;;  %v7657_v40 = vpop.eup %6096 }
 0x21c   : > { %v1416_v37 = vpop.f32.mrf.mxu3  ;;  %9196 = vst [vmem:[#allocation150_spill] sm:$0xff] %v7657_v40  ;;  %6104 = vpow2.f32 %v2976_v32  ;;  %v1644_v34 = vmul.f32 2.0, %v1247_v1  ;;  %v911_v2 = vpop.f32.mrf.mxu0 }
 0x21d   : > { %v1645_v30 = vmul.f32 2.0, %v1416_v37  ;;  %v1080_v41 = vpop.f32.mrf.mxu1  ;;  %v7660_v6 = vpop.eup %6098  ;;  %6106 = vpow2.f32 %v2978_v35  ;;  %v1646_v4 = vmul.f32 2.0, %v911_v2  ;;  %v2980_v37 = vmul.f32 1.442695, %v2548_v56  ;;  %v5690_v56 = vld [vmem:[%s6489_s29 + $0xf8] sm:$0xff]  ;;  %s8709_s29 = sld [smem:[#allocation3 + %s6476_s0]] }
 0x21e   : > { %9197 = vst [vmem:[#allocation151_spill] sm:$0xff] %v7660_v6  ;;  %v1647_v57 = vmul.f32 2.0, %v1080_v41  ;;  %v2284_v22 = vsub.f32 %v1644_v34, %v2009_v20  ;;  %v7666_v1 = vpop.eup %6100  ;;  %v2982_v35 = vmul.f32 1.442695, %v2549_v39 }
 0x21f   : > { %v2285_v32 = vsub.f32 %v1645_v30, %v2009_v20  ;;  %v2286_v31 = vsub.f32 %v1646_v4, %v2014_v38  ;;  %9198 = vst [vmem:[#allocation152_spill] sm:$0xff] %v7666_v1  ;;  %v7668_v9 = vpop.eup %6102  ;;  %6108 = vpow2.f32 %v2980_v37 }
 0x220   : > { %v2287_v42 = vsub.f32 %v1647_v57, %v2014_v38  ;;  %9199 = vst [vmem:[#allocation153_spill] sm:$0xff] %v7668_v9  ;;  %v2550_v34 = vsub.f32 %v2284_v22, %v6603_v14  ;;  %6110 = vpow2.f32 %v2982_v35 }
 0x221   : > { %v2552_v2 = vsub.f32 %v2286_v31, %v6593_v60  ;;  %v2551_v20 = vsub.f32 %v2285_v32, %v6605_v16  ;;  %v2019_v32 = vpop.permute.xlu1 %2018 }
 0x222   : > { %v2553_v41 = vsub.f32 %v2287_v42, %v6597_v62  ;;  %v7672_v44 = vpop.eup %6104 }
 0x223   : > { %v7675_v26 = vpop.eup %6106  ;;  %v2988_v30 = vmul.f32 1.442695, %v2552_v2  ;;  %v1249_v57 = vpop.f32.mrf.mxu2  ;;  %v2984_v2 = vmul.f32 1.442695, %v2550_v34  ;;  %v2986_v59 = vmul.f32 1.442695, %v2551_v20  ;;  %p440_p10 = scmp.ne.s32.totalorder %s8709_s29, %s8715_s13 }
 0x224   : > { %9200 = vst [vmem:[#allocation154_spill] sm:$0xff] %v7675_v26  ;;  %v2990_v4 = vmul.f32 1.442695, %v2553_v41  ;;  %v1418_v47 = vpop.f32.mrf.mxu3  ;;  %v1648_v31 = vmul.f32 2.0, %v1249_v57  ;;  %v914_v42 = vpop.f32.mrf.mxu0 }
 0x225   : > { %v1649_v55 = vmul.f32 2.0, %v1418_v47  ;;  %v1083_v6 = vpop.f32.mrf.mxu1  ;;  %v1650_v40 = vmul.f32 2.0, %v914_v42  ;;  %6112 = vpow2.f32 %v2988_v30  ;;  %s8749_s14 = scalar_select %p440_p10, 1, 0 }
 0x226   : > { %v1651_v51 = vmul.f32 2.0, %v1083_v6  ;;  %v2288_v41 = vsub.f32 %v1648_v31, %v2014_v38  ;;  %6114 = vpow2.f32 %v2990_v4  ;;  %v7689_v6 = vpop.eup %6108 }
 0x227   : > { %v2289_v45 = vsub.f32 %v1649_v55, %v2014_v38  ;;  %v2290_v7 = vsub.f32 %v1650_v40, %v2019_v32  ;;  %5428 = vmatmul.msk.bf16.gmra.mxu0 %vm680_vm2, %v5690_v56  ;;  %5460 = vmatmul.msk.bf16.gmra.mxu1 %vm680_vm2, %v5690_v56  ;;  %9201 = vst [vmem:[#allocation155_spill] sm:$0xff] %v7689_v6  ;;  %6116 = vpow2.f32 %v2984_v2  ;;  %v7691_v35 = vpop.eup %6110  ;;  %s442_s15 = scvt.s32.f32 %s8749_s14 }
 0x228   : > { %v2554_v47 = vsub.f32 %v2288_v41, %v6603_v14  ;;  %v2291_v57 = vsub.f32 %v1651_v51, %v2019_v32  ;;  %5492 = vmatmul.msk.bf16.gmra.mxu2 %vm680_vm2, %v5690_v56  ;;  %5524 = vmatmul.msk.bf16.gmra.mxu3 %vm680_vm2, %v5690_v56  ;;  %9202 = vst [vmem:[#allocation156_spill] sm:$0xff] %v7691_v35  ;;  %6118 = vpow2.f32 %v2986_v59 }
 0x229   : > { %v2555_v37 = vsub.f32 %v2289_v45, %v6605_v16  ;;  %v2556_v40 = vsub.f32 %v2290_v7, %v6593_v60  ;;  %v2024_v7 = vpop.permute.xlu2 %2023  ;;  %s443_s16 = sadd.f32 1.0, %s442_s15 }
 0x22a   : > { %v2992_v55 = vmul.f32 1.442695, %v2554_v47  ;;  %v2557_v51 = vsub.f32 %v2291_v57, %v6597_v62 }
 0x22b   : > { %v2994_v38 = vmul.f32 1.442695, %v2555_v37  ;;  %v1252_v34 = vpop.f32.mrf.mxu2  ;;  %v7694_v30 = vpop.eup %6112 }
 0x22c   : > { %v1421_v20 = vpop.f32.mrf.mxu3  ;;  %9203 = vst [vmem:[#allocation157_spill] sm:$0xff] %v7694_v30  ;;  %6120 = vpow2.f32 %v2992_v55  ;;  %v1652_v45 = vmul.f32 2.0, %v1252_v34  ;;  %v916_v56 = vpop.f32.mrf.mxu0  ;;  %v2998_v9 = vmul.f32 1.442695, %v2557_v51 }
 0x22d   : > { %v1653_v4 = vmul.f32 2.0, %v1421_v20  ;;  %v1085_v31 = vpop.f32.mrf.mxu1  ;;  %v7697_v42 = vpop.eup %6114  ;;  %6122 = vpow2.f32 %v2994_v38  ;;  %v1654_v2 = vmul.f32 2.0, %v916_v56  ;;  %v2996_v20 = vmul.f32 1.442695, %v2556_v40 }
 0x22e   : > { %9204 = vst [vmem:[#allocation158_spill] sm:$0xff] %v7697_v42  ;;  %v1655_v41 = vmul.f32 2.0, %v1085_v31  ;;  %v2292_v47 = vsub.f32 %v1652_v45, %v2019_v32  ;;  %v7703_v34 = vpop.eup %6116  ;;  %v2029_v30 = vpop.permute.xlu0 %2028 }
 0x22f   : > { %v2293_v55 = vsub.f32 %v1653_v4, %v2019_v32  ;;  %v2294_v22 = vsub.f32 %v1654_v2, %v2024_v7  ;;  %v7705_v39 = vpop.eup %6118  ;;  %6124 = vpow2.f32 %v2996_v20  ;;  %v9205_v20 = vpack.c.bf16 %v6628_v54, %v6623_v46 }
 0x230   : > { %v2295_v57 = vsub.f32 %v1655_v41, %v2024_v7  ;;  %v2558_v45 = vsub.f32 %v2292_v47, %v6603_v14  ;;  %6126 = vpow2.f32 %v2998_v9 }
 0x231   : > { %v2560_v38 = vsub.f32 %v2294_v22, %v6593_v60  ;;  %v2559_v32 = vsub.f32 %v2293_v55, %v6605_v16 }
 0x232   : > { %v2561_v56 = vsub.f32 %v2295_v57, %v6597_v62  ;;  %v7709_v31 = vpop.eup %6120  ;;  %v3000_v55 = vmul.f32 1.442695, %v2558_v45  ;;  %v9207_v45 = vpack.c.bf16 %v6648_v17, %v6640_v8 }
 0x233   : > { %v7712_v59 = vpop.eup %6122  ;;  %v3004_v4 = vmul.f32 1.442695, %v2560_v38  ;;  %v1254_v41 = vpop.f32.mrf.mxu2  ;;  %v3002_v26 = vmul.f32 1.442695, %v2559_v32 }
 0x234   : > { %v3006_v2 = vmul.f32 1.442695, %v2561_v56  ;;  %v1423_v37 = vpop.f32.mrf.mxu3  ;;  %v1656_v51 = vmul.f32 2.0, %v1254_v41  ;;  %v919_v35 = vpop.f32.mrf.mxu0 }
 0x235   : > { %v1657_v22 = vmul.f32 2.0, %v1423_v37  ;;  %v1088_v57 = vpop.f32.mrf.mxu1  ;;  %v1658_v47 = vmul.f32 2.0, %v919_v35  ;;  %6128 = vpow2.f32 %v3004_v4  ;;  %v9206_v37 = vpack.c.bf16 %v6631_v61, %v6625_v50  ;;  %v7733_v32 = vpop.eup %6124 }
 0x236   : > { %v1659_v6 = vmul.f32 2.0, %v1088_v57  ;;  %v2296_v38 = vsub.f32 %v1656_v51, %v2024_v7  ;;  %6130 = vpow2.f32 %v3006_v2  ;;  %v7735_v50 = vpop.eup %6126 }
 0x237   : > { %v2297_v56 = vsub.f32 %v1657_v22, %v2024_v7  ;;  %v2298_v1 = vsub.f32 %v1658_v47, %v2029_v30  ;;  %3532 = vmatmul.bf16.vlgmr.msrb.gmra.mxu0 %v9205_v20  ;;  %3701 = vmatmul.bf16.vlgmr.msrb.gmra.mxu1 %v9206_v37  ;;  %v9208_v7 = vpack.c.bf16 %v6651_v19, %v6644_v11  ;;  %6132 = vpow2.f32 %v3000_v55 }
 0x238   : > { %v2562_v9 = vsub.f32 %v2296_v38, %v6603_v14  ;;  %v2299_v41 = vsub.f32 %v1659_v6, %v2029_v30  ;;  %3870 = vmatmul.bf16.vlgmr.msrb.gmra.mxu2 %v9207_v45  ;;  %6134 = vpow2.f32 %v3002_v26  ;;  %v2039_v26 = vpop.permute.xlu2 %2038 }
 0x239   : > { %v2563_v35 = vsub.f32 %v2297_v56, %v6605_v16  ;;  %4039 = vmatmul.bf16.vlgmr.msrb.gmra.mxu3 %v9208_v7  ;;  %v2564_v61 = vsub.f32 %v2298_v1, %v6593_v60  ;;  %v2034_v1 = vpop.permute.xlu1 %2033 }
 0x23a   : > { %v3008_v46 = vmul.f32 1.442695, %v2562_v9  ;;  %v2565_v8 = vsub.f32 %v2299_v41, %v6597_v62 }
 0x23b   : > { %v3010_v54 = vmul.f32 1.442695, %v2563_v35  ;;  %v1257_v4 = vpop.f32.mrf.mxu2  ;;  %v7738_v2 = vpop.eup %6128  ;;  %v3012_v35 = vmul.f32 1.442695, %v2564_v61 }
 0x23c   : > { %v1426_v6 = vpop.f32.mrf.mxu3  ;;  %6136 = vpow2.f32 %v3008_v46  ;;  %v1660_v17 = vmul.f32 2.0, %v1257_v4  ;;  %v921_v19 = vpop.f32.mrf.mxu0  ;;  %v3014_v45 = vmul.f32 1.442695, %v2565_v8 }
 0x23d   : > { %v1661_v11 = vmul.f32 2.0, %v1426_v6  ;;  %v1090_v51 = vpop.f32.mrf.mxu1  ;;  %v7741_v22 = vpop.eup %6130  ;;  %6138 = vpow2.f32 %v3010_v54  ;;  %v1662_v57 = vmul.f32 2.0, %v921_v19 }
 0x23e   : > { %v1663_v47 = vmul.f32 2.0, %v1090_v51  ;;  %v2300_v55 = vsub.f32 %v1660_v17, %v2029_v30  ;;  %v7747_v9 = vpop.eup %6132  ;;  %6140 = vpow2.f32 %v3012_v35  ;;  %v9209_v35 = vpack.c.bf16 %v6675_v53, %v6668_v43 }
 0x23f   : > { %v2301_v56 = vsub.f32 %v1661_v11, %v2029_v30  ;;  %v2302_v20 = vsub.f32 %v1662_v57, %v2034_v1  ;;  %v7749_v41 = vpop.eup %6134  ;;  %6142 = vpow2.f32 %v3014_v45 }
 0x240   : > { %v2303_v37 = vsub.f32 %v1663_v47, %v2034_v1  ;;  %v2566_v4 = vsub.f32 %v2300_v55, %v6603_v14 }
 0x241   : > { %v2568_v7 = vsub.f32 %v2302_v20, %v6593_v60  ;;  %v2567_v30 = vsub.f32 %v2301_v56, %v6605_v16 }
 0x242   : > { %v2569_v46 = vsub.f32 %v2303_v37, %v6597_v62  ;;  %v7753_v54 = vpop.eup %6136  ;;  %v3016_v56 = vmul.f32 1.442695, %v2566_v4  ;;  %v9211_v4 = vpack.c.bf16 %v6697_v27, %v6690_v18 }
 0x243   : > { %v7756_v6 = vpop.eup %6138  ;;  %v3020_v17 = vmul.f32 1.442695, %v2568_v7  ;;  %v1259_v19 = vpop.f32.mrf.mxu2  ;;  %v3018_v42 = vmul.f32 1.442695, %v2567_v30 }
 0x244   : > { %v3022_v11 = vmul.f32 1.442695, %v2569_v46  ;;  %v1428_v51 = vpop.f32.mrf.mxu3  ;;  %v1664_v8 = vmul.f32 2.0, %v1259_v19  ;;  %v924_v47 = vpop.f32.mrf.mxu0  ;;  %v9210_v19 = vpack.c.bf16 %v6678_v63, %v6672_v48 }
 0x245   : > { %v1665_v57 = vmul.f32 2.0, %v1428_v51  ;;  %v1093_v20 = vpop.f32.mrf.mxu1  ;;  %v1666_v55 = vmul.f32 2.0, %v924_v47  ;;  %6144 = vpow2.f32 %v3020_v17  ;;  %v7777_v30 = vpop.eup %6140 }
 0x246   : > { %v1667_v38 = vmul.f32 2.0, %v1093_v20  ;;  %v2304_v7 = vsub.f32 %v1664_v8, %v2034_v1  ;;  %6146 = vpow2.f32 %v3022_v11  ;;  %v7779_v48 = vpop.eup %6142 }
 0x247   : > { %v2305_v46 = vsub.f32 %v1665_v57, %v2034_v1  ;;  %v2306_v40 = vsub.f32 %v1666_v55, %v2039_v26  ;;  %3537 = vmatmul.bf16.gmra.mxu0 %v9209_v35  ;;  %3706 = vmatmul.bf16.gmra.mxu1 %v9210_v19  ;;  %v9212_v1 = vpack.c.bf16 %v6702_v29, %v6692_v21  ;;  %6148 = vpow2.f32 %v3016_v56 }
 0x248   : > { %v2570_v45 = vsub.f32 %v2304_v7, %v6603_v14  ;;  %v2307_v47 = vsub.f32 %v1667_v38, %v2039_v26  ;;  %3875 = vmatmul.bf16.gmra.mxu2 %v9211_v4  ;;  %6150 = vpow2.f32 %v3018_v42  ;;  %v2049_v42 = vpop.permute.xlu1 %2048 }
 0x249   : > { %v2571_v51 = vsub.f32 %v2305_v46, %v6605_v16  ;;  %4044 = vmatmul.bf16.gmra.mxu3 %v9212_v1  ;;  %v2572_v63 = vsub.f32 %v2306_v40, %v6593_v60  ;;  %v2044_v40 = vpop.permute.xlu0 %2043 }
 0x24a   : > { %v3024_v43 = vmul.f32 1.442695, %v2570_v45  ;;  %v2573_v18 = vsub.f32 %v2307_v47, %v6597_v62 }
 0x24b   : > { %v3026_v53 = vmul.f32 1.442695, %v2571_v51  ;;  %v1262_v17 = vpop.f32.mrf.mxu2  ;;  %v7782_v11 = vpop.eup %6144  ;;  %v3028_v51 = vmul.f32 1.442695, %v2572_v63 }
 0x24c   : > { %v1431_v38 = vpop.f32.mrf.mxu3  ;;  %6152 = vpow2.f32 %v3024_v43  ;;  %v1668_v27 = vmul.f32 2.0, %v1262_v17  ;;  %v926_v29 = vpop.f32.mrf.mxu0  ;;  %v3030_v4 = vmul.f32 1.442695, %v2573_v18 }
 0x24d   : > { %v1669_v21 = vmul.f32 2.0, %v1431_v38  ;;  %v1095_v8 = vpop.f32.mrf.mxu1  ;;  %v7785_v57 = vpop.eup %6146  ;;  %6154 = vpow2.f32 %v3026_v53  ;;  %v1670_v20 = vmul.f32 2.0, %v926_v29 }
 0x24e   : > { %v1671_v55 = vmul.f32 2.0, %v1095_v8  ;;  %v2308_v56 = vsub.f32 %v1668_v27, %v2039_v26  ;;  %v7791_v45 = vpop.eup %6148  ;;  %6156 = vpow2.f32 %v3028_v51  ;;  %v9213_v51 = vpack.c.bf16 %v6730_v23, %v6723_v3 }
 0x24f   : > { %v2309_v46 = vsub.f32 %v1669_v21, %v2039_v26  ;;  %v2310_v35 = vsub.f32 %v1670_v20, %v2044_v40  ;;  %v7793_v47 = vpop.eup %6150  ;;  %6158 = vpow2.f32 %v3030_v4 }
 0x250   : > { %v2311_v19 = vsub.f32 %v1671_v55, %v2044_v40  ;;  %v2574_v17 = vsub.f32 %v2308_v56, %v6603_v14 }
 0x251   : > { %v2576_v1 = vsub.f32 %v2310_v35, %v6593_v60  ;;  %v2575_v26 = vsub.f32 %v2309_v46, %v6605_v16 }
 0x252   : > { %v2577_v43 = vsub.f32 %v2311_v19, %v6597_v62  ;;  %v7797_v53 = vpop.eup %6152  ;;  %v3032_v46 = vmul.f32 1.442695, %v2574_v17  ;;  %v9215_v17 = vpack.c.bf16 %v6750_v58, %v6744_v49 }
 0x253   : > { %v7800_v38 = vpop.eup %6154  ;;  %v3036_v27 = vmul.f32 1.442695, %v2576_v1  ;;  %v1264_v29 = vpop.f32.mrf.mxu2  ;;  %v3034_v37 = vmul.f32 1.442695, %v2575_v26 }
 0x254   : > { %v3038_v21 = vmul.f32 1.442695, %v2577_v43  ;;  %v1433_v8 = vpop.f32.mrf.mxu3  ;;  %v1672_v18 = vmul.f32 2.0, %v1264_v29  ;;  %v929_v55 = vpop.f32.mrf.mxu0  ;;  %v9214_v29 = vpack.c.bf16 %v6733_v33, %v6727_v13 }
 0x255   : > { %v1673_v20 = vmul.f32 2.0, %v1433_v8  ;;  %v1098_v35 = vpop.f32.mrf.mxu1  ;;  %v1674_v56 = vmul.f32 2.0, %v929_v55  ;;  %6160 = vpow2.f32 %v3036_v27  ;;  %v7821_v26 = vpop.eup %6156 }
 0x256   : > { %v1675_v7 = vmul.f32 2.0, %v1098_v35  ;;  %v2312_v1 = vsub.f32 %v1672_v18, %v2044_v40  ;;  %6162 = vpow2.f32 %v3038_v21  ;;  %v7823_v13 = vpop.eup %6158 }
 0x257   : > { %v2313_v43 = vsub.f32 %v1673_v20, %v2044_v40  ;;  %v2314_v61 = vsub.f32 %v1674_v56, %v2049_v42  ;;  %3542 = vmatmul.bf16.gmra.mxu0 %v9213_v51  ;;  %3711 = vmatmul.bf16.gmra.mxu1 %v9214_v29  ;;  %v9216_v40 = vpack.c.bf16 %v6755_v0, %v6746_v52  ;;  %6164 = vpow2.f32 %v3032_v46 }
 0x258   : > { %v2578_v4 = vsub.f32 %v2312_v1, %v6603_v14  ;;  %v2315_v55 = vsub.f32 %v1675_v7, %v2049_v42  ;;  %3880 = vmatmul.bf16.gmra.mxu2 %v9215_v17  ;;  %6166 = vpow2.f32 %v3034_v37  ;;  %v2059_v37 = vpop.permute.xlu0 %2058 }
 0x259   : > { %v2579_v8 = vsub.f32 %v2313_v43, %v6605_v16  ;;  %4049 = vmatmul.bf16.gmra.mxu3 %v9216_v40  ;;  %v2580_v33 = vsub.f32 %v2314_v61, %v6593_v60  ;;  %v2054_v61 = vpop.permute.xlu2 %2053 }
 0x25a   : > { %v3040_v3 = vmul.f32 1.442695, %v2578_v4  ;;  %v2581_v49 = vsub.f32 %v2315_v55, %v6597_v62 }
 0x25b   : > { %v3042_v23 = vmul.f32 1.442695, %v2579_v8  ;;  %v1267_v27 = vpop.f32.mrf.mxu2  ;;  %v7826_v21 = vpop.eup %6160  ;;  %v3044_v8 = vmul.f32 1.442695, %v2580_v33 }
 0x25c   : > { %v1436_v7 = vpop.f32.mrf.mxu3  ;;  %6168 = vpow2.f32 %v3040_v3  ;;  %v1676_v58 = vmul.f32 2.0, %v1267_v27  ;;  %v931_v0 = vpop.f32.mrf.mxu0  ;;  %v3046_v17 = vmul.f32 1.442695, %v2581_v49 }
 0x25d   : > { %v1677_v52 = vmul.f32 2.0, %v1436_v7  ;;  %v1100_v18 = vpop.f32.mrf.mxu1  ;;  %v7829_v20 = vpop.eup %6162  ;;  %6170 = vpow2.f32 %v3042_v23  ;;  %v1678_v35 = vmul.f32 2.0, %v931_v0 }
 0x25e   : > { %v1679_v56 = vmul.f32 2.0, %v1100_v18  ;;  %v2316_v46 = vsub.f32 %v1676_v58, %v2049_v42  ;;  %v7835_v4 = vpop.eup %6164  ;;  %6172 = vpow2.f32 %v3044_v8  ;;  %v9217_v8 = vpack.c.bf16 %v6779_v25, %v6774_v12 }
 0x25f   : > { %v2317_v43 = vsub.f32 %v1677_v52, %v2049_v42  ;;  %v2318_v51 = vsub.f32 %v1678_v35, %v2054_v61  ;;  %v7837_v55 = vpop.eup %6166  ;;  %6174 = vpow2.f32 %v3046_v17 }
 0x260   : > { %v2319_v29 = vsub.f32 %v1679_v56, %v2054_v61  ;;  %v2582_v27 = vsub.f32 %v2316_v46, %v6603_v14 }
 0x261   : > { %v2584_v40 = vsub.f32 %v2318_v51, %v6593_v60  ;;  %v2583_v42 = vsub.f32 %v2317_v43, %v6605_v16 }
 0x262   : > { %v2585_v3 = vsub.f32 %v2319_v29, %v6597_v62  ;;  %v7841_v23 = vpop.eup %6168  ;;  %v3048_v43 = vmul.f32 1.442695, %v2582_v27  ;;  %v9219_v27 = vpack.c.bf16 %v6797_v10, %v6791_v15 }
 0x263   : > { %v7844_v7 = vpop.eup %6170  ;;  %v3052_v58 = vmul.f32 1.442695, %v2584_v40  ;;  %v1269_v0 = vpop.f32.mrf.mxu2  ;;  %v3050_v19 = vmul.f32 1.442695, %v2583_v42 }
 0x264   : > { %v3054_v52 = vmul.f32 1.442695, %v2585_v3  ;;  %v1438_v18 = vpop.f32.mrf.mxu3  ;;  %v1680_v49 = vmul.f32 2.0, %v1269_v0  ;;  %v934_v56 = vpop.f32.mrf.mxu0  ;;  %v9218_v0 = vpack.c.bf16 %v6782_v36, %v6776_v5 }
 0x265   : > { %v1681_v35 = vmul.f32 2.0, %v1438_v18  ;;  %v1103_v51 = vpop.f32.mrf.mxu1  ;;  %v1682_v46 = vmul.f32 2.0, %v934_v56  ;;  %6176 = vpow2.f32 %v3052_v58  ;;  %v7865_v42 = vpop.eup %6172 }
 0x266   : > { %v1683_v1 = vmul.f32 2.0, %v1103_v51  ;;  %v2320_v40 = vsub.f32 %v1680_v49, %v2054_v61  ;;  %6178 = vpow2.f32 %v3054_v52  ;;  %v7867_v5 = vpop.eup %6174 }
 0x267   : > { %v2321_v3 = vsub.f32 %v1681_v35, %v2054_v61  ;;  %v2322_v63 = vsub.f32 %v1682_v46, %v2059_v37  ;;  %3547 = vmatmul.bf16.gmra.mxu0 %v9217_v8  ;;  %3716 = vmatmul.bf16.gmra.mxu1 %v9218_v0  ;;  %v9220_v61 = vpack.c.bf16 %v6802_v28, %v6793_v24  ;;  %6180 = vpow2.f32 %v3048_v43 }
 0x268   : > { %v2586_v17 = vsub.f32 %v2320_v40, %v6603_v14  ;;  %v2323_v56 = vsub.f32 %v1683_v1, %v2059_v37  ;;  %3885 = vmatmul.bf16.gmra.mxu2 %v9219_v27  ;;  %9221 = vst [vmem:[#allocation159_spill] sm:$0xff] %v7867_v5  ;;  %6182 = vpow2.f32 %v3050_v19  ;;  %v2069_v19 = vpop.permute.xlu2 %2068 }
 0x269   : > { %v2587_v18 = vsub.f32 %v2321_v3, %v6605_v16  ;;  %4054 = vmatmul.bf16.gmra.mxu3 %v9220_v61  ;;  %v2588_v36 = vsub.f32 %v2322_v63, %v6593_v60  ;;  %v2064_v63 = vpop.permute.xlu1 %2063 }
 0x26a   : > { %v3056_v12 = vmul.f32 1.442695, %v2586_v17  ;;  %v2589_v15 = vsub.f32 %v2323_v56, %v6597_v62 }
 0x26b   : > { %v3058_v25 = vmul.f32 1.442695, %v2587_v18  ;;  %v1272_v58 = vpop.f32.mrf.mxu2  ;;  %v7870_v52 = vpop.eup %6176  ;;  %v3060_v18 = vmul.f32 1.442695, %v2588_v36  ;;  %v9227_v36 = vld [vmem:[#allocation14_spill] sm:$0xff] }
 0x26c   : > { %v1441_v1 = vpop.f32.mrf.mxu3  ;;  %6184 = vpow2.f32 %v3056_v12  ;;  %v1684_v10 = vmul.f32 2.0, %v1272_v58  ;;  %v936_v28 = vpop.f32.mrf.mxu0  ;;  %v3062_v27 = vmul.f32 1.442695, %v2589_v15 }
 0x26d   : > { %v1685_v24 = vmul.f32 2.0, %v1441_v1  ;;  %v1105_v49 = vpop.f32.mrf.mxu1  ;;  %v7873_v35 = vpop.eup %6178  ;;  %6186 = vpow2.f32 %v3058_v25  ;;  %v1686_v51 = vmul.f32 2.0, %v936_v28 }
 0x26e   : > { %9222 = vst [vmem:[#allocation160_spill] sm:$0xff] %v7873_v35  ;;  %v1687_v46 = vmul.f32 2.0, %v1105_v49  ;;  %v2324_v43 = vsub.f32 %v1684_v10, %v2059_v37  ;;  %v7879_v17 = vpop.eup %6180  ;;  %6188 = vpow2.f32 %v3060_v18  ;;  %v9228_v18 = vld [vmem:[#allocation12_spill] sm:$0xff] }
 0x26f   : > { %v2325_v3 = vsub.f32 %v1685_v24, %v2059_v37  ;;  %v2326_v8 = vsub.f32 %v1686_v51, %v2064_v63  ;;  %9223 = vst [vmem:[#allocation161_spill] sm:$0xff] %v7879_v17  ;;  %v7881_v56 = vpop.eup %6182  ;;  %6190 = vpow2.f32 %v3062_v27  ;;  %v9231_v17 = vld [vmem:[#allocation13_spill] sm:$0xff] }
 0x270   : > { %v2327_v0 = vsub.f32 %v1687_v46, %v2064_v63  ;;  %9224 = vst [vmem:[#allocation162_spill] sm:$0xff] %v7881_v56  ;;  %v2590_v58 = vsub.f32 %v2324_v43, %v6603_v14 }
 0x271   : > { %v2592_v61 = vsub.f32 %v2326_v8, %v6593_v60  ;;  %v2591_v37 = vsub.f32 %v2325_v3, %v6605_v16 }
 0x272   : > { %v2593_v12 = vsub.f32 %v2327_v0, %v6597_v62  ;;  %v7885_v25 = vpop.eup %6184  ;;  %v3064_v3 = vmul.f32 1.442695, %v2590_v58  ;;  %v9233_v58 = vld [vmem:[#allocation18_spill] sm:$0xff] }
 0x273   : > { %9225 = vst [vmem:[#allocation163_spill] sm:$0xff] %v7885_v25  ;;  %v7888_v1 = vpop.eup %6186  ;;  %v3068_v10 = vmul.f32 1.442695, %v2592_v61  ;;  %v1274_v28 = vpop.f32.mrf.mxu2  ;;  %v3066_v29 = vmul.f32 1.442695, %v2591_v37  ;;  %v9237_v37 = vld [vmem:[#allocation17_spill] sm:$0xff] }
 0x274   : > { %9226 = vst [vmem:[#allocation164_spill] sm:$0xff] %v7888_v1  ;;  %v3070_v24 = vmul.f32 1.442695, %v2593_v12  ;;  %v1443_v49 = vpop.f32.mrf.mxu3  ;;  %v1688_v15 = vmul.f32 2.0, %v1274_v28  ;;  %v939_v46 = vpop.f32.mrf.mxu0  ;;  %v9229_v28 = vpack.c.bf16 %v9227_v36, %v9228_v18  ;;  %v9247_v1 = vld [vmem:[#allocation22_spill] sm:$0xff] }
 0x275   : > { %v1689_v51 = vmul.f32 2.0, %v1443_v49  ;;  %v1108_v8 = vpop.f32.mrf.mxu1  ;;  %v1690_v43 = vmul.f32 2.0, %v939_v46  ;;  %6192 = vpow2.f32 %v3068_v10  ;;  %v9230_v49 = vld [vmem:[#allocation15_spill] sm:$0xff]  ;;  %v9234_v10 = vld [vmem:[#allocation16_spill] sm:$0xff] }
 0x276   : > { %v1691_v40 = vmul.f32 2.0, %v1108_v8  ;;  %v2328_v61 = vsub.f32 %v1688_v15, %v2064_v63  ;;  %6194 = vpow2.f32 %v3070_v24  ;;  %v9232_v25 = vpack.c.bf16 %v9230_v49, %v9231_v17 }
 0x277   : > { %v2329_v12 = vsub.f32 %v1689_v51, %v2064_v63  ;;  %v2330_v33 = vsub.f32 %v1690_v43, %v2069_v19  ;;  %3552 = vmatmul.bf16.gmra.mxu0 %v9229_v28  ;;  %v9235_v15 = vpack.c.bf16 %v9233_v58, %v9234_v10  ;;  %v9236_v63 = vld [vmem:[#allocation19_spill] sm:$0xff]  ;;  %v7909_v51 = vpop.eup %6188  ;;  %6196 = vpow2.f32 %v3064_v3 }
 0x278   : > { %3721 = vmatmul.bf16.gmra.mxu1 %v9232_v25  ;;  %v2594_v27 = vsub.f32 %v2328_v61, %v6603_v14  ;;  %v2331_v8 = vsub.f32 %v1691_v40, %v2069_v19  ;;  %v9238_v24 = vpack.c.bf16 %v9236_v63, %v9237_v37  ;;  %9239 = vst [vmem:[#allocation14_spill] sm:$0xff] %v7909_v51  ;;  %v7911_v17 = vpop.eup %6190  ;;  %6198 = vpow2.f32 %v3066_v29 }
 0x279   : > { %v2595_v46 = vsub.f32 %v2329_v12, %v6605_v16  ;;  %3890 = vmatmul.bf16.gmra.mxu2 %v9235_v15  ;;  %9240 = vst [vmem:[#allocation12_spill] sm:$0xff] %v7911_v17  ;;  %v2596_v25 = vsub.f32 %v2330_v33, %v6593_v60  ;;  %v2074_v33 = vpop.permute.xlu0 %2073 }
 0x27a   : > { %4059 = vmatmul.bf16.gmra.mxu3 %v9238_v24  ;;  %v3072_v36 = vmul.f32 1.442695, %v2594_v27  ;;  %v2597_v18 = vsub.f32 %v2331_v8, %v6597_v62 }
 0x27b   : > { %v3074_v43 = vmul.f32 1.442695, %v2595_v46  ;;  %v1277_v61 = vpop.f32.mrf.mxu2  ;;  %v7914_v12 = vpop.eup %6192 }
 0x27c   : > { %v1446_v40 = vpop.f32.mrf.mxu3  ;;  %9241 = vst [vmem:[#allocation15_spill] sm:$0xff] %v7914_v12  ;;  %6200 = vpow2.f32 %v3072_v36  ;;  %v1692_v28 = vmul.f32 2.0, %v1277_v61  ;;  %v941_v58 = vpop.f32.mrf.mxu0  ;;  %v3076_v61 = vmul.f32 1.442695, %v2596_v25  ;;  %v3078_v0 = vmul.f32 1.442695, %v2597_v18 }
 0x27d   : > { %v1693_v49 = vmul.f32 2.0, %v1446_v40  ;;  %v1110_v10 = vpop.f32.mrf.mxu1  ;;  %v7917_v15 = vpop.eup %6194  ;;  %6202 = vpow2.f32 %v3074_v43  ;;  %v1694_v3 = vmul.f32 2.0, %v941_v58  ;;  %v9248_v25 = vld [vmem:[#allocation20_spill] sm:$0xff] }
 0x27e   : > { %9242 = vst [vmem:[#allocation13_spill] sm:$0xff] %v7917_v15  ;;  %v1695_v27 = vmul.f32 2.0, %v1110_v10  ;;  %v2332_v46 = vsub.f32 %v1692_v28, %v2069_v19  ;;  %v7923_v36 = vpop.eup %6196  ;;  %6204 = vpow2.f32 %v3076_v61  ;;  %v9249_v61 = vpack.c.bf16 %v9247_v1, %v9248_v25 }
 0x27f   : > { %v2333_v37 = vsub.f32 %v1693_v49, %v2069_v19  ;;  %v2334_v24 = vsub.f32 %v1694_v3, %v2074_v33  ;;  %9243 = vst [vmem:[#allocation18_spill] sm:$0xff] %v7923_v36  ;;  %v7925_v40 = vpop.eup %6198  ;;  %6206 = vpow2.f32 %v3078_v0 }
 0x280   : > { %v2335_v8 = vsub.f32 %v1695_v27, %v2074_v33  ;;  %9244 = vst [vmem:[#allocation16_spill] sm:$0xff] %v7925_v40  ;;  %v2598_v28 = vsub.f32 %v2332_v46, %v6603_v14 }
 0x281   : > { %v2600_v43 = vsub.f32 %v2334_v24, %v6593_v60  ;;  %v2599_v19 = vsub.f32 %v2333_v37, %v6605_v16 }
 0x282   : > { %v2601_v58 = vsub.f32 %v2335_v8, %v6597_v62  ;;  %v7929_v10 = vpop.eup %6200  ;;  %v3080_v51 = vmul.f32 1.442695, %v2598_v28  ;;  %v9253_v28 = vld [vmem:[#allocation26_spill] sm:$0xff] }
 0x283   : > { %9245 = vst [vmem:[#allocation19_spill] sm:$0xff] %v7929_v10  ;;  %v7932_v29 = vpop.eup %6202  ;;  %v3084_v49 = vmul.f32 1.442695, %v2600_v43  ;;  %v1279_v27 = vpop.f32.mrf.mxu2  ;;  %v3082_v12 = vmul.f32 1.442695, %v2599_v19  ;;  %v9256_v19 = vld [vmem:[#allocation27_spill] sm:$0xff] }
 0x284   : > { %9246 = vst [vmem:[#allocation17_spill] sm:$0xff] %v7932_v29  ;;  %v3086_v3 = vmul.f32 1.442695, %v2601_v58  ;;  %v1448_v63 = vpop.f32.mrf.mxu3  ;;  %v1696_v18 = vmul.f32 2.0, %v1279_v27  ;;  %v944_v17 = vpop.f32.mrf.mxu0  ;;  %v9251_v27 = vld [vmem:[#allocation21_spill] sm:$0xff] }
 0x285   : > { %v1697_v24 = vmul.f32 2.0, %v1448_v63  ;;  %v1113_v8 = vpop.f32.mrf.mxu1  ;;  %v1698_v46 = vmul.f32 2.0, %v944_v17  ;;  %6208 = vpow2.f32 %v3084_v49  ;;  %v2079_v58 = vpop.permute.xlu1 %2078  ;;  %v9250_v63 = vld [vmem:[#allocation23_spill] sm:$0xff]  ;;  %v9254_v49 = vld [vmem:[#allocation24_spill] sm:$0xff] }
 0x286   : > { %v2336_v37 = vsub.f32 %v1696_v18, %v2074_v33  ;;  %6210 = vpow2.f32 %v3086_v3  ;;  %v1699_v56 = vmul.f32 2.0, %v1113_v8  ;;  %v9252_v36 = vpack.c.bf16 %v9250_v63, %v9251_v27  ;;  %v9257_v3 = vld [vmem:[#allocation25_spill] sm:$0xff]  ;;  %v2089_v29 = vpop.permute.xlu0 %2088 }
 0x287   : > { %v2337_v43 = vsub.f32 %v1697_v24, %v2074_v33  ;;  %3557 = vmatmul.bf16.gmra.mxu0 %v9249_v61  ;;  %v2338_v17 = vsub.f32 %v1698_v46, %v2079_v58  ;;  %v9255_v33 = vpack.c.bf16 %v9253_v28, %v9254_v49  ;;  %v9258_v18 = vpack.c.bf16 %v9256_v19, %v9257_v3  ;;  %v7953_v24 = vpop.eup %6204 }
 0x288   : > { %3726 = vmatmul.bf16.gmra.mxu1 %v9252_v36  ;;  %v2602_v15 = vsub.f32 %v2336_v37, %v6603_v14  ;;  %9259 = vst [vmem:[#allocation22_spill] sm:$0xff] %v7953_v24  ;;  %6212 = vpow2.f32 %v3080_v51  ;;  %v7955_v8 = vpop.eup %6206  ;;  %v2339_v36 = vsub.f32 %v1699_v56, %v2079_v58  ;;  %v2084_v56 = vpop.permute.xlu2 %2083 }
 0x289   : > { %v2603_v0 = vsub.f32 %v2337_v43, %v6605_v16  ;;  %3895 = vmatmul.bf16.gmra.mxu2 %v9255_v33  ;;  %9260 = vst [vmem:[#allocation20_spill] sm:$0xff] %v7955_v8  ;;  %6214 = vpow2.f32 %v3082_v12  ;;  %v2604_v61 = vsub.f32 %v2338_v17, %v6593_v60 }
 0x28a   : > { %4064 = vmatmul.bf16.gmra.mxu3 %v9258_v18  ;;  %v3088_v1 = vmul.f32 1.442695, %v2602_v15 }
 0x28b   : > { %v3090_v25 = vmul.f32 1.442695, %v2603_v0  ;;  %v1282_v37 = vpop.f32.mrf.mxu2  ;;  %v7957_v46 = vpop.eup %6208 }
 0x28c   : > { %v1451_v43 = vpop.f32.mrf.mxu3  ;;  %9261 = vst [vmem:[#allocation23_spill] sm:$0xff] %v7957_v46  ;;  %6216 = vpow2.f32 %v3088_v1  ;;  %v1700_v63 = vmul.f32 2.0, %v1282_v37  ;;  %v946_v28 = vpop.f32.mrf.mxu0 }
 0x28d   : > { %v1701_v27 = vmul.f32 2.0, %v1451_v43  ;;  %v1115_v49 = vpop.f32.mrf.mxu1  ;;  %v7960_v33 = vpop.eup %6210  ;;  %6218 = vpow2.f32 %v3090_v25  ;;  %v1702_v51 = vmul.f32 2.0, %v946_v28  ;;  %v3092_v43 = vmul.f32 1.442695, %v2604_v61  ;;  %v9265_v61 = vld [vmem:[#allocation30_spill] sm:$0xff] }
 0x28e   : > { %9262 = vst [vmem:[#allocation21_spill] sm:$0xff] %v7960_v33  ;;  %v1703_v15 = vmul.f32 2.0, %v1115_v49  ;;  %v2340_v0 = vsub.f32 %v1700_v63, %v2079_v58  ;;  %v7966_v1 = vpop.eup %6212  ;;  %v2605_v25 = vsub.f32 %v2339_v36, %v6597_v62 }
 0x28f   : > { %v2341_v3 = vsub.f32 %v1701_v27, %v2079_v58  ;;  %v2342_v18 = vsub.f32 %v1702_v51, %v2084_v56  ;;  %9263 = vst [vmem:[#allocation26_spill] sm:$0xff] %v7966_v1  ;;  %v7968_v37 = vpop.eup %6214  ;;  %6220 = vpow2.f32 %v3092_v43  ;;  %v9268_v1 = vld [vmem:[#allocation31_spill] sm:$0xff] }
 0x290   : > { %v2343_v17 = vsub.f32 %v1703_v15, %v2084_v56  ;;  %v2606_v63 = vsub.f32 %v2340_v0, %v6603_v14  ;;  %v3094_v0 = vmul.f32 1.442695, %v2605_v25 }
 0x291   : > { %v2608_v28 = vsub.f32 %v2342_v18, %v6593_v60  ;;  %v2607_v58 = vsub.f32 %v2341_v3, %v6605_v16 }
 0x292   : > { %v2609_v49 = vsub.f32 %v2343_v17, %v6597_v62  ;;  %v7973_v12 = vpop.eup %6216  ;;  %v3096_v3 = vmul.f32 1.442695, %v2606_v63  ;;  %v9271_v63 = vld [vmem:[#allocation34_spill] sm:$0xff] }
 0x293   : > { %9264 = vst [vmem:[#allocation24_spill] sm:$0xff] %v7973_v12  ;;  %v7976_v24 = vpop.eup %6218  ;;  %v3100_v27 = vmul.f32 1.442695, %v2608_v28  ;;  %v1284_v15 = vpop.f32.mrf.mxu2  ;;  %v3098_v10 = vmul.f32 1.442695, %v2607_v58  ;;  %v9269_v12 = vld [vmem:[#allocation29_spill] sm:$0xff] }
 0x294   : > { %v3102_v51 = vmul.f32 1.442695, %v2609_v49  ;;  %v1453_v19 = vpop.f32.mrf.mxu3  ;;  %v1704_v36 = vmul.f32 2.0, %v1284_v15  ;;  %v949_v18 = vpop.f32.mrf.mxu0  ;;  %v9266_v15 = vld [vmem:[#allocation28_spill] sm:$0xff]  ;;  %v9270_v35 = vpack.c.bf16 %v9268_v1, %v9269_v12 }
 0x295   : > { %v1705_v8 = vmul.f32 2.0, %v1453_v19  ;;  %v1118_v33 = vpop.f32.mrf.mxu1  ;;  %v1706_v46 = vmul.f32 2.0, %v949_v18  ;;  %6222 = vpow2.f32 %v3100_v27  ;;  %v9267_v19 = vpack.c.bf16 %v9265_v61, %v9266_v15  ;;  %v9272_v27 = vld [vmem:[#allocation32_spill] sm:$0xff]  ;;  %v7997_v61 = vpop.eup %6220 }
 0x296   : > { %v1707_v40 = vmul.f32 2.0, %v1118_v33  ;;  %v2344_v28 = vsub.f32 %v1704_v36, %v2084_v56  ;;  %6224 = vpow2.f32 %v3102_v51  ;;  %v9273_v36 = vpack.c.bf16 %v9271_v63, %v9272_v27  ;;  %9277 = vst [vmem:[#allocation27_spill] sm:$0xff] %v7997_v61 }
 0x297   : > { %v2345_v49 = vsub.f32 %v1705_v8, %v2084_v56  ;;  %v2346_v5 = vsub.f32 %v1706_v46, %v2089_v29  ;;  %3562 = vmatmul.bf16.gmra.mxu0 %v9267_v19  ;;  %v9274_v8 = vld [vmem:[#allocation35_spill] sm:$0xff]  ;;  %v9275_v56 = vld [vmem:[#allocation33_spill] sm:$0xff]  ;;  %6226 = vpow2.f32 %v3094_v0 }
 0x298   : > { %3731 = vmatmul.bf16.gmra.mxu1 %v9270_v35  ;;  %v2610_v43 = vsub.f32 %v2344_v28, %v6603_v14  ;;  %v2347_v25 = vsub.f32 %v1707_v40, %v2089_v29  ;;  %v9276_v46 = vpack.c.bf16 %v9274_v8, %v9275_v56  ;;  %6228 = vpow2.f32 %v3096_v3 }
 0x299   : > { %v2611_v33 = vsub.f32 %v2345_v49, %v6605_v16  ;;  %3900 = vmatmul.bf16.gmra.mxu2 %v9273_v36  ;;  %6230 = vpow2.f32 %v3098_v10  ;;  %v2612_v35 = vsub.f32 %v2346_v5, %v6593_v60  ;;  %v2094_v5 = vpop.permute.xlu1 %2093 }
 0x29a   : > { %4069 = vmatmul.bf16.gmra.mxu3 %v9276_v46  ;;  %v3104_v58 = vmul.f32 1.442695, %v2610_v43  ;;  %v2613_v18 = vsub.f32 %v2347_v25, %v6597_v62  ;;  %v6411_v46 = vmov 4  }
 0x29b   : > { %v3106_v51 = vmul.f32 1.442695, %v2611_v33  ;;  %v1287_v12 = vpop.f32.mrf.mxu2  ;;  %v8000_v40 = vpop.eup %6222  ;;  %v3108_v56 = vmul.f32 1.442695, %v2612_v35  ;;  %5753 = vset.pattern.permute.xlu1 %v6411_v46  ;;  %5754 = vset.pattern.permute.xlu2 %v6411_v46 }
 0x29c   : > { %v1456_v1 = vpop.f32.mrf.mxu3  ;;  %9278 = vst [vmem:[#allocation25_spill] sm:$0xff] %v8000_v40  ;;  %6232 = vpow2.f32 %v3104_v58  ;;  %v1708_v28 = vmul.f32 2.0, %v1287_v12  ;;  %v951_v15 = vpop.f32.mrf.mxu0  ;;  %v3110_v12 = vmul.f32 1.442695, %v2613_v18  ;;  %5755 = vset.pattern.permute.xlu0 %v6411_v46  ;;  %v9283_v18 = vld [vmem:[#allocation38_spill] sm:$0xff] }
 0x29d   : > { %v1709_v49 = vmul.f32 2.0, %v1456_v1  ;;  %v1120_v19 = vpop.f32.mrf.mxu1  ;;  %v8003_v0 = vpop.eup %6224  ;;  %6234 = vpow2.f32 %v3106_v51  ;;  %v1710_v3 = vmul.f32 2.0, %v951_v15 }
 0x29e   : > { %9279 = vst [vmem:[#allocation30_spill] sm:$0xff] %v8003_v0  ;;  %v1711_v43 = vmul.f32 2.0, %v1120_v19  ;;  %v2348_v33 = vsub.f32 %v1708_v28, %v2089_v29  ;;  %v8007_v63 = vpop.eup %6226  ;;  %6236 = vpow2.f32 %v3108_v56  ;;  %v2099_v0 = vpop.permute.xlu2 %2098  ;;  %v9284_v56 = vld [vmem:[#allocation36_spill] sm:$0xff] }
 0x29f   : > { %9280 = vst [vmem:[#allocation28_spill] sm:$0xff] %v8007_v63  ;;  %v2349_v27 = vsub.f32 %v1709_v49, %v2089_v29  ;;  %v2350_v36 = vsub.f32 %v1710_v3, %v2094_v5  ;;  %v8009_v25 = vpop.eup %6228  ;;  %6238 = vpow2.f32 %v3110_v12 }
 0x2a0   : > { %v2351_v8 = vsub.f32 %v1711_v43, %v2094_v5  ;;  %9281 = vst [vmem:[#allocation31_spill] sm:$0xff] %v8009_v25  ;;  %v8013_v51 = vpop.eup %6230  ;;  %v2614_v49 = vsub.f32 %v2348_v33, %v6603_v14  ;;  %v9287_v25 = vld [vmem:[#allocation37_spill] sm:$0xff] }
 0x2a1   : > { %v2616_v1 = vsub.f32 %v2350_v36, %v6593_v60  ;;  %v2615_v35 = vsub.f32 %v2349_v27, %v6605_v16 }
 0x2a2   : > { %v2617_v28 = vsub.f32 %v2351_v8, %v6597_v62  ;;  %v8017_v29 = vpop.eup %6232  ;;  %v3112_v27 = vmul.f32 1.442695, %v2614_v49  ;;  %v9289_v49 = vld [vmem:[#allocation42_spill] sm:$0xff] }
 0x2a3   : > { %9282 = vst [vmem:[#allocation29_spill] sm:$0xff] %v8017_v29  ;;  %v8020_v15 = vpop.eup %6234  ;;  %v3116_v19 = vmul.f32 1.442695, %v2616_v1  ;;  %v1289_v43 = vpop.f32.mrf.mxu2  ;;  %v3114_v61 = vmul.f32 1.442695, %v2615_v35 }
 0x2a4   : > { %v3118_v3 = vmul.f32 1.442695, %v2617_v28  ;;  %v1458_v58 = vpop.f32.mrf.mxu3  ;;  %v1712_v36 = vmul.f32 2.0, %v1289_v43  ;;  %v954_v8 = vpop.f32.mrf.mxu0  ;;  %v9285_v43 = vpack.c.bf16 %v9283_v18, %v9284_v56 }
 0x2a5   : > { %v1713_v10 = vmul.f32 2.0, %v1458_v58  ;;  %v1123_v46 = vpop.f32.mrf.mxu1  ;;  %v1714_v33 = vmul.f32 2.0, %v954_v8  ;;  %6240 = vpow2.f32 %v3116_v19  ;;  %v9286_v58 = vld [vmem:[#allocation39_spill] sm:$0xff]  ;;  %v9290_v19 = vld [vmem:[#allocation40_spill] sm:$0xff] }
 0x2a6   : > { %v1715_v63 = vmul.f32 2.0, %v1123_v46  ;;  %v2352_v1 = vsub.f32 %v1712_v36, %v2094_v5  ;;  %6242 = vpow2.f32 %v3118_v3  ;;  %v9288_v29 = vpack.c.bf16 %v9286_v58, %v9287_v25  ;;  %v8041_v3 = vpop.eup %6236 }
 0x2a7   : > { %v2353_v28 = vsub.f32 %v1713_v10, %v2094_v5  ;;  %v2354_v40 = vsub.f32 %v1714_v33, %v2099_v0  ;;  %3567 = vmatmul.bf16.gmra.mxu0 %v9285_v43  ;;  %v9291_v36 = vpack.c.bf16 %v9289_v49, %v9290_v19  ;;  %v9292_v10 = vld [vmem:[#allocation43_spill] sm:$0xff]  ;;  %v9293_v5 = vld [vmem:[#allocation41_spill] sm:$0xff]  ;;  %9295 = vst [vmem:[#allocation34_spill] sm:$0xff] %v8041_v3  ;;  %6244 = vpow2.f32 %v3112_v27  ;;  %v8043_v25 = vpop.eup %6238 }
 0x2a8   : > { %3736 = vmatmul.bf16.gmra.mxu1 %v9288_v29  ;;  %v2618_v12 = vsub.f32 %v2352_v1, %v6603_v14  ;;  %v2355_v46 = vsub.f32 %v1715_v63, %v2099_v0  ;;  %v9294_v35 = vpack.c.bf16 %v9292_v10, %v9293_v5  ;;  %9296 = vst [vmem:[#allocation32_spill] sm:$0xff] %v8043_v25  ;;  %6246 = vpow2.f32 %v3114_v61 }
 0x2a9   : > { %v2619_v8 = vsub.f32 %v2353_v28, %v6605_v16  ;;  %3905 = vmatmul.bf16.gmra.mxu2 %v9291_v36  ;;  %v2620_v29 = vsub.f32 %v2354_v40, %v6593_v60  ;;  %v2104_v40 = vpop.permute.xlu0 %2103 }
 0x2aa   : > { %4074 = vmatmul.bf16.gmra.mxu3 %v9294_v35  ;;  %v3120_v18 = vmul.f32 1.442695, %v2618_v12  ;;  %v2621_v56 = vsub.f32 %v2355_v46, %v6597_v62 }
 0x2ab   : > { %v3122_v33 = vmul.f32 1.442695, %v2619_v8  ;;  %v1292_v1 = vpop.f32.mrf.mxu2  ;;  %v8046_v28 = vpop.eup %6240 }
 0x2ac   : > { %v1461_v63 = vpop.f32.mrf.mxu3  ;;  %6248 = vpow2.f32 %v3120_v18  ;;  %v1716_v43 = vmul.f32 2.0, %v1292_v1  ;;  %v956_v49 = vpop.f32.mrf.mxu0  ;;  %v3124_v1 = vmul.f32 1.442695, %v2620_v29  ;;  %v3126_v17 = vmul.f32 1.442695, %v2621_v56  ;;  %v9302_v29 = vld [vmem:[#allocation47_spill] sm:$0xff] }
 0x2ad   : > { %v1717_v58 = vmul.f32 2.0, %v1461_v63  ;;  %v1125_v19 = vpop.f32.mrf.mxu1  ;;  %v8049_v36 = vpop.eup %6242  ;;  %6250 = vpow2.f32 %v3122_v33  ;;  %v1718_v27 = vmul.f32 2.0, %v956_v49 }
 0x2ae   : > { %9297 = vst [vmem:[#allocation35_spill] sm:$0xff] %v8049_v36  ;;  %v1719_v12 = vmul.f32 2.0, %v1125_v19  ;;  %v2356_v8 = vsub.f32 %v1716_v43, %v2099_v0  ;;  %v8055_v18 = vpop.eup %6244  ;;  %6252 = vpow2.f32 %v3124_v1  ;;  %v9300_v36 = vld [vmem:[#allocation44_spill] sm:$0xff]  ;;  %v9303_v1 = vld [vmem:[#allocation45_spill] sm:$0xff] }
 0x2af   : > { %v2357_v5 = vsub.f32 %v1717_v58, %v2099_v0  ;;  %v2358_v35 = vsub.f32 %v1718_v27, %v2104_v40  ;;  %9298 = vst [vmem:[#allocation33_spill] sm:$0xff] %v8055_v18  ;;  %v8057_v63 = vpop.eup %6246  ;;  %6254 = vpow2.f32 %v3126_v17  ;;  %v9306_v17 = vld [vmem:[#allocation48_spill] sm:$0xff] }
 0x2b0   : > { %v2359_v46 = vsub.f32 %v1719_v12, %v2104_v40  ;;  %v2622_v43 = vsub.f32 %v2356_v8, %v6603_v14 }
 0x2b1   : > { %v2624_v33 = vsub.f32 %v2358_v35, %v6593_v60  ;;  %v2623_v0 = vsub.f32 %v2357_v5, %v6605_v16 }
 0x2b2   : > { %v2625_v49 = vsub.f32 %v2359_v46, %v6597_v62  ;;  %v8061_v19 = vpop.eup %6248  ;;  %v3128_v8 = vmul.f32 1.442695, %v2622_v43  ;;  %v9305_v46 = vld [vmem:[#allocation50_spill] sm:$0xff] }
 0x2b3   : > { %v8064_v61 = vpop.eup %6250  ;;  %v3132_v58 = vmul.f32 1.442695, %v2624_v33  ;;  %v1294_v12 = vpop.f32.mrf.mxu2  ;;  %v3130_v33 = vmul.f32 1.442695, %v2623_v0  ;;  %v9307_v43 = vpack.c.bf16 %v9305_v46, %v9306_v17 }
 0x2b4   : > { %v3134_v27 = vmul.f32 1.442695, %v2625_v49  ;;  %v1463_v10 = vpop.f32.mrf.mxu3  ;;  %v1720_v56 = vmul.f32 2.0, %v1294_v12  ;;  %v3533_v35 = vpop.f32.mrf.mxu0  ;;  %v9299_v49 = vld [vmem:[#allocation46_spill] sm:$0xff]  ;;  %v9304_v12 = vpack.c.bf16 %v9302_v29, %v9303_v1 }
 0x2b5   : > { %v1721_v60 = vmul.f32 2.0, %v1463_v10  ;;  %v3702_v62 = vpop.f32.mrf.mxu1  ;;  %6256 = vpow2.f32 %v3132_v58  ;;  %v9301_v3 = vpack.c.bf16 %v9299_v49, %v9300_v36  ;;  %v9308_v58 = vld [vmem:[#allocation51_spill] sm:$0xff] }
 0x2b6   : > { %v2360_v25 = vsub.f32 %v1720_v56, %v2104_v40  ;;  %6258 = vpow2.f32 %v3134_v27  ;;  %v8085_v27 = vpop.eup %6252  ;;  %v3703_v56 = vadd.f32 %v3702_v62, %v3533_v35  ;;  %v9322_v35 = vld [vmem:[#allocation55_spill] sm:$0xff] }
 0x2b7   : > { %v2361_v5 = vsub.f32 %v1721_v60, %v2104_v40  ;;  %3572 = vmatmul.bf16.gmra.mxu0 %v9301_v3  ;;  %v9309_v40 = vld [vmem:[#allocation49_spill] sm:$0xff]  ;;  %9311 = vst [vmem:[#allocation38_spill] sm:$0xff] %v8085_v27  ;;  %6260 = vpow2.f32 %v3128_v8  ;;  %v8087_v29 = vpop.eup %6254  ;;  %v9319_v8 = vld [vmem:[#allocation54_spill] sm:$0xff] }
 0x2b8   : > { %3741 = vmatmul.bf16.gmra.mxu1 %v9304_v12  ;;  %v2626_v10 = vsub.f32 %v2360_v25, %v6603_v14  ;;  %v9310_v0 = vpack.c.bf16 %v9308_v58, %v9309_v40  ;;  %9312 = vst [vmem:[#allocation36_spill] sm:$0xff] %v8087_v29  ;;  %6262 = vpow2.f32 %v3130_v33  ;;  %v4200_v58 = vld [vmem:[%s6508_s25] sm:$0xff]  ;;  %v9323_v27 = vld [vmem:[#allocation53_spill] sm:$0xff] }
 0x2b9   : > { %v2627_v18 = vsub.f32 %v2361_v5, %v6605_v16  ;;  %3910 = vmatmul.bf16.gmra.mxu2 %v9307_v43 }
 0x2ba   : > { %4079 = vmatmul.bf16.gmra.mxu3 %v9310_v0  ;;  %v3136_v3 = vmul.f32 1.442695, %v2626_v10 }
 0x2bb   : > { %v3138_v36 = vmul.f32 1.442695, %v2627_v18  ;;  %v3871_v14 = vpop.f32.mrf.mxu2  ;;  %v8089_v16 = vpop.eup %6256 }
 0x2bc   : > { %v4040_v25 = vpop.f32.mrf.mxu3  ;;  %9313 = vst [vmem:[#allocation39_spill] sm:$0xff] %v8089_v16  ;;  %6264 = vpow2.f32 %v3136_v3  ;;  %v3872_v60 = vadd.f32 %v3871_v14, %v3703_v56  ;;  %v3535_v46 = vpop.f32.mrf.mxu0  ;;  %v4201_v14 = vld [vmem:[%s6508_s25 + $0x8] sm:$0xff]  ;;  %v9324_v16 = vpack.c.bf16 %v9322_v35, %v9323_v27 }
 0x2bd   : > { %v3704_v5 = vpop.f32.mrf.mxu1  ;;  %v8091_v49 = vpop.eup %6258  ;;  %6266 = vpow2.f32 %v3138_v36 }
 0x2be   : > { %9314 = vst [vmem:[#allocation37_spill] sm:$0xff] %v8091_v49  ;;  %v4041_v18 = vadd.f32 %v4040_v25, %v3872_v60  ;;  %v8097_v62 = vpop.eup %6260  ;;  %v3705_v12 = vadd.f32 %v3704_v5, %v3535_v46  ;;  %v9320_v46 = vld [vmem:[#allocation52_spill] sm:$0xff] }
 0x2bf   : > { %9315 = vst [vmem:[#allocation42_spill] sm:$0xff] %v8097_v62  ;;  %v8099_v33 = vpop.eup %6262  ;;  %v9321_v5 = vpack.c.bf16 %v9319_v8, %v9320_v46  ;;  %v9326_v62 = vld [vmem:[#allocation56_spill] sm:$0xff] }
 0x2c0   : > { %4464 = vperm.xlu1 %5753, %v4041_v18   ;;  %9316 = vst [vmem:[#allocation40_spill] sm:$0xff] %v8099_v33  ;;  %v4264_v60 = vmul.f32 %v4200_v58, %v4041_v18  ;;  %v4979_v40 = vsel %vm4328_vm3, %v4041_v18, 0.0  ;;  %v9328_v33 = vld [vmem:[#allocation59_spill] sm:$0xff] }
 0x2c2   : > { %v8101_v1 = vpop.eup %6264 }
 0x2c3   : > { %9317 = vst [vmem:[#allocation43_spill] sm:$0xff] %v8101_v1  ;;  %v8103_v10 = vpop.eup %6266  ;;  %v3873_v17 = vpop.f32.mrf.mxu2 }
 0x2c4   : > { %9318 = vst [vmem:[#allocation41_spill] sm:$0xff] %v8103_v10  ;;  %v4042_v43 = vpop.f32.mrf.mxu3  ;;  %v3874_v0 = vadd.f32 %v3873_v17, %v3705_v12  ;;  %v3538_v3 = vpop.f32.mrf.mxu0  ;;  %v9325_v17 = vld [vmem:[#allocation58_spill] sm:$0xff] }
 0x2c5   : > { %v3707_v36 = vpop.f32.mrf.mxu1  ;;  %v9327_v56 = vpack.c.bf16 %v9325_v17, %v9326_v62 }
 0x2c6   : > { %v4043_v25 = vadd.f32 %v4042_v43, %v3874_v0  ;;  %v9329_v43 = vld [vmem:[#allocation57_spill] sm:$0xff]  ;;  %v3708_v46 = vadd.f32 %v3707_v36, %v3538_v3 }
 0x2c7   : > { %3577 = vmatmul.bf16.gmra.mxu0 %v9321_v5  ;;  %v9330_v58 = vpack.c.bf16 %v9328_v33, %v9329_v43 }
 0x2c8   : > { %3746 = vmatmul.bf16.gmra.mxu1 %v9324_v16  ;;  %v4980_v12 = vsel %vm4328_vm3, %v4043_v25, 0.0  ;;  %v4265_v0 = vmul.f32 %v4201_v14, %v4043_v25  ;;  %4469 = vperm.xlu2 %5754, %v4043_v25   ;;  %v4329_v16 = vsel %vm4328_vm3, %v4264_v60, 0.0 }
 0x2c9   : > { %3915 = vmatmul.bf16.gmra.mxu2 %v9327_v56  ;;  %v4981_v8 = vadd.f32 %v4980_v12, %v4979_v40  ;;  %v4202_v56 = vld [vmem:[%s6508_s25 + $0x10] sm:$0xff] }
 0x2ca   : > { %4084 = vmatmul.bf16.gmra.mxu3 %v9330_v58  ;;  %v4330_v27 = vsel %vm4328_vm3, %v4265_v0, 0.0 }
 0x2cb   : > { %v3876_v18 = vpop.f32.mrf.mxu2  ;;  %v4331_v5 = vadd.f32 %v4330_v27, %v4329_v16  ;;  %v9331_v16 = vld [vmem:[#allocation62_spill] sm:$0xff] }
 0x2cc   : > { %v4045_v35 = vpop.f32.mrf.mxu3  ;;  %v3877_v10 = vadd.f32 %v3876_v18, %v3708_v46  ;;  %v3540_v1 = vpop.f32.mrf.mxu0  ;;  %v4203_v46 = vld [vmem:[%s6508_s25 + $0x18] sm:$0xff]  ;;  %v9332_v18 = vld [vmem:[#allocation60_spill] sm:$0xff] }
 0x2cd   : > { %v3709_v62 = vpop.f32.mrf.mxu1  ;;  %v9333_v29 = vpack.c.bf16 %v9331_v16, %v9332_v18 }
 0x2ce   : > { %v4046_v17 = vadd.f32 %v4045_v35, %v3877_v10  ;;  %v3710_v25 = vadd.f32 %v3709_v62, %v3540_v1  ;;  %v9334_v10 = vld [vmem:[#allocation63_spill] sm:$0xff]  ;;  %v9335_v35 = vld [vmem:[#allocation61_spill] sm:$0xff]  ;;  %v9338_v62 = vld [vmem:[#allocation64_spill] sm:$0xff] }
 0x2cf   : > { %v9336_v49 = vpack.c.bf16 %v9334_v10, %v9335_v35  ;;  %v4204_v10 = vld [vmem:[%s6508_s25 + $0x20] sm:$0xff] }
 0x2d0   : > { %v4982_v33 = vsel %vm4328_vm3, %v4046_v17, 0.0  ;;  %4474 = vperm.xlu0 %5755, %v4046_v17   ;;  %v4266_v14 = vmul.f32 %v4202_v56, %v4046_v17  ;;  %v9341_v17 = vld [vmem:[#allocation65_spill] sm:$0xff] }
 0x2d1   : > { %v4983_v40 = vadd.f32 %v4982_v33, %v4981_v8  ;;  %v9337_v8 = vld [vmem:[#allocation66_spill] sm:$0xff] }
 0x2d2   : > { %v4332_v3 = vsel %vm4328_vm3, %v4266_v14, 0.0  ;;  %v9339_v56 = vpack.c.bf16 %v9337_v8, %v9338_v62 }
 0x2d3   : > { %v3878_v36 = vpop.f32.mrf.mxu2  ;;  %v4333_v60 = vadd.f32 %v4332_v3, %v4331_v5  ;;  %v9340_v5 = vld [vmem:[#allocation67_spill] sm:$0xff] }
 0x2d4   : > { %v4047_v12 = vpop.f32.mrf.mxu3  ;;  %v3879_v43 = vadd.f32 %v3878_v36, %v3710_v25  ;;  %v3543_v58 = vpop.f32.mrf.mxu0  ;;  %v9342_v33 = vpack.c.bf16 %v9340_v5, %v9341_v17  ;;  %v4205_v17 = vld [vmem:[%s6508_s25 + $0x28] sm:$0xff] }
 0x2d5   : > { %v3712_v0 = vpop.f32.mrf.mxu1 }
 0x2d6   : > { %v4048_v27 = vadd.f32 %v4047_v12, %v3879_v43  ;;  %v3713_v3 = vadd.f32 %v3712_v0, %v3543_v58 }
 0x2d7   : > { %3582 = vmatmul.bf16.gmra.mxu0 %v9333_v29 }
 0x2d8   : > { %3751 = vmatmul.bf16.gmra.mxu1 %v9336_v49  ;;  %v4984_v1 = vsel %vm4328_vm3, %v4048_v27, 0.0  ;;  %v4267_v14 = vmul.f32 %v4203_v46, %v4048_v27  ;;  %4479 = vperm.xlu1 %5753, %v4048_v27  }
 0x2d9   : > { %3920 = vmatmul.bf16.gmra.mxu2 %v9339_v56  ;;  %v4985_v25 = vadd.f32 %v4984_v1, %v4983_v40 }
 0x2da   : > { %4089 = vmatmul.bf16.gmra.mxu3 %v9342_v33  ;;  %v4334_v29 = vsel %vm4328_vm3, %v4267_v14, 0.0  ;;  %v9343_v14 = vld [vmem:[#allocation70_spill] sm:$0xff] }
 0x2db   : > { %v3881_v36 = vpop.f32.mrf.mxu2  ;;  %v4335_v43 = vadd.f32 %v4334_v29, %v4333_v60 }
 0x2dc   : > { %v4050_v12 = vpop.f32.mrf.mxu3  ;;  %v3882_v49 = vadd.f32 %v3881_v36, %v3713_v3  ;;  %v3545_v16 = vpop.f32.mrf.mxu0  ;;  %v9344_v3 = vld [vmem:[#allocation68_spill] sm:$0xff]  ;;  %v9346_v36 = vld [vmem:[#allocation71_spill] sm:$0xff] }
 0x2dd   : > { %v3714_v18 = vpop.f32.mrf.mxu1  ;;  %v9345_v29 = vpack.c.bf16 %v9343_v14, %v9344_v3 }
 0x2de   : > { %v4051_v35 = vadd.f32 %v4050_v12, %v3882_v49  ;;  %v3715_v46 = vadd.f32 %v3714_v18, %v3545_v16  ;;  %v9347_v12 = vld [vmem:[#allocation69_spill] sm:$0xff]  ;;  %v9349_v16 = vld [vmem:[#allocation74_spill] sm:$0xff]  ;;  %v9350_v18 = vld [vmem:[#allocation72_spill] sm:$0xff] }
 0x2df   : > { %v9348_v49 = vpack.c.bf16 %v9346_v36, %v9347_v12  ;;  %v4206_v12 = vld [vmem:[%s6508_s25 + $0x30] sm:$0xff] }
 0x2e0   : > { %v4986_v8 = vsel %vm4328_vm3, %v4051_v35, 0.0  ;;  %4484 = vperm.xlu2 %5754, %v4051_v35   ;;  %v4268_v62 = vmul.f32 %v4204_v10, %v4051_v35  ;;  %v9351_v10 = vpack.c.bf16 %v9349_v16, %v9350_v18  ;;  %v9353_v35 = vld [vmem:[#allocation73_spill] sm:$0xff] }
 0x2e1   : > { %v4987_v56 = vadd.f32 %v4986_v8, %v4985_v25 }
 0x2e2   : > { %v4336_v40 = vsel %vm4328_vm3, %v4268_v62, 0.0 }
 0x2e3   : > { %v3883_v58 = vpop.f32.mrf.mxu2  ;;  %v4337_v27 = vadd.f32 %v4336_v40, %v4335_v43  ;;  %v9352_v43 = vld [vmem:[#allocation75_spill] sm:$0xff] }
 0x2e4   : > { %v4052_v0 = vpop.f32.mrf.mxu3  ;;  %v3884_v1 = vadd.f32 %v3883_v58, %v3715_v46  ;;  %v3548_v5 = vpop.f32.mrf.mxu0  ;;  %v9354_v8 = vpack.c.bf16 %v9352_v43, %v9353_v35  ;;  %v4207_v35 = vld [vmem:[%s6508_s25 + $0x38] sm:$0xff] }
 0x2e5   : > { %v3717_v60 = vpop.f32.mrf.mxu1 }
 0x2e6   : > { %v4053_v33 = vadd.f32 %v4052_v0, %v3884_v1  ;;  %v3718_v40 = vadd.f32 %v3717_v60, %v3548_v5 }
 0x2e7   : > { %3587 = vmatmul.bf16.gmra.mxu0 %v9345_v29 }
 0x2e8   : > { %3756 = vmatmul.bf16.gmra.mxu1 %v9348_v49  ;;  %v4988_v25 = vsel %vm4328_vm3, %v4053_v33, 0.0  ;;  %v4269_v62 = vmul.f32 %v4205_v17, %v4053_v33  ;;  %4489 = vperm.xlu1 %5753, %v4053_v33  }
 0x2e9   : > { %3925 = vmatmul.bf16.gmra.mxu2 %v9351_v10  ;;  %v4989_v46 = vadd.f32 %v4988_v25, %v4987_v56 }
 0x2ea   : > { %4094 = vmatmul.bf16.gmra.mxu3 %v9354_v8  ;;  %v4338_v58 = vsel %vm4328_vm3, %v4269_v62, 0.0  ;;  %v9355_v62 = vld [vmem:[#allocation78_spill] sm:$0xff] }
 0x2eb   : > { %v3886_v0 = vpop.f32.mrf.mxu2  ;;  %v4339_v14 = vadd.f32 %v4338_v58, %v4337_v27 }
 0x2ec   : > { %v4055_v1 = vpop.f32.mrf.mxu3  ;;  %v3887_v3 = vadd.f32 %v3886_v0, %v3718_v40  ;;  %v3550_v29 = vpop.f32.mrf.mxu0  ;;  %v9356_v40 = vld [vmem:[#allocation76_spill] sm:$0xff]  ;;  %v9358_v0 = vld [vmem:[#allocation79_spill] sm:$0xff] }
 0x2ed   : > { %v3719_v36 = vpop.f32.mrf.mxu1  ;;  %v9357_v58 = vpack.c.bf16 %v9355_v62, %v9356_v40 }
 0x2ee   : > { %v4056_v49 = vadd.f32 %v4055_v1, %v3887_v3  ;;  %v3720_v17 = vadd.f32 %v3719_v36, %v3550_v29  ;;  %v9359_v1 = vld [vmem:[#allocation77_spill] sm:$0xff]  ;;  %v9361_v29 = vld [vmem:[#allocation82_spill] sm:$0xff]  ;;  %v9362_v36 = vld [vmem:[#allocation80_spill] sm:$0xff] }
 0x2ef   : > { %v9360_v3 = vpack.c.bf16 %v9358_v0, %v9359_v1  ;;  %v4208_v1 = vld [vmem:[%s6508_s25 + $0x40] sm:$0xff] }
 0x2f0   : > { %v4990_v16 = vsel %vm4328_vm3, %v4056_v49, 0.0  ;;  %4494 = vperm.xlu2 %5754, %v4056_v49   ;;  %v4270_v18 = vmul.f32 %v4206_v12, %v4056_v49  ;;  %v9363_v12 = vpack.c.bf16 %v9361_v29, %v9362_v36  ;;  %v9365_v49 = vld [vmem:[#allocation81_spill] sm:$0xff] }
 0x2f1   : > { %v4991_v10 = vadd.f32 %v4990_v16, %v4989_v46 }
 0x2f2   : > { %v4340_v56 = vsel %vm4328_vm3, %v4270_v18, 0.0 }
 0x2f3   : > { %v3888_v5 = vpop.f32.mrf.mxu2  ;;  %v4341_v33 = vadd.f32 %v4340_v56, %v4339_v14  ;;  %v9364_v14 = vld [vmem:[#allocation83_spill] sm:$0xff] }
 0x2f4   : > { %v4057_v60 = vpop.f32.mrf.mxu3  ;;  %v3889_v25 = vadd.f32 %v3888_v5, %v3720_v17  ;;  %v3553_v43 = vpop.f32.mrf.mxu0  ;;  %v9366_v16 = vpack.c.bf16 %v9364_v14, %v9365_v49  ;;  %v4209_v49 = vld [vmem:[%s6508_s25 + $0x48] sm:$0xff] }
 0x2f5   : > { %v3722_v27 = vpop.f32.mrf.mxu1 }
 0x2f6   : > { %v4058_v8 = vadd.f32 %v4057_v60, %v3889_v25  ;;  %v3723_v56 = vadd.f32 %v3722_v27, %v3553_v43 }
 0x2f7   : > { %3592 = vmatmul.bf16.gmra.mxu0 %v9357_v58 }
 0x2f8   : > { %3761 = vmatmul.bf16.gmra.mxu1 %v9360_v3  ;;  %v4992_v46 = vsel %vm4328_vm3, %v4058_v8, 0.0  ;;  %v4271_v18 = vmul.f32 %v4207_v35, %v4058_v8  ;;  %4499 = vperm.xlu0 %5755, %v4058_v8  }
 0x2f9   : > { %3930 = vmatmul.bf16.gmra.mxu2 %v9363_v12  ;;  %v4993_v17 = vadd.f32 %v4992_v46, %v4991_v10 }
 0x2fa   : > { %4099 = vmatmul.bf16.gmra.mxu3 %v9366_v16  ;;  %v4342_v5 = vsel %vm4328_vm3, %v4271_v18, 0.0  ;;  %v9367_v18 = vld [vmem:[#allocation86_spill] sm:$0xff] }
 0x2fb   : > { %v4343_v62 = vadd.f32 %v4342_v5, %v4341_v33 }
 0x2fc   : > { %v3891_v60 = vpop.f32.mrf.mxu2  ;;  %v3555_v58 = vpop.f32.mrf.mxu0 }
 0x2fd   : > { %v4060_v25 = vpop.f32.mrf.mxu3  ;;  %v3892_v40 = vadd.f32 %v3891_v60, %v3723_v56  ;;  %v3724_v0 = vpop.f32.mrf.mxu1  ;;  %v9368_v56 = vld [vmem:[#allocation84_spill] sm:$0xff]  ;;  %v9370_v60 = vld [vmem:[#allocation87_spill] sm:$0xff] }
 0x2fe   : > { %v3725_v35 = vadd.f32 %v3724_v0, %v3555_v58  ;;  %v9369_v5 = vpack.c.bf16 %v9367_v18, %v9368_v56  ;;  %v9373_v58 = vld [vmem:[#allocation90_spill] sm:$0xff]  ;;  %v9374_v0 = vld [vmem:[#allocation88_spill] sm:$0xff] }
 0x2ff   : > { %v4061_v3 = vadd.f32 %v4060_v25, %v3892_v40  ;;  %v9371_v25 = vld [vmem:[#allocation85_spill] sm:$0xff] }
 0x300   : > { %v9372_v40 = vpack.c.bf16 %v9370_v60, %v9371_v25  ;;  %v4210_v25 = vld [vmem:[%s6508_s25 + $0x50] sm:$0xff] }
 0x301   : > { %v4994_v29 = vsel %vm4328_vm3, %v4061_v3, 0.0  ;;  %4504 = vperm.xlu1 %5753, %v4061_v3   ;;  %v4272_v36 = vmul.f32 %v4208_v1, %v4061_v3  ;;  %v9375_v1 = vpack.c.bf16 %v9373_v58, %v9374_v0  ;;  %v9377_v3 = vld [vmem:[#allocation89_spill] sm:$0xff] }
 0x302   : > { %v4995_v12 = vadd.f32 %v4994_v29, %v4993_v17 }
 0x303   : > { %v4344_v10 = vsel %vm4328_vm3, %v4272_v36, 0.0 }
 0x304   : > { %v3893_v43 = vpop.f32.mrf.mxu2  ;;  %v4345_v8 = vadd.f32 %v4344_v10, %v4343_v62  ;;  %v3558_v14 = vpop.f32.mrf.mxu0  ;;  %v9376_v62 = vld [vmem:[#allocation91_spill] sm:$0xff] }
 0x305   : > { %v4062_v27 = vpop.f32.mrf.mxu3  ;;  %v3894_v46 = vadd.f32 %v3893_v43, %v3725_v35  ;;  %v3727_v33 = vpop.f32.mrf.mxu1  ;;  %v9378_v29 = vpack.c.bf16 %v9376_v62, %v9377_v3  ;;  %v4211_v3 = vld [vmem:[%s6508_s25 + $0x58] sm:$0xff] }
 0x306   : > { %v3728_v10 = vadd.f32 %v3727_v33, %v3558_v14 }
 0x307   : > { %v4063_v16 = vadd.f32 %v4062_v27, %v3894_v46  ;;  %3597 = vmatmul.bf16.gmra.mxu0 %v9369_v5 }
 0x308   : > { %3766 = vmatmul.bf16.gmra.mxu1 %v9372_v40 }
 0x309   : > { %v4996_v17 = vsel %vm4328_vm3, %v4063_v16, 0.0  ;;  %3935 = vmatmul.bf16.gmra.mxu2 %v9375_v1  ;;  %v4273_v36 = vmul.f32 %v4209_v49, %v4063_v16  ;;  %4509 = vperm.xlu2 %5754, %v4063_v16  }
 0x30a   : > { %4104 = vmatmul.bf16.gmra.mxu3 %v9378_v29  ;;  %v4997_v35 = vadd.f32 %v4996_v17, %v4995_v12 }
 0x30b   : > { %v4346_v43 = vsel %vm4328_vm3, %v4273_v36, 0.0  ;;  %v9379_v36 = vld [vmem:[#allocation94_spill] sm:$0xff] }
 0x30c   : > { %v3896_v27 = vpop.f32.mrf.mxu2  ;;  %v4347_v18 = vadd.f32 %v4346_v43, %v4345_v8  ;;  %v3560_v5 = vpop.f32.mrf.mxu0 }
 0x30d   : > { %v4065_v46 = vpop.f32.mrf.mxu3  ;;  %v3897_v56 = vadd.f32 %v3896_v27, %v3728_v10  ;;  %v3729_v60 = vpop.f32.mrf.mxu1  ;;  %v9380_v10 = vld [vmem:[#allocation92_spill] sm:$0xff]  ;;  %v9382_v27 = vld [vmem:[#allocation95_spill] sm:$0xff] }
 0x30e   : > { %v3730_v49 = vadd.f32 %v3729_v60, %v3560_v5  ;;  %v9381_v43 = vpack.c.bf16 %v9379_v36, %v9380_v10  ;;  %v9385_v5 = vld [vmem:[#allocation98_spill] sm:$0xff]  ;;  %v9386_v60 = vld [vmem:[#allocation96_spill] sm:$0xff] }
 0x30f   : > { %v4066_v40 = vadd.f32 %v4065_v46, %v3897_v56  ;;  %v9383_v46 = vld [vmem:[#allocation93_spill] sm:$0xff] }
 0x310   : > { %v9384_v56 = vpack.c.bf16 %v9382_v27, %v9383_v46  ;;  %v4212_v46 = vld [vmem:[%s6508_s25 + $0x60] sm:$0xff] }
 0x311   : > { %v4998_v58 = vsel %vm4328_vm3, %v4066_v40, 0.0  ;;  %4514 = vperm.xlu0 %5755, %v4066_v40   ;;  %v4274_v0 = vmul.f32 %v4210_v25, %v4066_v40  ;;  %v9387_v25 = vpack.c.bf16 %v9385_v5, %v9386_v60  ;;  %v9389_v40 = vld [vmem:[#allocation97_spill] sm:$0xff] }
 0x312   : > { %v4999_v1 = vadd.f32 %v4998_v58, %v4997_v35 }
 0x313   : > { %v4348_v12 = vsel %vm4328_vm3, %v4274_v0, 0.0 }
 0x314   : > { %v3898_v14 = vpop.f32.mrf.mxu2  ;;  %v4349_v16 = vadd.f32 %v4348_v12, %v4347_v18  ;;  %v3563_v62 = vpop.f32.mrf.mxu0  ;;  %v9388_v18 = vld [vmem:[#allocation99_spill] sm:$0xff] }
 0x315   : > { %v4067_v33 = vpop.f32.mrf.mxu3  ;;  %v3899_v17 = vadd.f32 %v3898_v14, %v3730_v49  ;;  %v3732_v8 = vpop.f32.mrf.mxu1  ;;  %v9390_v58 = vpack.c.bf16 %v9388_v18, %v9389_v40  ;;  %v4213_v40 = vld [vmem:[%s6508_s25 + $0x68] sm:$0xff] }
 0x316   : > { %v3733_v12 = vadd.f32 %v3732_v8, %v3563_v62 }
 0x317   : > { %v4068_v29 = vadd.f32 %v4067_v33, %v3899_v17  ;;  %3602 = vmatmul.bf16.gmra.mxu0 %v9381_v43 }
 0x318   : > { %3771 = vmatmul.bf16.gmra.mxu1 %v9384_v56 }
 0x319   : > { %v5000_v35 = vsel %vm4328_vm3, %v4068_v29, 0.0  ;;  %3940 = vmatmul.bf16.gmra.mxu2 %v9387_v25  ;;  %v4275_v0 = vmul.f32 %v4211_v3, %v4068_v29  ;;  %4519 = vperm.xlu1 %5753, %v4068_v29  }
 0x31a   : > { %4109 = vmatmul.bf16.gmra.mxu3 %v9390_v58  ;;  %v5001_v49 = vadd.f32 %v5000_v35, %v4999_v1 }
 0x31b   : > { %v4350_v14 = vsel %vm4328_vm3, %v4275_v0, 0.0  ;;  %v9391_v0 = vld [vmem:[#allocation102_spill] sm:$0xff] }
 0x31c   : > { %v3901_v33 = vpop.f32.mrf.mxu2  ;;  %v4351_v36 = vadd.f32 %v4350_v14, %v4349_v16  ;;  %v3565_v43 = vpop.f32.mrf.mxu0 }
 0x31d   : > { %v4070_v17 = vpop.f32.mrf.mxu3  ;;  %v3902_v10 = vadd.f32 %v3901_v33, %v3733_v12  ;;  %v3734_v27 = vpop.f32.mrf.mxu1  ;;  %v9392_v12 = vld [vmem:[#allocation100_spill] sm:$0xff]  ;;  %v9394_v33 = vld [vmem:[#allocation103_spill] sm:$0xff] }
 0x31e   : > { %v3735_v3 = vadd.f32 %v3734_v27, %v3565_v43  ;;  %v9393_v14 = vpack.c.bf16 %v9391_v0, %v9392_v12  ;;  %v9397_v43 = vld [vmem:[#allocation106_spill] sm:$0xff]  ;;  %v9398_v27 = vld [vmem:[#allocation104_spill] sm:$0xff] }
 0x31f   : > { %v4071_v56 = vadd.f32 %v4070_v17, %v3902_v10  ;;  %v9395_v17 = vld [vmem:[#allocation101_spill] sm:$0xff] }
 0x320   : > { %v9396_v10 = vpack.c.bf16 %v9394_v33, %v9395_v17  ;;  %v4214_v17 = vld [vmem:[%s6508_s25 + $0x70] sm:$0xff] }
 0x321   : > { %v5002_v5 = vsel %vm4328_vm3, %v4071_v56, 0.0  ;;  %4524 = vperm.xlu2 %5754, %v4071_v56   ;;  %v4276_v60 = vmul.f32 %v4212_v46, %v4071_v56  ;;  %v9400_v46 = vld [vmem:[#allocation107_spill] sm:$0xff]  ;;  %v9401_v56 = vld [vmem:[#allocation105_spill] sm:$0xff] }
 0x322   : > { %v5003_v25 = vadd.f32 %v5002_v5, %v5001_v49  ;;  %v9402_v5 = vpack.c.bf16 %v9400_v46, %v9401_v56  ;;  %v4215_v56 = vld [vmem:[%s6508_s25 + $0x78] sm:$0xff] }
 0x323   : > { %v4352_v1 = vsel %vm4328_vm3, %v4276_v60, 0.0 }
 0x324   : > { %v3903_v62 = vpop.f32.mrf.mxu2  ;;  %v4353_v8 = vadd.f32 %v4352_v1, %v4351_v36  ;;  %v3568_v18 = vpop.f32.mrf.mxu0  ;;  %v9399_v36 = vpack.c.bf16 %v9397_v43, %v9398_v27 }
 0x325   : > { %v3904_v29 = vadd.f32 %v3903_v62, %v3735_v3  ;;  %v4072_v35 = vpop.f32.mrf.mxu3  ;;  %v3737_v16 = vpop.f32.mrf.mxu1 }
 0x326   : > { %v3738_v1 = vadd.f32 %v3737_v16, %v3568_v18 }
 0x327   : > { %v4073_v58 = vadd.f32 %v4072_v35, %v3904_v29  ;;  %3607 = vmatmul.bf16.gmra.mxu0 %v9393_v14 }
 0x328   : > { %3776 = vmatmul.bf16.gmra.mxu1 %v9396_v10 }
 0x329   : > { %v5004_v49 = vsel %vm4328_vm3, %v4073_v58, 0.0  ;;  %3945 = vmatmul.bf16.gmra.mxu2 %v9399_v36  ;;  %v4277_v60 = vmul.f32 %v4213_v40, %v4073_v58  ;;  %4529 = vperm.xlu0 %5755, %v4073_v58  }
 0x32a   : > { %4114 = vmatmul.bf16.gmra.mxu3 %v9402_v5  ;;  %v5005_v3 = vadd.f32 %v5004_v49, %v5003_v25 }
 0x32b   : > { %v4354_v62 = vsel %vm4328_vm3, %v4277_v60, 0.0  ;;  %v9403_v60 = vld [vmem:[#allocation110_spill] sm:$0xff] }
 0x32c   : > { %v3906_v29 = vpop.f32.mrf.mxu2  ;;  %v4355_v35 = vadd.f32 %v4354_v62, %v4353_v8  ;;  %v3570_v14 = vpop.f32.mrf.mxu0 }
 0x32d   : > { %v3907_v0 = vadd.f32 %v3906_v29, %v3738_v1  ;;  %v4075_v12 = vpop.f32.mrf.mxu3  ;;  %v3739_v33 = vpop.f32.mrf.mxu1  ;;  %v9404_v1 = vld [vmem:[#allocation108_spill] sm:$0xff]  ;;  %v9406_v29 = vld [vmem:[#allocation111_spill] sm:$0xff] }
 0x32e   : > { %v3740_v40 = vadd.f32 %v3739_v33, %v3570_v14  ;;  %v9405_v62 = vpack.c.bf16 %v9403_v60, %v9404_v1  ;;  %v9409_v14 = vld [vmem:[#allocation114_spill] sm:$0xff]  ;;  %v9410_v33 = vld [vmem:[#allocation112_spill] sm:$0xff] }
 0x32f   : > { %v4076_v10 = vadd.f32 %v4075_v12, %v3907_v0  ;;  %v9407_v0 = vld [vmem:[#allocation109_spill] sm:$0xff] }
 0x330   : > { %v9408_v12 = vpack.c.bf16 %v9406_v29, %v9407_v0  ;;  %v4216_v0 = vld [vmem:[%s6508_s25 + $0x80] sm:$0xff] }
 0x331   : > { %v5006_v43 = vsel %vm4328_vm3, %v4076_v10, 0.0  ;;  %4534 = vperm.xlu1 %5753, %v4076_v10   ;;  %v4278_v27 = vmul.f32 %v4214_v17, %v4076_v10  ;;  %v9412_v17 = vld [vmem:[#allocation115_spill] sm:$0xff]  ;;  %v9413_v10 = vld [vmem:[#allocation113_spill] sm:$0xff] }
 0x332   : > { %v5007_v36 = vadd.f32 %v5006_v43, %v5005_v3  ;;  %v9414_v43 = vpack.c.bf16 %v9412_v17, %v9413_v10  ;;  %v4217_v10 = vld [vmem:[%s6508_s25 + $0x88] sm:$0xff] }
 0x333   : > { %v4356_v25 = vsel %vm4328_vm3, %v4278_v27, 0.0 }
 0x334   : > { %v3908_v18 = vpop.f32.mrf.mxu2  ;;  %v4357_v16 = vadd.f32 %v4356_v25, %v4355_v35  ;;  %v3573_v8 = vpop.f32.mrf.mxu0  ;;  %v9411_v35 = vpack.c.bf16 %v9409_v14, %v9410_v33 }
 0x335   : > { %v3909_v58 = vadd.f32 %v3908_v18, %v3740_v40  ;;  %v4077_v49 = vpop.f32.mrf.mxu3  ;;  %v3742_v46 = vpop.f32.mrf.mxu1 }
 0x336   : > { %v3743_v25 = vadd.f32 %v3742_v46, %v3573_v8 }
 0x337   : > { %v4078_v5 = vadd.f32 %v4077_v49, %v3909_v58  ;;  %3612 = vmatmul.bf16.gmra.mxu0 %v9405_v62 }
 0x338   : > { %3781 = vmatmul.bf16.gmra.mxu1 %v9408_v12 }
 0x339   : > { %v5008_v3 = vsel %vm4328_vm3, %v4078_v5, 0.0  ;;  %3950 = vmatmul.bf16.gmra.mxu2 %v9411_v35  ;;  %v4279_v27 = vmul.f32 %v4215_v56, %v4078_v5  ;;  %4539 = vperm.xlu2 %5754, %v4078_v5  }
 0x33a   : > { %4119 = vmatmul.bf16.gmra.mxu3 %v9414_v43  ;;  %v5009_v40 = vadd.f32 %v5008_v3, %v5007_v36 }
 0x33b   : > { %v4358_v18 = vsel %vm4328_vm3, %v4279_v27, 0.0  ;;  %v9415_v27 = vld [vmem:[#allocation118_spill] sm:$0xff] }
 0x33c   : > { %v3911_v58 = vpop.f32.mrf.mxu2  ;;  %v4359_v49 = vadd.f32 %v4358_v18, %v4357_v16  ;;  %v3575_v62 = vpop.f32.mrf.mxu0 }
 0x33d   : > { %v3912_v60 = vadd.f32 %v3911_v58, %v3743_v25  ;;  %v4080_v1 = vpop.f32.mrf.mxu3  ;;  %v3744_v29 = vpop.f32.mrf.mxu1  ;;  %v9416_v25 = vld [vmem:[#allocation116_spill] sm:$0xff]  ;;  %v9418_v58 = vld [vmem:[#allocation119_spill] sm:$0xff] }
 0x33e   : > { %v3745_v56 = vadd.f32 %v3744_v29, %v3575_v62  ;;  %v9417_v18 = vpack.c.bf16 %v9415_v27, %v9416_v25  ;;  %v9421_v62 = vld [vmem:[#allocation122_spill] sm:$0xff]  ;;  %v9422_v29 = vld [vmem:[#allocation120_spill] sm:$0xff] }
 0x33f   : > { %v4081_v12 = vadd.f32 %v4080_v1, %v3912_v60  ;;  %v9419_v60 = vld [vmem:[#allocation117_spill] sm:$0xff] }
 0x340   : > { %v9420_v1 = vpack.c.bf16 %v9418_v58, %v9419_v60  ;;  %v4218_v60 = vld [vmem:[%s6508_s25 + $0x90] sm:$0xff] }
 0x341   : > { %v5010_v14 = vsel %vm4328_vm3, %v4081_v12, 0.0  ;;  %4544 = vperm.xlu0 %5755, %v4081_v12   ;;  %v4280_v33 = vmul.f32 %v4216_v0, %v4081_v12  ;;  %v9424_v0 = vld [vmem:[#allocation123_spill] sm:$0xff]  ;;  %v9425_v12 = vld [vmem:[#allocation121_spill] sm:$0xff] }
 0x342   : > { %v5011_v35 = vadd.f32 %v5010_v14, %v5009_v40  ;;  %v9426_v14 = vpack.c.bf16 %v9424_v0, %v9425_v12  ;;  %v4219_v12 = vld [vmem:[%s6508_s25 + $0x98] sm:$0xff] }
 0x343   : > { %v4360_v36 = vsel %vm4328_vm3, %v4280_v33, 0.0 }
 0x344   : > { %v3913_v8 = vpop.f32.mrf.mxu2  ;;  %v4361_v46 = vadd.f32 %v4360_v36, %v4359_v49  ;;  %v3578_v16 = vpop.f32.mrf.mxu0  ;;  %v9423_v49 = vpack.c.bf16 %v9421_v62, %v9422_v29 }
 0x345   : > { %v3914_v5 = vadd.f32 %v3913_v8, %v3745_v56  ;;  %v4082_v3 = vpop.f32.mrf.mxu3  ;;  %v3747_v17 = vpop.f32.mrf.mxu1 }
 0x346   : > { %v3748_v36 = vadd.f32 %v3747_v17, %v3578_v16 }
 0x347   : > { %v4083_v43 = vadd.f32 %v4082_v3, %v3914_v5  ;;  %3617 = vmatmul.bf16.gmra.mxu0 %v9417_v18 }
 0x348   : > { %3786 = vmatmul.bf16.gmra.mxu1 %v9420_v1 }
 0x349   : > { %v5012_v40 = vsel %vm4328_vm3, %v4083_v43, 0.0  ;;  %3955 = vmatmul.bf16.gmra.mxu2 %v9423_v49  ;;  %v4281_v33 = vmul.f32 %v4217_v10, %v4083_v43  ;;  %4549 = vperm.xlu1 %5753, %v4083_v43  }
 0x34a   : > { %4124 = vmatmul.bf16.gmra.mxu3 %v9426_v14  ;;  %v5013_v56 = vadd.f32 %v5012_v40, %v5011_v35 }
 0x34b   : > { %v4362_v8 = vsel %vm4328_vm3, %v4281_v33, 0.0  ;;  %v9427_v33 = vld [vmem:[#allocation126_spill] sm:$0xff] }
 0x34c   : > { %v3916_v5 = vpop.f32.mrf.mxu2  ;;  %v4363_v3 = vadd.f32 %v4362_v8, %v4361_v46  ;;  %v3580_v18 = vpop.f32.mrf.mxu0 }
 0x34d   : > { %v3917_v27 = vadd.f32 %v3916_v5, %v3748_v36  ;;  %v4085_v25 = vpop.f32.mrf.mxu3  ;;  %v3749_v58 = vpop.f32.mrf.mxu1  ;;  %v9428_v36 = vld [vmem:[#allocation124_spill] sm:$0xff]  ;;  %v9430_v5 = vld [vmem:[#allocation127_spill] sm:$0xff] }
 0x34e   : > { %v3750_v10 = vadd.f32 %v3749_v58, %v3580_v18  ;;  %v9429_v8 = vpack.c.bf16 %v9427_v33, %v9428_v36  ;;  %v9433_v18 = vld [vmem:[#allocation130_spill] sm:$0xff]  ;;  %v9434_v58 = vld [vmem:[#allocation128_spill] sm:$0xff] }
 0x34f   : > { %v4086_v1 = vadd.f32 %v4085_v25, %v3917_v27  ;;  %v9431_v27 = vld [vmem:[#allocation125_spill] sm:$0xff] }
 0x350   : > { %v9432_v25 = vpack.c.bf16 %v9430_v5, %v9431_v27  ;;  %v4220_v27 = vld [vmem:[%s6508_s25 + $0xa0] sm:$0xff] }
 0x351   : > { %v5014_v62 = vsel %vm4328_vm3, %v4086_v1, 0.0  ;;  %4554 = vperm.xlu2 %5754, %v4086_v1   ;;  %v4282_v29 = vmul.f32 %v4218_v60, %v4086_v1  ;;  %v9436_v60 = vld [vmem:[#allocation131_spill] sm:$0xff]  ;;  %v9437_v1 = vld [vmem:[#allocation129_spill] sm:$0xff] }
 0x352   : > { %v5015_v49 = vadd.f32 %v5014_v62, %v5013_v56  ;;  %v9438_v62 = vpack.c.bf16 %v9436_v60, %v9437_v1  ;;  %v4221_v1 = vld [vmem:[%s6508_s25 + $0xa8] sm:$0xff] }
 0x353   : > { %v4364_v35 = vsel %vm4328_vm3, %v4282_v29, 0.0 }
 0x354   : > { %v3918_v16 = vpop.f32.mrf.mxu2  ;;  %v4365_v17 = vadd.f32 %v4364_v35, %v4363_v3  ;;  %v3583_v46 = vpop.f32.mrf.mxu0  ;;  %v9435_v3 = vpack.c.bf16 %v9433_v18, %v9434_v58 }
 0x355   : > { %v3919_v43 = vadd.f32 %v3918_v16, %v3750_v10  ;;  %v4087_v40 = vpop.f32.mrf.mxu3  ;;  %v3752_v0 = vpop.f32.mrf.mxu1 }
 0x356   : > { %v3753_v35 = vadd.f32 %v3752_v0, %v3583_v46 }
 0x357   : > { %v4088_v14 = vadd.f32 %v4087_v40, %v3919_v43  ;;  %3622 = vmatmul.bf16.gmra.mxu0 %v9429_v8 }
 0x358   : > { %3791 = vmatmul.bf16.gmra.mxu1 %v9432_v25 }
 0x359   : > { %v5016_v56 = vsel %vm4328_vm3, %v4088_v14, 0.0  ;;  %3960 = vmatmul.bf16.gmra.mxu2 %v9435_v3  ;;  %v4283_v29 = vmul.f32 %v4219_v12, %v4088_v14  ;;  %4559 = vperm.xlu0 %5755, %v4088_v14  }
 0x35a   : > { %4129 = vmatmul.bf16.gmra.mxu3 %v9438_v62  ;;  %v5017_v10 = vadd.f32 %v5016_v56, %v5015_v49 }
 0x35b   : > { %v4366_v16 = vsel %vm4328_vm3, %v4283_v29, 0.0  ;;  %v9439_v29 = vld [vmem:[#allocation134_spill] sm:$0xff] }
 0x35c   : > { %v3921_v43 = vpop.f32.mrf.mxu2  ;;  %v4367_v40 = vadd.f32 %v4366_v16, %v4365_v17  ;;  %v3585_v8 = vpop.f32.mrf.mxu0 }
 0x35d   : > { %v3922_v33 = vadd.f32 %v3921_v43, %v3753_v35  ;;  %v4090_v36 = vpop.f32.mrf.mxu3  ;;  %v3754_v5 = vpop.f32.mrf.mxu1  ;;  %v9440_v35 = vld [vmem:[#allocation132_spill] sm:$0xff]  ;;  %v9442_v43 = vld [vmem:[#allocation135_spill] sm:$0xff] }
 0x35e   : > { %v3755_v12 = vadd.f32 %v3754_v5, %v3585_v8  ;;  %v9441_v16 = vpack.c.bf16 %v9439_v29, %v9440_v35  ;;  %v9445_v8 = vld [vmem:[#allocation138_spill] sm:$0xff]  ;;  %v9446_v5 = vld [vmem:[#allocation136_spill] sm:$0xff] }
 0x35f   : > { %v4091_v25 = vadd.f32 %v4090_v36, %v3922_v33  ;;  %v9443_v33 = vld [vmem:[#allocation133_spill] sm:$0xff] }
 0x360   : > { %v9444_v36 = vpack.c.bf16 %v9442_v43, %v9443_v33  ;;  %v4222_v33 = vld [vmem:[%s6508_s25 + $0xb0] sm:$0xff] }
 0x361   : > { %v5018_v18 = vsel %vm4328_vm3, %v4091_v25, 0.0  ;;  %4564 = vperm.xlu1 %5753, %v4091_v25   ;;  %v4284_v58 = vmul.f32 %v4220_v27, %v4091_v25  ;;  %v9448_v27 = vld [vmem:[#allocation139_spill] sm:$0xff]  ;;  %v9449_v25 = vld [vmem:[#allocation137_spill] sm:$0xff] }
 0x362   : > { %v5019_v3 = vadd.f32 %v5018_v18, %v5017_v10  ;;  %v9450_v18 = vpack.c.bf16 %v9448_v27, %v9449_v25  ;;  %v4223_v25 = vld [vmem:[%s6508_s25 + $0xb8] sm:$0xff] }
 0x363   : > { %v4368_v49 = vsel %vm4328_vm3, %v4284_v58, 0.0 }
 0x364   : > { %v3923_v46 = vpop.f32.mrf.mxu2  ;;  %v4369_v0 = vadd.f32 %v4368_v49, %v4367_v40  ;;  %v3588_v17 = vpop.f32.mrf.mxu0  ;;  %v9447_v40 = vpack.c.bf16 %v9445_v8, %v9446_v5 }
 0x365   : > { %v3924_v14 = vadd.f32 %v3923_v46, %v3755_v12  ;;  %v4092_v56 = vpop.f32.mrf.mxu3  ;;  %v3757_v60 = vpop.f32.mrf.mxu1 }
 0x366   : > { %v3758_v49 = vadd.f32 %v3757_v60, %v3588_v17 }
 0x367   : > { %v4093_v62 = vadd.f32 %v4092_v56, %v3924_v14  ;;  %3627 = vmatmul.bf16.gmra.mxu0 %v9441_v16 }
 0x368   : > { %3796 = vmatmul.bf16.gmra.mxu1 %v9444_v36 }
 0x369   : > { %v5020_v10 = vsel %vm4328_vm3, %v4093_v62, 0.0  ;;  %3965 = vmatmul.bf16.gmra.mxu2 %v9447_v40  ;;  %v4285_v58 = vmul.f32 %v4221_v1, %v4093_v62  ;;  %4569 = vperm.xlu2 %5754, %v4093_v62  }
 0x36a   : > { %4134 = vmatmul.bf16.gmra.mxu3 %v9450_v18  ;;  %v5021_v12 = vadd.f32 %v5020_v10, %v5019_v3 }
 0x36b   : > { %v4370_v46 = vsel %vm4328_vm3, %v4285_v58, 0.0  ;;  %v9451_v58 = vld [vmem:[#allocation142_spill] sm:$0xff] }
 0x36c   : > { %v3926_v14 = vpop.f32.mrf.mxu2  ;;  %v4371_v56 = vadd.f32 %v4370_v46, %v4369_v0  ;;  %v3590_v16 = vpop.f32.mrf.mxu0 }
 0x36d   : > { %v3927_v29 = vadd.f32 %v3926_v14, %v3758_v49  ;;  %v4095_v35 = vpop.f32.mrf.mxu3  ;;  %v3759_v43 = vpop.f32.mrf.mxu1  ;;  %v9452_v49 = vld [vmem:[#allocation140_spill] sm:$0xff]  ;;  %v9454_v14 = vld [vmem:[#allocation143_spill] sm:$0xff] }
 0x36e   : > { %v3760_v1 = vadd.f32 %v3759_v43, %v3590_v16  ;;  %v9453_v46 = vpack.c.bf16 %v9451_v58, %v9452_v49  ;;  %v9457_v16 = vld [vmem:[#allocation146_spill] sm:$0xff]  ;;  %v9458_v43 = vld [vmem:[#allocation144_spill] sm:$0xff] }
 0x36f   : > { %v4096_v36 = vadd.f32 %v4095_v35, %v3927_v29  ;;  %v9455_v29 = vld [vmem:[#allocation141_spill] sm:$0xff] }
 0x370   : > { %v9456_v35 = vpack.c.bf16 %v9454_v14, %v9455_v29  ;;  %v4224_v29 = vld [vmem:[%s6508_s25 + $0xc0] sm:$0xff] }
 0x371   : > { %v5022_v8 = vsel %vm4328_vm3, %v4096_v36, 0.0  ;;  %4574 = vperm.xlu0 %5755, %v4096_v36   ;;  %v4286_v5 = vmul.f32 %v4222_v33, %v4096_v36  ;;  %v9460_v33 = vld [vmem:[#allocation147_spill] sm:$0xff]  ;;  %v9461_v36 = vld [vmem:[#allocation145_spill] sm:$0xff] }
 0x372   : > { %v5023_v40 = vadd.f32 %v5022_v8, %v5021_v12  ;;  %v9462_v8 = vpack.c.bf16 %v9460_v33, %v9461_v36  ;;  %v4225_v36 = vld [vmem:[%s6508_s25 + $0xc8] sm:$0xff] }
 0x373   : > { %v4372_v3 = vsel %vm4328_vm3, %v4286_v5, 0.0 }
 0x374   : > { %v3928_v17 = vpop.f32.mrf.mxu2  ;;  %v4373_v60 = vadd.f32 %v4372_v3, %v4371_v56  ;;  %v3593_v0 = vpop.f32.mrf.mxu0  ;;  %v9459_v56 = vpack.c.bf16 %v9457_v16, %v9458_v43 }
 0x375   : > { %v3929_v62 = vadd.f32 %v3928_v17, %v3760_v1  ;;  %v4097_v10 = vpop.f32.mrf.mxu3  ;;  %v3762_v27 = vpop.f32.mrf.mxu1 }
 0x376   : > { %v3763_v3 = vadd.f32 %v3762_v27, %v3593_v0 }
 0x377   : > { %v4098_v18 = vadd.f32 %v4097_v10, %v3929_v62  ;;  %3632 = vmatmul.bf16.gmra.mxu0 %v9453_v46 }
 0x378   : > { %3801 = vmatmul.bf16.gmra.mxu1 %v9456_v35 }
 0x379   : > { %v5024_v12 = vsel %vm4328_vm3, %v4098_v18, 0.0  ;;  %3970 = vmatmul.bf16.gmra.mxu2 %v9459_v56  ;;  %v4287_v5 = vmul.f32 %v4223_v25, %v4098_v18  ;;  %4579 = vperm.xlu1 %5753, %v4098_v18  }
 0x37a   : > { %4139 = vmatmul.bf16.gmra.mxu3 %v9462_v8  ;;  %v5025_v1 = vadd.f32 %v5024_v12, %v5023_v40 }
 0x37b   : > { %v4374_v17 = vsel %vm4328_vm3, %v4287_v5, 0.0  ;;  %v9463_v5 = vld [vmem:[#allocation150_spill] sm:$0xff] }
 0x37c   : > { %v3931_v62 = vpop.f32.mrf.mxu2  ;;  %v4375_v10 = vadd.f32 %v4374_v17, %v4373_v60  ;;  %v3595_v46 = vpop.f32.mrf.mxu0 }
 0x37d   : > { %v3932_v58 = vadd.f32 %v3931_v62, %v3763_v3  ;;  %v4100_v49 = vpop.f32.mrf.mxu3  ;;  %v3764_v14 = vpop.f32.mrf.mxu1  ;;  %v9464_v3 = vld [vmem:[#allocation148_spill] sm:$0xff]  ;;  %v9466_v62 = vld [vmem:[#allocation151_spill] sm:$0xff] }
 0x37e   : > { %v3765_v25 = vadd.f32 %v3764_v14, %v3595_v46  ;;  %v9465_v17 = vpack.c.bf16 %v9463_v5, %v9464_v3  ;;  %v9469_v46 = vld [vmem:[#allocation152_spill] sm:$0xff]  ;;  %v9471_v14 = vld [vmem:[#allocation154_spill] sm:$0xff] }
 0x37f   : > { %v4101_v35 = vadd.f32 %v4100_v49, %v3932_v58  ;;  %v9467_v58 = vld [vmem:[#allocation149_spill] sm:$0xff] }
 0x380   : > { %v9468_v49 = vpack.c.bf16 %v9466_v62, %v9467_v58  ;;  %v4226_v62 = vld [vmem:[%s6508_s25 + $0xd0] sm:$0xff] }
 0x381   : > { %v5026_v16 = vsel %vm4328_vm3, %v4101_v35, 0.0  ;;  %4584 = vperm.xlu2 %5754, %v4101_v35   ;;  %v4288_v43 = vmul.f32 %v4224_v29, %v4101_v35  ;;  %v9472_v29 = vld [vmem:[#allocation153_spill] sm:$0xff] }
 0x382   : > { %v5027_v56 = vadd.f32 %v5026_v16, %v5025_v1  ;;  %v9473_v35 = vpack.c.bf16 %v9471_v14, %v9472_v29  ;;  %v4227_v14 = vld [vmem:[%s6508_s25 + $0xd8] sm:$0xff] }
 0x383   : > { %v4376_v40 = vsel %vm4328_vm3, %v4288_v43, 0.0 }
 0x384   : > { %v3933_v0 = vpop.f32.mrf.mxu2  ;;  %v4377_v27 = vadd.f32 %v4376_v40, %v4375_v10  ;;  %v3598_v60 = vpop.f32.mrf.mxu0  ;;  %v9470_v10 = vpack.c.bf16 %v7672_v44, %v9469_v46 }
 0x385   : > { %v3934_v18 = vadd.f32 %v3933_v0, %v3765_v25  ;;  %v4102_v12 = vpop.f32.mrf.mxu3  ;;  %v3767_v33 = vpop.f32.mrf.mxu1 }
 0x386   : > { %v3768_v25 = vadd.f32 %v3767_v33, %v3598_v60 }
 0x387   : > { %v4103_v8 = vadd.f32 %v4102_v12, %v3934_v18  ;;  %3637 = vmatmul.bf16.gmra.mxu0 %v9465_v17 }
 0x388   : > { %3806 = vmatmul.bf16.gmra.mxu1 %v9468_v49 }
 0x389   : > { %v5028_v1 = vsel %vm4328_vm3, %v4103_v8, 0.0  ;;  %3975 = vmatmul.bf16.gmra.mxu2 %v9470_v10  ;;  %v4289_v16 = vmul.f32 %v4225_v36, %v4103_v8  ;;  %4589 = vperm.xlu0 %5755, %v4103_v8  }
 0x38a   : > { %4144 = vmatmul.bf16.gmra.mxu3 %v9473_v35  ;;  %v5029_v43 = vadd.f32 %v5028_v1, %v5027_v56  ;;  %v9474_v35 = vld [vmem:[#allocation157_spill] sm:$0xff] }
 0x38b   : > { %v4378_v40 = vsel %vm4328_vm3, %v4289_v16, 0.0  ;;  %v9475_v16 = vld [vmem:[#allocation155_spill] sm:$0xff] }
 0x38c   : > { %v3936_v0 = vpop.f32.mrf.mxu2  ;;  %v4379_v18 = vadd.f32 %v4378_v40, %v4377_v27  ;;  %v3600_v3 = vpop.f32.mrf.mxu0  ;;  %v9477_v40 = vld [vmem:[#allocation158_spill] sm:$0xff] }
 0x38d   : > { %v3937_v12 = vadd.f32 %v3936_v0, %v3768_v25  ;;  %v4105_v5 = vpop.f32.mrf.mxu3  ;;  %v3769_v17 = vpop.f32.mrf.mxu1  ;;  %v9476_v25 = vpack.c.bf16 %v9474_v35, %v9475_v16  ;;  %v9478_v0 = vld [vmem:[#allocation156_spill] sm:$0xff] }
 0x38e   : > { %v3770_v36 = vadd.f32 %v3769_v17, %v3600_v3 }
 0x38f   : > { %v4106_v44 = vadd.f32 %v4105_v5, %v3937_v12  ;;  %v9479_v12 = vpack.c.bf16 %v9477_v40, %v9478_v0  ;;  %v9481_v5 = vpack.c.bf16 %v7712_v59, %v7705_v39  ;;  %v9482_v0 = vpack.c.bf16 %v7738_v2, %v7733_v32 }
 0x391   : > { %v5030_v58 = vsel %vm4328_vm3, %v4106_v44, 0.0  ;;  %4594 = vperm.xlu1 %5753, %v4106_v44   ;;  %v4290_v49 = vmul.f32 %v4226_v62, %v4106_v44 }
 0x392   : > { %v5031_v46 = vadd.f32 %v5030_v58, %v5029_v43 }
 0x393   : > { %v4380_v56 = vsel %vm4328_vm3, %v4290_v49, 0.0 }
 0x394   : > { %v3938_v60 = vpop.f32.mrf.mxu2  ;;  %v4381_v33 = vadd.f32 %v4380_v56, %v4379_v18  ;;  %v3603_v27 = vpop.f32.mrf.mxu0  ;;  %v9480_v18 = vpack.c.bf16 %v7709_v31, %v7703_v34 }
 0x395   : > { %v3939_v8 = vadd.f32 %v3938_v60, %v3770_v36  ;;  %v4107_v1 = vpop.f32.mrf.mxu3  ;;  %v3772_v10 = vpop.f32.mrf.mxu1 }
 0x396   : > { %v3773_v62 = vadd.f32 %v3772_v10, %v3603_v27 }
 0x397   : > { %v4108_v29 = vadd.f32 %v4107_v1, %v3939_v8  ;;  %3642 = vmatmul.bf16.gmra.mxu0 %v9476_v25  ;;  %v4228_v1 = vld [vmem:[%s6508_s25 + $0xe0] sm:$0xff]  ;;  %v4229_v25 = vld [vmem:[%s6508_s25 + $0xe8] sm:$0xff] }
 0x398   : > { %3811 = vmatmul.bf16.gmra.mxu1 %v9479_v12  ;;  %v9483_v12 = vpack.c.bf16 %v7741_v22, %v7735_v50 }
 0x399   : > { %v5032_v43 = vsel %vm4328_vm3, %v4108_v29, 0.0  ;;  %3980 = vmatmul.bf16.gmra.mxu2 %v9480_v18  ;;  %v4291_v3 = vmul.f32 %v4227_v14, %v4108_v29  ;;  %4599 = vperm.xlu2 %5754, %v4108_v29   ;;  %v9484_v18 = vpack.c.bf16 %v7753_v54, %v7747_v9 }
 0x39a   : > { %4149 = vmatmul.bf16.gmra.mxu3 %v9481_v5  ;;  %v5033_v17 = vadd.f32 %v5032_v43, %v5031_v46  ;;  %v9485_v5 = vpack.c.bf16 %v7756_v6, %v7749_v41 }
 0x39b   : > { %v4382_v44 = vsel %vm4328_vm3, %v4291_v3, 0.0 }
 0x39c   : > { %v3941_v58 = vpop.f32.mrf.mxu2  ;;  %v4383_v49 = vadd.f32 %v4382_v44, %v4381_v33  ;;  %v3605_v60 = vpop.f32.mrf.mxu0 }
 0x39d   : > { %v3942_v36 = vadd.f32 %v3941_v58, %v3773_v62  ;;  %v4110_v56 = vpop.f32.mrf.mxu3  ;;  %v3774_v8 = vpop.f32.mrf.mxu1 }
 0x39e   : > { %v3775_v14 = vadd.f32 %v3774_v8, %v3605_v60 }
 0x39f   : > { %v4111_v34 = vadd.f32 %v4110_v56, %v3942_v36  ;;  %v4230_v36 = vld [vmem:[%s6508_s25 + $0xf0] sm:$0xff] }
 0x3a1   : > { %v5034_v31 = vsel %vm4328_vm3, %v4111_v34, 0.0  ;;  %4604 = vperm.xlu0 %5755, %v4111_v34   ;;  %v4292_v39 = vmul.f32 %v4228_v1, %v4111_v34 }
 0x3a2   : > { %v5035_v59 = vadd.f32 %v5034_v31, %v5033_v17 }
 0x3a3   : > { %v4384_v46 = vsel %vm4328_vm3, %v4292_v39, 0.0 }
 0x3a4   : > { %v3943_v27 = vpop.f32.mrf.mxu2  ;;  %v4385_v10 = vadd.f32 %v4384_v46, %v4383_v49  ;;  %v3608_v33 = vpop.f32.mrf.mxu0 }
 0x3a5   : > { %v3944_v29 = vadd.f32 %v3943_v27, %v3775_v14  ;;  %v4112_v35 = vpop.f32.mrf.mxu3  ;;  %v3777_v16 = vpop.f32.mrf.mxu1  ;;  %v4231_v14 = vld [vmem:[%s6508_s25 + $0xf8] sm:$0xff]  ;;  %v9486_v27 = vpack.c.bf16 %v7782_v11, %v7777_v30 }
 0x3a6   : > { %v3778_v32 = vadd.f32 %v3777_v16, %v3608_v33  ;;  %v9489_v33 = vpack.c.bf16 %v7800_v38, %v7793_v47 }
 0x3a7   : > { %v4113_v40 = vadd.f32 %v4112_v35, %v3944_v29  ;;  %3647 = vmatmul.bf16.gmra.mxu0 %v9482_v0  ;;  %v9488_v35 = vpack.c.bf16 %v7797_v53, %v7791_v45 }
 0x3a8   : > { %3816 = vmatmul.bf16.gmra.mxu1 %v9483_v12 }
 0x3a9   : > { %v5036_v43 = vsel %vm4328_vm3, %v4113_v40, 0.0  ;;  %3985 = vmatmul.bf16.gmra.mxu2 %v9484_v18  ;;  %v4293_v3 = vmul.f32 %v4229_v25, %v4113_v40  ;;  %4609 = vperm.xlu1 %5753, %v4113_v40   ;;  %v4232_v18 = vld [vmem:[%s6508_s25 + $0x100] sm:$0xff] }
 0x3aa   : > { %4154 = vmatmul.bf16.gmra.mxu3 %v9485_v5  ;;  %v5037_v17 = vadd.f32 %v5036_v43, %v5035_v59 }
 0x3ab   : > { %v4386_v2 = vsel %vm4328_vm3, %v4293_v3, 0.0 }
 0x3ac   : > { %v3946_v62 = vpop.f32.mrf.mxu2  ;;  %v4387_v50 = vadd.f32 %v4386_v2, %v4385_v10  ;;  %v3610_v58 = vpop.f32.mrf.mxu0  ;;  %v9487_v10 = vpack.c.bf16 %v7785_v57, %v7779_v48 }
 0x3ad   : > { %v3947_v22 = vadd.f32 %v3946_v62, %v3778_v32  ;;  %v4115_v44 = vpop.f32.mrf.mxu3  ;;  %v3779_v49 = vpop.f32.mrf.mxu1 }
 0x3ae   : > { %v3780_v56 = vadd.f32 %v3779_v49, %v3610_v58  ;;  %v9490_v49 = vpack.c.bf16 %v7826_v21, %v7821_v26 }
 0x3af   : > { %v4116_v9 = vadd.f32 %v4115_v44, %v3947_v22  ;;  %v4233_v44 = vld [vmem:[%s6508_s25 + $0x108] sm:$0xff] }
 0x3b1   : > { %v5038_v54 = vsel %vm4328_vm3, %v4116_v9, 0.0  ;;  %4614 = vperm.xlu2 %5754, %v4116_v9   ;;  %v4294_v41 = vmul.f32 %v4230_v36, %v4116_v9  ;;  %v9491_v36 = vpack.c.bf16 %v7829_v20, %v7823_v13 }
 0x3b2   : > { %v5039_v6 = vadd.f32 %v5038_v54, %v5037_v17  ;;  %v9492_v54 = vpack.c.bf16 %v7841_v23, %v7835_v4 }
 0x3b3   : > { %v4388_v60 = vsel %vm4328_vm3, %v4294_v41, 0.0  ;;  %v9493_v41 = vpack.c.bf16 %v7844_v7, %v7837_v55 }
 0x3b4   : > { %v3948_v8 = vpop.f32.mrf.mxu2  ;;  %v4389_v1 = vadd.f32 %v4388_v60, %v4387_v50  ;;  %v3613_v39 = vpop.f32.mrf.mxu0 }
 0x3b5   : > { %v3949_v34 = vadd.f32 %v3948_v8, %v3780_v56  ;;  %v4117_v31 = vpop.f32.mrf.mxu3  ;;  %v3782_v59 = vpop.f32.mrf.mxu1 }
 0x3b6   : > { %v3783_v30 = vadd.f32 %v3782_v59, %v3613_v39 }
 0x3b7   : > { %v4118_v46 = vadd.f32 %v4117_v31, %v3949_v34  ;;  %3652 = vmatmul.bf16.gmra.mxu0 %v9486_v27  ;;  %v4234_v31 = vld [vmem:[%s6508_s25 + $0x110] sm:$0xff] }
 0x3b8   : > { %3821 = vmatmul.bf16.gmra.mxu1 %v9487_v10 }
 0x3b9   : > { %v5040_v29 = vsel %vm4328_vm3, %v4118_v46, 0.0  ;;  %3990 = vmatmul.bf16.gmra.mxu2 %v9488_v35  ;;  %v4295_v16 = vmul.f32 %v4231_v14, %v4118_v46  ;;  %4619 = vperm.xlu0 %5755, %v4118_v46  }
 0x3ba   : > { %4159 = vmatmul.bf16.gmra.mxu3 %v9489_v33  ;;  %v5041_v25 = vadd.f32 %v5040_v29, %v5039_v6  ;;  %v4235_v33 = vld [vmem:[%s6508_s25 + $0x118] sm:$0xff] }
 0x3bb   : > { %v4390_v11 = vsel %vm4328_vm3, %v4295_v16, 0.0 }
 0x3bc   : > { %v3951_v40 = vpop.f32.mrf.mxu2  ;;  %v4391_v48 = vadd.f32 %v4390_v11, %v4389_v1  ;;  %v3615_v12 = vpop.f32.mrf.mxu0  ;;  %v9496_v11 = vld [vmem:[#allocation159_spill] sm:$0xff] }
 0x3bd   : > { %v3952_v57 = vadd.f32 %v3951_v40, %v3783_v30  ;;  %v4120_v0 = vpop.f32.mrf.mxu3  ;;  %v3784_v43 = vpop.f32.mrf.mxu1  ;;  %v9495_v30 = vld [vmem:[#allocation160_spill] sm:$0xff] }
 0x3be   : > { %v3785_v5 = vadd.f32 %v3784_v43, %v3615_v12  ;;  %v9497_v40 = vpack.c.bf16 %v9495_v30, %v9496_v11  ;;  %v9501_v43 = vld [vmem:[#allocation164_spill] sm:$0xff] }
 0x3bf   : > { %v4121_v45 = vadd.f32 %v4120_v0, %v3952_v57  ;;  %v9498_v57 = vld [vmem:[#allocation163_spill] sm:$0xff]  ;;  %v9499_v0 = vld [vmem:[#allocation161_spill] sm:$0xff] }
 0x3c0   : > { %v9500_v12 = vpack.c.bf16 %v9498_v57, %v9499_v0 }
 0x3c1   : > { %v5042_v53 = vsel %vm4328_vm3, %v4121_v45, 0.0  ;;  %4624 = vperm.xlu1 %5753, %v4121_v45   ;;  %v4296_v47 = vmul.f32 %v4232_v18, %v4121_v45  ;;  %v9502_v18 = vld [vmem:[#allocation162_spill] sm:$0xff] }
 0x3c2   : > { %v5043_v38 = vadd.f32 %v5042_v53, %v5041_v25  ;;  %v9494_v25 = vpack.c.bf16 %v7870_v52, %v7865_v42  ;;  %v9503_v45 = vpack.c.bf16 %v9501_v43, %v9502_v18 }
 0x3c3   : > { %v4392_v3 = vsel %vm4328_vm3, %v4296_v47, 0.0 }
 0x3c4   : > { %v3953_v17 = vpop.f32.mrf.mxu2  ;;  %v4393_v32 = vadd.f32 %v4392_v3, %v4391_v48  ;;  %v3618_v50 = vpop.f32.mrf.mxu0 }
 0x3c5   : > { %v3954_v2 = vadd.f32 %v3953_v17, %v3785_v5  ;;  %v4122_v62 = vpop.f32.mrf.mxu3  ;;  %v3787_v22 = vpop.f32.mrf.mxu1 }
 0x3c6   : > { %v3788_v26 = vadd.f32 %v3787_v22, %v3618_v50 }
 0x3c7   : > { %v4123_v58 = vadd.f32 %v4122_v62, %v3954_v2  ;;  %3657 = vmatmul.bf16.gmra.mxu0 %v9490_v49  ;;  %v4236_v62 = vld [vmem:[%s6508_s25 + $0x120] sm:$0xff] }
 0x3c8   : > { %3826 = vmatmul.bf16.gmra.mxu1 %v9491_v36 }
 0x3c9   : > { %v5044_v9 = vsel %vm4328_vm3, %v4123_v58, 0.0  ;;  %3995 = vmatmul.bf16.gmra.mxu2 %v9492_v54  ;;  %v4297_v6 = vmul.f32 %v4233_v44, %v4123_v58  ;;  %4629 = vperm.xlu2 %5754, %v4123_v58  }
 0x3ca   : > { %4164 = vmatmul.bf16.gmra.mxu3 %v9493_v41  ;;  %v5045_v56 = vadd.f32 %v5044_v9, %v5043_v38 }
 0x3cb   : > { %v4394_v21 = vsel %vm4328_vm3, %v4297_v6, 0.0 }
 0x3cc   : > { %v3956_v60 = vpop.f32.mrf.mxu2  ;;  %v4395_v13 = vadd.f32 %v4394_v21, %v4393_v32  ;;  %v3620_v1 = vpop.f32.mrf.mxu0  ;;  %v4237_v21 = vld [vmem:[%s6508_s25 + $0x128] sm:$0xff] }
 0x3cd   : > { %v3957_v20 = vadd.f32 %v3956_v60, %v3788_v26  ;;  %v4125_v8 = vpop.f32.mrf.mxu3  ;;  %v3789_v34 = vpop.f32.mrf.mxu1 }
 0x3ce   : > { %v3790_v39 = vadd.f32 %v3789_v34, %v3620_v1  ;;  %v9507_v1 = vld [vmem:[#allocation13_spill] sm:$0xff]  ;;  %v9508_v34 = vld [vmem:[#allocation12_spill] sm:$0xff] }
 0x3cf   : > { %v4126_v4 = vadd.f32 %v4125_v8, %v3957_v20  ;;  %v9505_v20 = vld [vmem:[#allocation14_spill] sm:$0xff] }
 0x3d1   : > { %v5046_v23 = vsel %vm4328_vm3, %v4126_v4, 0.0  ;;  %4634 = vperm.xlu0 %5755, %v4126_v4   ;;  %v4298_v55 = vmul.f32 %v4234_v31, %v4126_v4  ;;  %v9509_v31 = vpack.c.bf16 %v9507_v1, %v9508_v34  ;;  %v4240_v1 = vld [vmem:[%s6508_s25 + $0x140] sm:$0xff] }
 0x3d2   : > { %v5047_v7 = vadd.f32 %v5046_v23, %v5045_v56  ;;  %v9510_v23 = vld [vmem:[#allocation19_spill] sm:$0xff] }
 0x3d3   : > { %v4396_v59 = vsel %vm4328_vm3, %v4298_v55, 0.0  ;;  %v9511_v55 = vld [vmem:[#allocation18_spill] sm:$0xff] }
 0x3d4   : > { %v3958_v14 = vpop.f32.mrf.mxu2  ;;  %v4397_v46 = vadd.f32 %v4396_v59, %v4395_v13  ;;  %v3623_v29 = vpop.f32.mrf.mxu0  ;;  %v9504_v13 = vld [vmem:[#allocation15_spill] sm:$0xff]  ;;  %v9514_v59 = vld [vmem:[#allocation16_spill] sm:$0xff] }
 0x3d5   : > { %v3959_v27 = vadd.f32 %v3958_v14, %v3790_v39  ;;  %v4127_v10 = vpop.f32.mrf.mxu3  ;;  %v3792_v35 = vpop.f32.mrf.mxu1  ;;  %v9506_v8 = vpack.c.bf16 %v9504_v13, %v9505_v20  ;;  %v9513_v39 = vld [vmem:[#allocation17_spill] sm:$0xff] }
 0x3d6   : > { %v3793_v42 = vadd.f32 %v3792_v35, %v3623_v29  ;;  %v9515_v14 = vpack.c.bf16 %v9513_v39, %v9514_v59 }
 0x3d7   : > { %v4128_v16 = vadd.f32 %v4127_v10, %v3959_v27  ;;  %3662 = vmatmul.bf16.gmra.mxu0 %v9494_v25 }
 0x3d8   : > { %3831 = vmatmul.bf16.gmra.mxu1 %v9497_v40  ;;  %v4238_v40 = vld [vmem:[%s6508_s25 + $0x130] sm:$0xff] }
 0x3d9   : > { %v5048_v48 = vsel %vm4328_vm3, %v4128_v16, 0.0  ;;  %4000 = vmatmul.bf16.gmra.mxu2 %v9500_v12  ;;  %v4299_v53 = vmul.f32 %v4235_v33, %v4128_v16  ;;  %4639 = vperm.xlu1 %5753, %v4128_v16  }
 0x3da   : > { %4169 = vmatmul.bf16.gmra.mxu3 %v9503_v45  ;;  %v5049_v47 = vadd.f32 %v5048_v48, %v5047_v7  ;;  %v9512_v7 = vpack.c.bf16 %v9510_v23, %v9511_v55 }
 0x3db   : > { %v4398_v52 = vsel %vm4328_vm3, %v4299_v53, 0.0 }
 0x3dc   : > { %v3961_v38 = vpop.f32.mrf.mxu2  ;;  %v4399_v5 = vadd.f32 %v4398_v52, %v4397_v46  ;;  %v3625_v32 = vpop.f32.mrf.mxu0 }
 0x3dd   : > { %v3962_v3 = vadd.f32 %v3961_v38, %v3793_v42  ;;  %v4130_v17 = vpop.f32.mrf.mxu3  ;;  %v3794_v2 = vpop.f32.mrf.mxu1 }
 0x3de   : > { %v3795_v49 = vadd.f32 %v3794_v2, %v3625_v32  ;;  %v9517_v32 = vld [vmem:[#allocation22_spill] sm:$0xff] }
 0x3df   : > { %v4131_v50 = vadd.f32 %v4130_v17, %v3962_v3  ;;  %v9516_v17 = vld [vmem:[#allocation23_spill] sm:$0xff] }
 0x3e0   : > { %v9518_v2 = vpack.c.bf16 %v9516_v17, %v9517_v32 }
 0x3e1   : > { %v5050_v22 = vsel %vm4328_vm3, %v4131_v50, 0.0  ;;  %4644 = vperm.xlu2 %5754, %v4131_v50   ;;  %v4300_v44 = vmul.f32 %v4236_v62, %v4131_v50  ;;  %v9519_v62 = vld [vmem:[#allocation21_spill] sm:$0xff]  ;;  %v9520_v50 = vld [vmem:[#allocation20_spill] sm:$0xff] }
 0x3e2   : > { %v5051_v58 = vadd.f32 %v5050_v22, %v5049_v47  ;;  %v9521_v22 = vpack.c.bf16 %v9519_v62, %v9520_v50 }
 0x3e3   : > { %v4400_v36 = vsel %vm4328_vm3, %v4300_v44, 0.0 }
 0x3e4   : > { %v3963_v9 = vpop.f32.mrf.mxu2  ;;  %v4401_v54 = vadd.f32 %v4400_v36, %v4399_v5  ;;  %v3628_v56 = vpop.f32.mrf.mxu0  ;;  %v4239_v5 = vld [vmem:[%s6508_s25 + $0x138] sm:$0xff] }
 0x3e5   : > { %v3964_v41 = vadd.f32 %v3963_v9, %v3795_v49  ;;  %v4132_v6 = vpop.f32.mrf.mxu3  ;;  %v3797_v26 = vpop.f32.mrf.mxu1  ;;  %v9523_v49 = vld [vmem:[#allocation26_spill] sm:$0xff]  ;;  %v9525_v9 = vpack.c.bf16 %v7976_v24, %v7968_v37 }
 0x3e6   : > { %v3798_v10 = vadd.f32 %v3797_v26, %v3628_v56 }
 0x3e7   : > { %v4133_v60 = vadd.f32 %v4132_v6, %v3964_v41  ;;  %3667 = vmatmul.bf16.gmra.mxu0 %v9506_v8 }
 0x3e8   : > { %3836 = vmatmul.bf16.gmra.mxu1 %v9509_v31 }
 0x3e9   : > { %v5052_v4 = vsel %vm4328_vm3, %v4133_v60, 0.0  ;;  %4005 = vmatmul.bf16.gmra.mxu2 %v9512_v7  ;;  %v4301_v46 = vmul.f32 %v4237_v21, %v4133_v60  ;;  %4649 = vperm.xlu0 %5755, %v4133_v60  }
 0x3ea   : > { %4174 = vmatmul.bf16.gmra.mxu3 %v9515_v14  ;;  %v5053_v27 = vadd.f32 %v5052_v4, %v5051_v58  ;;  %v9522_v58 = vld [vmem:[#allocation24_spill] sm:$0xff] }
 0x3eb   : > { %v4402_v29 = vsel %vm4328_vm3, %v4301_v46, 0.0  ;;  %v9524_v36 = vpack.c.bf16 %v9522_v58, %v9523_v49 }
 0x3ec   : > { %v3966_v35 = vpop.f32.mrf.mxu2  ;;  %v4403_v33 = vadd.f32 %v4402_v29, %v4401_v54  ;;  %v3630_v30 = vpop.f32.mrf.mxu0  ;;  %v9526_v29 = vld [vmem:[#allocation25_spill] sm:$0xff] }
 0x3ed   : > { %v3967_v16 = vadd.f32 %v3966_v35, %v3798_v10  ;;  %v4135_v25 = vpop.f32.mrf.mxu3  ;;  %v3799_v11 = vpop.f32.mrf.mxu1  ;;  %v9527_v35 = vld [vmem:[#allocation27_spill] sm:$0xff] }
 0x3ee   : > { %v3800_v43 = vadd.f32 %v3799_v11, %v3630_v30 }
 0x3ef   : > { %v4136_v48 = vadd.f32 %v4135_v25, %v3967_v16  ;;  %v9529_v16 = vld [vmem:[#allocation30_spill] sm:$0xff]  ;;  %v9530_v25 = vld [vmem:[#allocation28_spill] sm:$0xff] }
 0x3f0   : > { %v9531_v30 = vpack.c.bf16 %v9529_v16, %v9530_v25 }
 0x3f1   : > { %v5054_v57 = vsel %vm4328_vm3, %v4136_v48, 0.0  ;;  %4654 = vperm.xlu1 %5753, %v4136_v48   ;;  %v4302_v0 = vmul.f32 %v4238_v40, %v4136_v48  ;;  %v9532_v40 = vld [vmem:[#allocation29_spill] sm:$0xff]  ;;  %v9533_v48 = vld [vmem:[#allocation31_spill] sm:$0xff] }
 0x3f2   : > { %v5055_v12 = vadd.f32 %v5054_v57, %v5053_v27  ;;  %v8473_v27 = vld [vmem:[%s6508_s25 + $0x148] sm:$0xff]  ;;  %v9534_v57 = vpack.c.bf16 %v9532_v40, %v9533_v48 }
 0x3f3   : > { %v4404_v18 = vsel %vm4328_vm3, %v4302_v0, 0.0  ;;  %v9535_v0 = vpack.c.bf16 %v8020_v15, %v8013_v51  ;;  %v9544_v40 = vld [vmem:[#allocation37_spill] sm:$0xff]  ;;  %v9545_v48 = vld [vmem:[#allocation36_spill] sm:$0xff] }
 0x3f4   : > { %v3968_v45 = vpop.f32.mrf.mxu2  ;;  %v4405_v53 = vadd.f32 %v4404_v18, %v4403_v33  ;;  %v3633_v52 = vpop.f32.mrf.mxu0  ;;  %v9528_v33 = vpack.c.bf16 %v9526_v29, %v9527_v35 }
 0x3f5   : > { %v3969_v47 = vadd.f32 %v3968_v45, %v3800_v43  ;;  %v4137_v42 = vpop.f32.mrf.mxu3  ;;  %v3802_v38 = vpop.f32.mrf.mxu1 }
 0x3f6   : > { %v3803_v6 = vadd.f32 %v3802_v38, %v3633_v52 }
 0x3f7   : > { %v4138_v3 = vadd.f32 %v4137_v42, %v3969_v47  ;;  %3672 = vmatmul.bf16.gmra.mxu0 %v9518_v2 }
 0x3f8   : > { %3841 = vmatmul.bf16.gmra.mxu1 %v9521_v22 }
 0x3f9   : > { %v5056_v44 = vsel %vm4328_vm3, %v4138_v3, 0.0  ;;  %4010 = vmatmul.bf16.gmra.mxu2 %v9524_v36  ;;  %v4303_v54 = vmul.f32 %v4239_v5, %v4138_v3  ;;  %4659 = vperm.xlu2 %5754, %v4138_v3   ;;  %v8491_v3 = vld [vmem:[%s6508_s25 + $0x150] sm:$0xff] }
 0x3fa   : > { %4179 = vmatmul.bf16.gmra.mxu3 %v9525_v9  ;;  %v5057_v41 = vadd.f32 %v5056_v44, %v5055_v12  ;;  %v8497_v9 = vld [vmem:[%s6508_s25 + $0x158] sm:$0xff] }
 0x3fb   : > { %v4406_v56 = vsel %vm4328_vm3, %v4303_v54, 0.0 }
 0x3fc   : > { %v3971_v26 = vpop.f32.mrf.mxu2  ;;  %v4407_v21 = vadd.f32 %v4406_v56, %v4405_v53  ;;  %v3635_v20 = vpop.f32.mrf.mxu0  ;;  %v9538_v56 = vld [vmem:[#allocation35_spill] sm:$0xff] }
 0x3fd   : > { %v3972_v60 = vadd.f32 %v3971_v26, %v3803_v6  ;;  %v4140_v13 = vpop.f32.mrf.mxu3  ;;  %v3804_v8 = vpop.f32.mrf.mxu1  ;;  %v9539_v26 = vld [vmem:[#allocation32_spill] sm:$0xff] }
 0x3fe   : > { %v3805_v4 = vadd.f32 %v3804_v8, %v3635_v20  ;;  %v9543_v8 = vpack.c.bf16 %v8064_v61, %v8057_v63 }
 0x3ff   : > { %v4141_v34 = vadd.f32 %v4140_v13, %v3972_v60  ;;  %v9541_v13 = vld [vmem:[#allocation33_spill] sm:$0xff] }
 0x400   : > { %v9542_v20 = vpack.c.bf16 %v8061_v19, %v9541_v13  ;;  %v8515_v19 = vld [vmem:[%s6508_s25 + $0x160] sm:$0xff] }
 0x401   : > { %v5058_v31 = vsel %vm4328_vm3, %v4141_v34, 0.0  ;;  %4664 = vperm.xlu0 %5755, %v4141_v34   ;;  %v4304_v24 = vmul.f32 %v4240_v1, %v4141_v34 }
 0x402   : > { %v5059_v37 = vadd.f32 %v5058_v31, %v5057_v41  ;;  %v9536_v41 = vld [vmem:[#allocation34_spill] sm:$0xff] }
 0x403   : > { %v4408_v23 = vsel %vm4328_vm3, %v4304_v24, 0.0  ;;  %v9537_v6 = vpack.c.bf16 %v8046_v28, %v9536_v41 }
 0x404   : > { %v3973_v55 = vpop.f32.mrf.mxu2  ;;  %v4409_v7 = vadd.f32 %v4408_v23, %v4407_v21  ;;  %v3638_v14 = vpop.f32.mrf.mxu0  ;;  %v9540_v21 = vpack.c.bf16 %v9538_v56, %v9539_v26 }
 0x405   : > { %v3974_v39 = vadd.f32 %v3973_v55, %v3805_v4  ;;  %v4142_v59 = vpop.f32.mrf.mxu3  ;;  %v3807_v46 = vpop.f32.mrf.mxu1 }
 0x406   : > { %v3808_v18 = vadd.f32 %v3807_v46, %v3638_v14 }
 0x407   : > { %v4143_v10 = vadd.f32 %v4142_v59, %v3974_v39  ;;  %3677 = vmatmul.bf16.gmra.mxu0 %v9528_v33 }
 0x408   : > { %3846 = vmatmul.bf16.gmra.mxu1 %v9531_v30  ;;  %v8521_v30 = vld [vmem:[%s6508_s25 + $0x168] sm:$0xff] }
 0x409   : > { %v5060_v11 = vsel %vm4328_vm3, %v4143_v10, 0.0  ;;  %4015 = vmatmul.bf16.gmra.mxu2 %v9534_v57  ;;  %v4305_v12 = vmul.f32 %v8473_v27, %v4143_v10  ;;  %4669 = vperm.xlu1 %5753, %v4143_v10   ;;  %v9546_v57 = vpack.c.bf16 %v9544_v40, %v9545_v48 }
 0x40a   : > { %4184 = vmatmul.bf16.gmra.mxu3 %v9535_v0  ;;  %v5061_v43 = vadd.f32 %v5060_v11, %v5059_v37  ;;  %v9547_v0 = vld [vmem:[#allocation39_spill] sm:$0xff] }
 0x40b   : > { %v4410_v45 = vsel %vm4328_vm3, %v4305_v12, 0.0  ;;  %v9548_v12 = vld [vmem:[#allocation38_spill] sm:$0xff] }
 0x40c   : > { %v3976_v53 = vpop.f32.mrf.mxu2  ;;  %v4411_v47 = vadd.f32 %v4410_v45, %v4409_v7  ;;  %v3640_v38 = vpop.f32.mrf.mxu0  ;;  %v9550_v45 = vld [vmem:[#allocation43_spill] sm:$0xff] }
 0x40d   : > { %v3977_v42 = vadd.f32 %v3976_v53, %v3808_v18  ;;  %v4145_v52 = vpop.f32.mrf.mxu3  ;;  %v3809_v5 = vpop.f32.mrf.mxu1  ;;  %v9551_v53 = vld [vmem:[#allocation42_spill] sm:$0xff] }
 0x40e   : > { %v3810_v2 = vadd.f32 %v3809_v5, %v3640_v38 }
 0x40f   : > { %v4146_v17 = vadd.f32 %v4145_v52, %v3977_v42  ;;  %v9553_v42 = vld [vmem:[#allocation41_spill] sm:$0xff]  ;;  %v9554_v52 = vld [vmem:[#allocation40_spill] sm:$0xff] }
 0x410   : > { %v9555_v38 = vpack.c.bf16 %v9553_v42, %v9554_v52 }
 0x411   : > { %v5062_v51 = vsel %vm4328_vm3, %v4146_v17, 0.0  ;;  %4674 = vperm.xlu2 %5754, %v4146_v17   ;;  %v4306_v15 = vmul.f32 %v8491_v3, %v4146_v17 }
 0x412   : > { %v5063_v32 = vadd.f32 %v5062_v51, %v5061_v43  ;;  %v9549_v43 = vpack.c.bf16 %v9547_v0, %v9548_v12  ;;  %v8557_v0 = vld [vmem:[%s6508_s25 + $0x188] sm:$0xff] }
 0x413   : > { %v4412_v62 = vsel %vm4328_vm3, %v4306_v15, 0.0 }
 0x414   : > { %v3978_v50 = vpop.f32.mrf.mxu2  ;;  %v4413_v22 = vadd.f32 %v4412_v62, %v4411_v47  ;;  %v3643_v49 = vpop.f32.mrf.mxu0  ;;  %v9552_v47 = vpack.c.bf16 %v9550_v45, %v9551_v53 }
 0x415   : > { %v3979_v44 = vadd.f32 %v3978_v50, %v3810_v2  ;;  %v4147_v58 = vpop.f32.mrf.mxu3  ;;  %v3812_v36 = vpop.f32.mrf.mxu1 }
 0x416   : > { %v3813_v28 = vadd.f32 %v3812_v36, %v3643_v49 }
 0x417   : > { %v4148_v54 = vadd.f32 %v4147_v58, %v3979_v44  ;;  %3682 = vmatmul.bf16.gmra.mxu0 %v9537_v6  ;;  %v8539_v58 = vld [vmem:[%s6508_s25 + $0x170] sm:$0xff] }
 0x418   : > { %3851 = vmatmul.bf16.gmra.mxu1 %v9540_v21 }
 0x419   : > { %v5064_v60 = vsel %vm4328_vm3, %v4148_v54, 0.0  ;;  %4020 = vmatmul.bf16.gmra.mxu2 %v9542_v20  ;;  %v4307_v1 = vmul.f32 %v8497_v9, %v4148_v54  ;;  %4679 = vperm.xlu0 %5755, %v4148_v54  }
 0x41a   : > { %4189 = vmatmul.bf16.gmra.mxu3 %v9543_v8  ;;  %v5065_v34 = vadd.f32 %v5064_v60, %v5063_v32 }
 0x41b   : > { %v4414_v31 = vsel %vm4328_vm3, %v4307_v1, 0.0  ;;  %v8545_v1 = vld [vmem:[%s6508_s25 + $0x178] sm:$0xff] }
 0x41c   : > { %v3981_v24 = vpop.f32.mrf.mxu2  ;;  %v4415_v37 = vadd.f32 %v4414_v31, %v4413_v22  ;;  %v3645_v55 = vpop.f32.mrf.mxu0 }
 0x41d   : > { %v3982_v4 = vadd.f32 %v3981_v24, %v3813_v28  ;;  %v4150_v23 = vpop.f32.mrf.mxu3  ;;  %v3814_v7 = vpop.f32.mrf.mxu1 }
 0x41e   : > { %v3815_v14 = vadd.f32 %v3814_v7, %v3645_v55 }
 0x41f   : > { %v4151_v39 = vadd.f32 %v4150_v23, %v3982_v4 }
 0x421   : > { %v5066_v61 = vsel %vm4328_vm3, %v4151_v39, 0.0  ;;  %4684 = vperm.xlu1 %5753, %v4151_v39   ;;  %v4308_v63 = vmul.f32 %v8515_v19, %v4151_v39 }
 0x422   : > { %v5067_v59 = vadd.f32 %v5066_v61, %v5065_v34 }
 0x423   : > { %v4416_v46 = vsel %vm4328_vm3, %v4308_v63, 0.0 }
 0x424   : > { %v3983_v10 = vpop.f32.mrf.mxu2  ;;  %v4417_v29 = vadd.f32 %v4416_v46, %v4415_v37  ;;  %v3648_v16 = vpop.f32.mrf.mxu0 }
 0x425   : > { %v3984_v35 = vadd.f32 %v3983_v10, %v3815_v14  ;;  %v4152_v33 = vpop.f32.mrf.mxu3  ;;  %v3817_v25 = vpop.f32.mrf.mxu1 }
 0x426   : > { %v3818_v51 = vadd.f32 %v3817_v25, %v3648_v16 }
 0x427   : > { %v4153_v11 = vadd.f32 %v4152_v33, %v3984_v35  ;;  %3687 = vmatmul.bf16.gmra.mxu0 %v9549_v43 }
 0x428   : > { %3856 = vmatmul.bf16.gmra.mxu1 %v9546_v57 }
 0x429   : > { %v5068_v18 = vsel %vm4328_vm3, %v4153_v11, 0.0  ;;  %4025 = vmatmul.bf16.gmra.mxu2 %v9552_v47  ;;  %v4309_v5 = vmul.f32 %v8521_v30, %v4153_v11  ;;  %4689 = vperm.xlu2 %5754, %v4153_v11  }
 0x42a   : > { %4194 = vmatmul.bf16.gmra.mxu3 %v9555_v38  ;;  %v5069_v17 = vadd.f32 %v5068_v18, %v5067_v59  ;;  %v8551_v59 = vld [vmem:[%s6508_s25 + $0x180] sm:$0xff] }
 0x42b   : > { %v4418_v15 = vsel %vm4328_vm3, %v4309_v5, 0.0 }
 0x42c   : > { %v3986_v32 = vpop.f32.mrf.mxu2  ;;  %v4419_v2 = vadd.f32 %v4418_v15, %v4417_v29  ;;  %v3650_v22 = vpop.f32.mrf.mxu0  ;;  %v8563_v15 = vld [vmem:[%s6508_s25 + $0x190] sm:$0xff] }
 0x42d   : > { %v3987_v62 = vadd.f32 %v3986_v32, %v3818_v51  ;;  %v4155_v50 = vpop.f32.mrf.mxu3  ;;  %v3819_v44 = vpop.f32.mrf.mxu1 }
 0x42e   : > { %v3820_v6 = vadd.f32 %v3819_v44, %v3650_v22 }
 0x42f   : > { %v4156_v49 = vadd.f32 %v4155_v50, %v3987_v62 }
 0x431   : > { %v5070_v36 = vsel %vm4328_vm3, %v4156_v49, 0.0  ;;  %4694 = vperm.xlu0 %5755, %v4156_v49   ;;  %v4310_v54 = vmul.f32 %v8539_v58, %v4156_v49 }
 0x432   : > { %v5071_v41 = vadd.f32 %v5070_v36, %v5069_v17 }
 0x433   : > { %v4420_v56 = vsel %vm4328_vm3, %v4310_v54, 0.0 }
 0x434   : > { %v3988_v26 = vpop.f32.mrf.mxu2  ;;  %v4421_v21 = vadd.f32 %v4420_v56, %v4419_v2  ;;  %v3653_v20 = vpop.f32.mrf.mxu0 }
 0x435   : > { %v3989_v60 = vadd.f32 %v3988_v26, %v3820_v6  ;;  %v4157_v13 = vpop.f32.mrf.mxu3  ;;  %v3822_v8 = vpop.f32.mrf.mxu1  ;;  %v8569_v26 = vld [vmem:[%s6508_s25 + $0x198] sm:$0xff] }
 0x436   : > { %v3823_v37 = vadd.f32 %v3822_v8, %v3653_v20 }
 0x437   : > { %v4158_v34 = vadd.f32 %v4157_v13, %v3989_v60 }
 0x439   : > { %v5072_v28 = vsel %vm4328_vm3, %v4158_v34, 0.0  ;;  %4699 = vperm.xlu1 %5753, %v4158_v34   ;;  %v4311_v31 = vmul.f32 %v8545_v1, %v4158_v34 }
 0x43a   : > { %v5073_v24 = vadd.f32 %v5072_v28, %v5071_v41 }
 0x43b   : > { %v4422_v4 = vsel %vm4328_vm3, %v4311_v31, 0.0 }
 0x43c   : > { %v3991_v23 = vpop.f32.mrf.mxu2  ;;  %v4423_v55 = vadd.f32 %v4422_v4, %v4421_v21  ;;  %v3655_v61 = vpop.f32.mrf.mxu0 }
 0x43d   : > { %v3992_v7 = vadd.f32 %v3991_v23, %v3823_v37  ;;  %v4160_v39 = vpop.f32.mrf.mxu3  ;;  %v3824_v63 = vpop.f32.mrf.mxu1 }
 0x43e   : > { %v3825_v35 = vadd.f32 %v3824_v63, %v3655_v61 }
 0x43f   : > { %v4161_v14 = vadd.f32 %v4160_v39, %v3992_v7 }
 0x441   : > { %v5074_v46 = vsel %vm4328_vm3, %v4161_v14, 0.0  ;;  %4704 = vperm.xlu2 %5754, %v4161_v14   ;;  %v4312_v10 = vmul.f32 %v8551_v59, %v4161_v14 }
 0x442   : > { %v5075_v29 = vadd.f32 %v5074_v46, %v5073_v24 }
 0x443   : > { %v4424_v33 = vsel %vm4328_vm3, %v4312_v10, 0.0 }
 0x444   : > { %v3993_v16 = vpop.f32.mrf.mxu2  ;;  %v4425_v25 = vadd.f32 %v4424_v33, %v4423_v55  ;;  %v3658_v48 = vpop.f32.mrf.mxu0  ;;  %v8575_v55 = vld [vmem:[%s6508_s25 + $0x1a0] sm:$0xff] }
 0x445   : > { %v3994_v11 = vadd.f32 %v3993_v16, %v3825_v35  ;;  %v4162_v40 = vpop.f32.mrf.mxu3  ;;  %v3827_v57 = vpop.f32.mrf.mxu1 }
 0x446   : > { %v3828_v53 = vadd.f32 %v3827_v57, %v3658_v48 }
 0x447   : > { %v4163_v12 = vadd.f32 %v4162_v40, %v3994_v11 }
 0x449   : > { %v5076_v43 = vsel %vm4328_vm3, %v4163_v12, 0.0  ;;  %4709 = vperm.xlu0 %5755, %v4163_v12   ;;  %v4313_v18 = vmul.f32 %v8557_v0, %v4163_v12 }
 0x44a   : > { %v5077_v45 = vadd.f32 %v5076_v43, %v5075_v29 }
 0x44b   : > { %v4426_v47 = vsel %vm4328_vm3, %v4313_v18, 0.0 }
 0x44c   : > { %v3996_v42 = vpop.f32.mrf.mxu2  ;;  %v4427_v52 = vadd.f32 %v4426_v47, %v4425_v25  ;;  %v3660_v17 = vpop.f32.mrf.mxu0 }
 0x44d   : > { %v3997_v38 = vadd.f32 %v3996_v42, %v3828_v53  ;;  %v4165_v5 = vpop.f32.mrf.mxu3  ;;  %v3829_v51 = vpop.f32.mrf.mxu1 }
 0x44e   : > { %v3830_v22 = vadd.f32 %v3829_v51, %v3660_v17 }
 0x44f   : > { %v4166_v32 = vadd.f32 %v4165_v5, %v3997_v38  ;;  %v4465_v5 = vpop.permute.xlu1 %4464 }
 0x451   : > { %v5078_v2 = vsel %vm4328_vm3, %v4166_v32, 0.0  ;;  %4714 = vperm.xlu1 %5753, %v4166_v32   ;;  %v4314_v62 = vmul.f32 %v8563_v15, %v4166_v32 }
 0x452   : > { %v5079_v50 = vadd.f32 %v5078_v2, %v5077_v45 }
 0x453   : > { %v4428_v44 = vsel %vm4328_vm3, %v4314_v62, 0.0 }
 0x454   : > { %v3998_v49 = vpop.f32.mrf.mxu2  ;;  %v4429_v36 = vadd.f32 %v4428_v44, %v4427_v52  ;;  %v3663_v6 = vpop.f32.mrf.mxu0 }
 0x455   : > { %v3999_v54 = vadd.f32 %v3998_v49, %v3830_v22  ;;  %v4167_v41 = vpop.f32.mrf.mxu3  ;;  %v3832_v56 = vpop.f32.mrf.mxu1 }
 0x456   : > { %v3833_v8 = vadd.f32 %v3832_v56, %v3663_v6  ;;  %v4470_v22 = vpop.permute.xlu2 %4469 }
 0x457   : > { %v4168_v21 = vadd.f32 %v4167_v41, %v3999_v54  ;;  %v4480_v41 = vpop.permute.xlu1 %4479 }
 0x459   : > { %v5080_v60 = vsel %vm4328_vm3, %v4168_v21, 0.0  ;;  %4719 = vperm.xlu2 %5754, %v4168_v21   ;;  %v4315_v13 = vmul.f32 %v8569_v26, %v4168_v21 }
 0x45a   : > { %v5081_v20 = vadd.f32 %v5080_v60, %v5079_v50 }
 0x45b   : > { %v4430_v34 = vsel %vm4328_vm3, %v4315_v13, 0.0  ;;  %v6268_v13 = vld [vmem:[%s6508_s25] sm:$0xff] }
 0x45c   : > { %v4001_v28 = vpop.f32.mrf.mxu2  ;;  %v4431_v31 = vadd.f32 %v4430_v34, %v4429_v36  ;;  %v3665_v4 = vpop.f32.mrf.mxu0 }
 0x45d   : > { %v4002_v24 = vadd.f32 %v4001_v28, %v3833_v8  ;;  %v4170_v37 = vpop.f32.mrf.mxu3  ;;  %v3834_v23 = vpop.f32.mrf.mxu1  ;;  %v6269_v28 = vld [vmem:[%s6508_s25 + $0x8] sm:$0xff] }
 0x45e   : > { %v3835_v14 = vadd.f32 %v3834_v23, %v3665_v4  ;;  %v4475_v36 = vpop.permute.xlu0 %4474  ;;  %v4485_v4 = vpop.permute.xlu2 %4484 }
 0x45f   : > { %v4171_v7 = vadd.f32 %v4170_v37, %v4002_v24  ;;  %v6270_v24 = vld [vmem:[%s6508_s25 + $0x10] sm:$0xff] }
 0x460   : > { %v4784_v37 = vmul.f32 %v6270_v24, %v4475_v36 }
 0x461   : > { %v5082_v39 = vsel %vm4328_vm3, %v4171_v7, 0.0  ;;  %4724 = vperm.xlu0 %5755, %v4171_v7   ;;  %v4316_v61 = vmul.f32 %v8575_v55, %v4171_v7 }
 0x462   : > { %v5083_v63 = vadd.f32 %v5082_v39, %v5081_v20  ;;  %v4782_v20 = vmul.f32 %v6268_v13, %v4465_v5  ;;  %v6271_v39 = vld [vmem:[%s6508_s25 + $0x18] sm:$0xff] }
 0x463   : > { %v4432_v46 = vsel %vm4328_vm3, %v4316_v61, 0.0  ;;  %v4785_v61 = vmul.f32 %v6271_v39, %v4480_v41 }
 0x464   : > { %v4003_v10 = vpop.f32.mrf.mxu2  ;;  %v8580_v29 = vadd.f32 %v4432_v46, %v4431_v31  ;;  %v3668_v16 = vpop.f32.mrf.mxu0  ;;  %v4783_v31 = vmul.f32 %v6269_v28, %v4470_v22  ;;  %v4846_v7 = vsel %vm4328_vm3, %v4782_v20, 0.0 }
 0x465   : > { %v4004_v35 = vadd.f32 %v4003_v10, %v3835_v14  ;;  %v4172_v33 = vpop.f32.mrf.mxu3  ;;  %v3837_v25 = vpop.f32.mrf.mxu1  ;;  %v4849_v10 = vsel %vm4328_vm3, %v4784_v37, 0.0 }
 0x466   : > { %v3838_v57 = vadd.f32 %v3837_v25, %v3668_v16  ;;  %v4847_v46 = vsel %vm4328_vm3, %v4783_v31, 0.0  ;;  %v4495_v5 = vpop.permute.xlu2 %4494  ;;  %v6276_v31 = vld [vmem:[%s6508_s25 + $0x40] sm:$0xff] }
 0x467   : > { %v8582_v11 = vadd.f32 %v4172_v33, %v4004_v35  ;;  %v4490_v35 = vpop.permute.xlu1 %4489  ;;  %v4848_v16 = vadd.f32 %v4847_v46, %v4846_v7 }
 0x469   : > { %v5084_v40 = vsel %vm4328_vm3, %v8582_v11, 0.0  ;;  %4729 = vperm.xlu1 %5753, %v8582_v11  }
 0x46a   : > { %v5085_v48 = vadd.f32 %v5084_v40, %v5083_v63 }
 0x46c   : > { %v4006_v12 = vpop.f32.mrf.mxu2  ;;  %v3670_v45 = vpop.f32.mrf.mxu0 }
 0x46d   : > { %v4007_v43 = vadd.f32 %v4006_v12, %v3838_v57  ;;  %v4175_v18 = vpop.f32.mrf.mxu3  ;;  %v3839_v53 = vpop.f32.mrf.mxu1  ;;  %v4851_v57 = vsel %vm4328_vm3, %v4785_v61, 0.0 }
 0x46e   : > { %v3840_v38 = vadd.f32 %v3839_v53, %v3670_v45  ;;  %v6272_v45 = vld [vmem:[%s6508_s25 + $0x20] sm:$0xff]  ;;  %v4510_v37 = vpop.permute.xlu2 %4509 }
 0x46f   : > { %v8587_v47 = vadd.f32 %v4175_v18, %v4007_v43  ;;  %v4850_v43 = vadd.f32 %v4849_v10, %v4848_v16  ;;  %v4786_v53 = vmul.f32 %v6272_v45, %v4485_v4 }
 0x471   : > { %v5086_v42 = vsel %vm4328_vm3, %v8587_v47, 0.0  ;;  %4734 = vperm.xlu2 %5754, %v8587_v47  }
 0x472   : > { %v5087_v52 = vadd.f32 %v5086_v42, %v5085_v48  ;;  %v6273_v42 = vld [vmem:[%s6508_s25 + $0x28] sm:$0xff] }
 0x474   : > { %v4008_v17 = vpop.f32.mrf.mxu2  ;;  %v3673_v2 = vpop.f32.mrf.mxu0 }
 0x475   : > { %v4009_v51 = vadd.f32 %v4008_v17, %v3840_v38  ;;  %v4177_v32 = vpop.f32.mrf.mxu3  ;;  %v3842_v62 = vpop.f32.mrf.mxu1  ;;  %v4852_v38 = vadd.f32 %v4851_v57, %v4850_v43 }
 0x476   : > { %v3843_v54 = vadd.f32 %v3842_v62, %v3673_v2  ;;  %v4853_v62 = vsel %vm4328_vm3, %v4786_v53, 0.0 }
 0x477   : > { %v8592_v50 = vadd.f32 %v4177_v32, %v4009_v51  ;;  %v4500_v32 = vpop.permute.xlu0 %4499  ;;  %v4854_v36 = vadd.f32 %v4853_v62, %v4852_v38 }
 0x479   : > { %v5088_v44 = vsel %vm4328_vm3, %v8592_v50, 0.0  ;;  %4739 = vperm.xlu0 %5755, %v8592_v50  }
 0x47a   : > { %v5089_v49 = vadd.f32 %v5088_v44, %v5087_v52  ;;  %v4787_v52 = vmul.f32 %v6273_v42, %v4490_v35  ;;  %v4505_v44 = vpop.permute.xlu1 %4504 }
 0x47b   : > { %v4790_v24 = vmul.f32 %v6276_v31, %v4505_v44 }
 0x47c   : > { %v4011_v6 = vpop.f32.mrf.mxu2  ;;  %v3675_v60 = vpop.f32.mrf.mxu0  ;;  %v4855_v22 = vsel %vm4328_vm3, %v4787_v52, 0.0  ;;  %v6279_v52 = vld [vmem:[%s6508_s25 + $0x58] sm:$0xff] }
 0x47d   : > { %v4012_v56 = vadd.f32 %v4011_v6, %v3843_v54  ;;  %v4180_v21 = vpop.f32.mrf.mxu3  ;;  %v3844_v8 = vpop.f32.mrf.mxu1  ;;  %v4861_v46 = vsel %vm4328_vm3, %v4790_v24, 0.0  ;;  %v8644_v24 = vld [vmem:[%s6508_s25 + $0x1a8] sm:$0xff] }
 0x47e   : > { %v3845_v14 = vadd.f32 %v3844_v8, %v3675_v60  ;;  %v6275_v60 = vld [vmem:[%s6508_s25 + $0x38] sm:$0xff]  ;;  %v4856_v8 = vadd.f32 %v4855_v22, %v4854_v36 }
 0x47f   : > { %v8598_v34 = vadd.f32 %v4180_v21, %v4012_v56  ;;  %v6274_v56 = vld [vmem:[%s6508_s25 + $0x30] sm:$0xff]  ;;  %v4789_v13 = vmul.f32 %v6275_v60, %v4500_v32  ;;  %v6280_v60 = vld [vmem:[%s6508_s25 + $0x60] sm:$0xff] }
 0x480   : > { %v4788_v21 = vmul.f32 %v6274_v56, %v4495_v5  ;;  %v4525_v5 = vpop.permute.xlu2 %4524 }
 0x481   : > { %v5090_v23 = vsel %vm4328_vm3, %v8598_v34, 0.0  ;;  %4744 = vperm.xlu1 %5753, %v8598_v34   ;;  %v4859_v7 = vsel %vm4328_vm3, %v4789_v13, 0.0  ;;  %v4794_v13 = vmul.f32 %v6280_v60, %v4525_v5 }
 0x482   : > { %v5091_v63 = vadd.f32 %v5090_v23, %v5089_v49  ;;  %v4857_v23 = vsel %vm4328_vm3, %v4788_v21, 0.0  ;;  %v4520_v10 = vpop.permute.xlu1 %4519 }
 0x483   : > { %v4858_v61 = vadd.f32 %v4857_v23, %v4856_v8  ;;  %v4793_v38 = vmul.f32 %v6279_v52, %v4520_v10  ;;  %v6282_v23 = vld [vmem:[%s6508_s25 + $0x70] sm:$0xff] }
 0x484   : > { %v4013_v33 = vpop.f32.mrf.mxu2  ;;  %v3678_v48 = vpop.f32.mrf.mxu0 }
 0x485   : > { %v4014_v25 = vadd.f32 %v4013_v33, %v3845_v14  ;;  %v4182_v40 = vpop.f32.mrf.mxu3  ;;  %v3847_v12 = vpop.f32.mrf.mxu1  ;;  %v4860_v33 = vadd.f32 %v4859_v7, %v4858_v61 }
 0x486   : > { %v3848_v2 = vadd.f32 %v3847_v12, %v3678_v48  ;;  %v6277_v48 = vld [vmem:[%s6508_s25 + $0x48] sm:$0xff]  ;;  %v6278_v12 = vld [vmem:[%s6508_s25 + $0x50] sm:$0xff] }
 0x487   : > { %v8610_v18 = vadd.f32 %v4182_v40, %v4014_v25  ;;  %v4791_v57 = vmul.f32 %v6277_v48, %v4510_v37  ;;  %v4862_v53 = vadd.f32 %v4861_v46, %v4860_v33  ;;  %v4869_v46 = vsel %vm4328_vm3, %v4794_v13, 0.0  ;;  %v8660_v33 = vld [vmem:[%s6508_s25 + $0x1b8] sm:$0xff] }
 0x488   : > { %v4540_v61 = vpop.permute.xlu2 %4539  ;;  %v4319_v5 = vmul.f32 %v8660_v33, %v8592_v50 }
 0x489   : > { %v5092_v17 = vsel %vm4328_vm3, %v8610_v18, 0.0  ;;  %4749 = vperm.xlu2 %5754, %v8610_v18  }
 0x48a   : > { %v5093_v51 = vadd.f32 %v5092_v17, %v5091_v63  ;;  %v4515_v63 = vpop.permute.xlu0 %4514  ;;  %v4535_v36 = vpop.permute.xlu1 %4534 }
 0x48b   : > { %v4792_v43 = vmul.f32 %v6278_v12, %v4515_v63  ;;  %v4796_v7 = vmul.f32 %v6282_v23, %v4535_v36  ;;  %v8691_v23 = vld [vmem:[%s6508_s25 + $0x1d8] sm:$0xff] }
 0x48c   : > { %v4016_v49 = vpop.f32.mrf.mxu2  ;;  %v3680_v6 = vpop.f32.mrf.mxu0 }
 0x48d   : > { %v4017_v54 = vadd.f32 %v4016_v49, %v3848_v2  ;;  %v4185_v41 = vpop.f32.mrf.mxu3  ;;  %v3849_v20 = vpop.f32.mrf.mxu1  ;;  %v4865_v32 = vsel %vm4328_vm3, %v4792_v43, 0.0  ;;  %v4867_v49 = vsel %vm4328_vm3, %v4793_v38, 0.0 }
 0x48e   : > { %v3850_v14 = vadd.f32 %v3849_v20, %v3680_v6  ;;  %v6281_v20 = vld [vmem:[%s6508_s25 + $0x68] sm:$0xff] }
 0x48f   : > { %v8621_v28 = vadd.f32 %v4185_v41, %v4017_v54 }
 0x491   : > { %v5094_v4 = vsel %vm4328_vm3, %v8621_v28, 0.0  ;;  %4754 = vperm.xlu0 %5755, %v8621_v28  }
 0x492   : > { %v5095_v39 = vadd.f32 %v5094_v4, %v5093_v51  ;;  %v4863_v51 = vsel %vm4328_vm3, %v4791_v57, 0.0  ;;  %v4530_v22 = vpop.permute.xlu0 %4529  ;;  %v4873_v57 = vsel %vm4328_vm3, %v4796_v7, 0.0 }
 0x493   : > { %v4864_v62 = vadd.f32 %v4863_v51, %v4862_v53  ;;  %v4795_v8 = vmul.f32 %v6281_v20, %v4530_v22  ;;  %v8674_v22 = vld [vmem:[%s6508_s25 + $0x1c8] sm:$0xff]  ;;  %v4438_v20 = vsel %vm4328_vm3, %v4319_v5, 0.0 }
 0x494   : > { %v4018_v35 = vpop.f32.mrf.mxu2  ;;  %v3683_v40 = vpop.f32.mrf.mxu0  ;;  %v4321_v13 = vmul.f32 %v8674_v22, %v8610_v18 }
 0x495   : > { %v4019_v16 = vadd.f32 %v4018_v35, %v3850_v14  ;;  %v4187_v25 = vpop.f32.mrf.mxu3  ;;  %v3852_v45 = vpop.f32.mrf.mxu1  ;;  %v4866_v41 = vadd.f32 %v4865_v32, %v4864_v62  ;;  %v4317_v14 = vmul.f32 %v8644_v24, %v8582_v11  ;;  %v4871_v10 = vsel %vm4328_vm3, %v4795_v8, 0.0  ;;  %v8666_v11 = vld [vmem:[%s6508_s25 + $0x1c0] sm:$0xff] }
 0x496   : > { %v3853_v44 = vadd.f32 %v3852_v45, %v3683_v40  ;;  %v4550_v45 = vpop.permute.xlu1 %4549 }
 0x497   : > { %v8632_v42 = vadd.f32 %v4187_v25, %v4019_v16  ;;  %v4868_v37 = vadd.f32 %v4867_v49, %v4866_v41  ;;  %v4434_v38 = vsel %vm4328_vm3, %v4317_v14, 0.0  ;;  %v6285_v41 = vld [vmem:[%s6508_s25 + $0x88] sm:$0xff] }
 0x498   : > { %v4435_v50 = vadd.f32 %v4434_v38, %v8580_v29  ;;  %v8706_v38 = vld [vmem:[%s6508_s25 + $0x1e8] sm:$0xff] }
 0x499   : > { %v5096_v17 = vsel %vm4328_vm3, %v8632_v42, 0.0  ;;  %4759 = vperm.xlu1 %5753, %v8632_v42   ;;  %v4870_v16 = vadd.f32 %v4869_v46, %v4868_v37 }
 0x49a   : > { %v5097_v2 = vadd.f32 %v5096_v17, %v5095_v39  ;;  %v8650_v39 = vld [vmem:[%s6508_s25 + $0x1b0] sm:$0xff]  ;;  %v4545_v25 = vpop.permute.xlu0 %4544  ;;  %v6283_v17 = vld [vmem:[%s6508_s25 + $0x78] sm:$0xff] }
 0x49b   : > { %v4318_v48 = vmul.f32 %v8650_v39, %v8587_v47  ;;  %v4872_v43 = vadd.f32 %v4871_v10, %v4870_v16  ;;  %v4797_v51 = vmul.f32 %v6283_v17, %v4540_v61  ;;  %v6284_v47 = vld [vmem:[%s6508_s25 + $0x80] sm:$0xff] }
 0x49c   : > { %v4021_v54 = vpop.f32.mrf.mxu2  ;;  %v3685_v21 = vpop.f32.mrf.mxu0  ;;  %v4798_v32 = vmul.f32 %v6284_v47, %v4545_v25 }
 0x49d   : > { %v4022_v6 = vadd.f32 %v4021_v54, %v3853_v44  ;;  %v4190_v56 = vpop.f32.mrf.mxu3  ;;  %v3854_v31 = vpop.f32.mrf.mxu1  ;;  %v4874_v44 = vadd.f32 %v4873_v57, %v4872_v43  ;;  %v4436_v36 = vsel %vm4328_vm3, %v4318_v48, 0.0  ;;  %v4320_v54 = vmul.f32 %v8666_v11, %v8598_v34 }
 0x49e   : > { %v3855_v40 = vadd.f32 %v3854_v31, %v3685_v21  ;;  %v4555_v21 = vpop.permute.xlu2 %4554  ;;  %v4875_v8 = vsel %vm4328_vm3, %v4797_v51, 0.0  ;;  %v4877_v34 = vsel %vm4328_vm3, %v4798_v32, 0.0  ;;  %v4437_v37 = vadd.f32 %v4436_v36, %v4435_v50  ;;  %v4565_v25 = vpop.permute.xlu1 %4564  ;;  %v8719_v36 = vld [vmem:[%s6508_s25 + $0x1f0] sm:$0xff] }
 0x49f   : > { %v8646_v4 = vadd.f32 %v4190_v56, %v4022_v6  ;;  %v4799_v6 = vmul.f32 %v6285_v41, %v4550_v45  ;;  %v8682_v56 = vld [vmem:[%s6508_s25 + $0x1d0] sm:$0xff]  ;;  %v4876_v29 = vadd.f32 %v4875_v8, %v4874_v44  ;;  %v4442_v57 = vsel %vm4328_vm3, %v4321_v13, 0.0  ;;  %v6287_v45 = vld [vmem:[%s6508_s25 + $0x98] sm:$0xff] }
 0x4a0   : > { %v4322_v18 = vmul.f32 %v8682_v56, %v8621_v28  ;;  %v4439_v10 = vadd.f32 %v4438_v20, %v4437_v37  ;;  %v6286_v28 = vld [vmem:[%s6508_s25 + $0x90] sm:$0xff] }
 0x4a1   : > { %v5098_v63 = vsel %vm4328_vm3, %v8646_v4, 0.0  ;;  %4764 = vperm.xlu2 %5754, %v8646_v4   ;;  %v4879_v14 = vsel %vm4328_vm3, %v4799_v6, 0.0  ;;  %v4878_v16 = vadd.f32 %v4877_v34, %v4876_v29  ;;  %v4800_v43 = vmul.f32 %v6286_v28, %v4555_v21 }
 0x4a2   : > { %v5099_v35 = vadd.f32 %v5098_v63, %v5097_v2  ;;  %v4560_v7 = vpop.permute.xlu0 %4559  ;;  %v4440_v63 = vsel %vm4328_vm3, %v4320_v54, 0.0  ;;  %v4444_v47 = vsel %vm4328_vm3, %v4322_v18, 0.0 }
 0x4a3   : > { %v4880_v5 = vadd.f32 %v4879_v14, %v4878_v16  ;;  %v6290_v16 = vld [vmem:[%s6508_s25 + $0xb0] sm:$0xff] }
 0x4a4   : > { %v4023_v12 = vpop.f32.mrf.mxu2  ;;  %v3688_v2 = vpop.f32.mrf.mxu0 }
 0x4a5   : > { %v4024_v53 = vadd.f32 %v4023_v12, %v3855_v40  ;;  %v4192_v52 = vpop.f32.mrf.mxu3  ;;  %v3857_v62 = vpop.f32.mrf.mxu1  ;;  %v4323_v12 = vmul.f32 %v8691_v23, %v8632_v42  ;;  %v6288_v42 = vld [vmem:[%s6508_s25 + $0xa0] sm:$0xff] }
 0x4a6   : > { %v3858_v61 = vadd.f32 %v3857_v62, %v3688_v2  ;;  %v4802_v32 = vmul.f32 %v6288_v42, %v4565_v25  ;;  %v4570_v54 = vpop.permute.xlu2 %4569  ;;  %v4580_v18 = vpop.permute.xlu1 %4579 }
 0x4a7   : > { %v4193_v49 = vadd.f32 %v4192_v52, %v4024_v53  ;;  %v4801_v53 = vmul.f32 %v6287_v45, %v4560_v7  ;;  %v4441_v52 = vadd.f32 %v4440_v63, %v4439_v10  ;;  %v4446_v6 = vsel %vm4328_vm3, %v4323_v12, 0.0  ;;  %v6291_v45 = vld [vmem:[%s6508_s25 + $0xb8] sm:$0xff] }
 0x4a8   : > { %v4885_v7 = vsel %vm4328_vm3, %v4802_v32, 0.0 }
 0x4a9   : > { %v5100_v60 = vsel %vm4328_vm3, %v4193_v49, 0.0  ;;  %4769 = vperm.xlu0 %5755, %v4193_v49   ;;  %v4443_v44 = vadd.f32 %v4442_v57, %v4441_v52  ;;  %v4325_v50 = vmul.f32 %v8706_v38, %v4193_v49  ;;  %v4883_v21 = vsel %vm4328_vm3, %v4801_v53, 0.0 }
 0x4aa   : > { %v5101_v31 = vadd.f32 %v5100_v60, %v5099_v35  ;;  %v8698_v35 = vld [vmem:[%s6508_s25 + $0x1e0] sm:$0xff]  ;;  %v4575_v8 = vpop.permute.xlu0 %4574  ;;  %v4805_v53 = vmul.f32 %v6291_v45, %v4580_v18 }
 0x4ab   : > { %v4324_v51 = vmul.f32 %v8698_v35, %v8646_v4  ;;  %v4881_v4 = vsel %vm4328_vm3, %v4800_v43, 0.0  ;;  %v4445_v13 = vadd.f32 %v4444_v47, %v4443_v44  ;;  %v4450_v14 = vsel %vm4328_vm3, %v4325_v50, 0.0 }
 0x4ac   : > { %v4026_v46 = vpop.f32.mrf.mxu2  ;;  %v3690_v2 = vpop.f32.mrf.mxu0  ;;  %v4882_v20 = vadd.f32 %v4881_v4, %v4880_v5  ;;  %v4804_v25 = vmul.f32 %v6290_v16, %v4575_v8 }
 0x4ad   : > { %v4027_v40 = vadd.f32 %v4026_v46, %v3858_v61  ;;  %v4195_v48 = vpop.f32.mrf.mxu3  ;;  %v3859_v62 = vpop.f32.mrf.mxu1  ;;  %v4448_v37 = vsel %vm4328_vm3, %v4324_v51, 0.0  ;;  %v4447_v49 = vadd.f32 %v4446_v6, %v4445_v13  ;;  %v6289_v46 = vld [vmem:[%s6508_s25 + $0xa8] sm:$0xff] }
 0x4ae   : > { %v3860_v34 = vadd.f32 %v3859_v62, %v3690_v2  ;;  %v4884_v63 = vadd.f32 %v4883_v21, %v4882_v20  ;;  %v4803_v10 = vmul.f32 %v6289_v46, %v4570_v54  ;;  %v4585_v5 = vpop.permute.xlu2 %4584  ;;  %v4889_v42 = vsel %vm4328_vm3, %v4804_v25, 0.0  ;;  %v4595_v4 = vpop.permute.xlu1 %4594  ;;  %v6292_v21 = vld [vmem:[%s6508_s25 + $0xc0] sm:$0xff] }
 0x4af   : > { %v4196_v17 = vadd.f32 %v4195_v48, %v4027_v40  ;;  %v8733_v48 = vld [vmem:[%s6508_s25 + $0x1f8] sm:$0xff]  ;;  %v4449_v57 = vadd.f32 %v4448_v37, %v4447_v49  ;;  %v4806_v13 = vmul.f32 %v6292_v21, %v4585_v5  ;;  %v6294_v37 = vld [vmem:[%s6508_s25 + $0xd0] sm:$0xff] }
 0x4b0   : > { %v4886_v12 = vadd.f32 %v4885_v7, %v4884_v63  ;;  %v4887_v47 = vsel %vm4328_vm3, %v4803_v10, 0.0  ;;  %v6298_v21 = vld [vmem:[%s6508_s25 + $0xf0] sm:$0xff] }
 0x4b1   : > { %v5102_v41 = vsel %vm4328_vm3, %v4196_v17, 0.0  ;;  %4774 = vperm.xlu1 %5753, %v4196_v17   ;;  %v4326_v29 = vmul.f32 %v8719_v36, %v4196_v17  ;;  %v4451_v52 = vadd.f32 %v4450_v14, %v4449_v57  ;;  %v4893_v49 = vsel %vm4328_vm3, %v4806_v13, 0.0 }
 0x4b2   : > { %v5103_v60 = vadd.f32 %v5102_v41, %v5101_v31  ;;  %v4888_v62 = vadd.f32 %v4887_v47, %v4886_v12  ;;  %v4590_v44 = vpop.permute.xlu0 %4589  ;;  %v4891_v41 = vsel %vm4328_vm3, %v4805_v53, 0.0  ;;  %v6296_v12 = vld [vmem:[%s6508_s25 + $0xe0] sm:$0xff]  ;;  %v5113_v53 = vstv %s443_s16 }
 0x4b3   : > { %v4452_v43 = vsel %vm4328_vm3, %v4326_v29, 0.0  ;;  %v4808_v29 = vmul.f32 %v6294_v37, %v4595_v4  ;;  %v5112_v47 = vld [vmem:[#allocation5] sm:$0x1] }
 0x4b4   : > { %v4028_v61 = vpop.f32.mrf.mxu2  ;;  %v4453_v2 = vadd.f32 %v4452_v43, %v4451_v52  ;;  %v4890_v50 = vadd.f32 %v4889_v42, %v4888_v62  ;;  %v6297_v52 = vld [vmem:[%s6508_s25 + $0xe8] sm:$0xff] }
 0x4b5   : > { %v4029_v31 = vadd.f32 %v4028_v61, %v3860_v34  ;;  %v4197_v40 = vpop.f32.mrf.mxu3  ;;  %v4897_v46 = vsel %vm4328_vm3, %v4808_v29, 0.0 }
 0x4b6   : > { %v4892_v34 = vadd.f32 %v4891_v41, %v4890_v50  ;;  %v4600_v61 = vpop.permute.xlu2 %4599  ;;  %v4610_v25 = vpop.permute.xlu1 %4609 }
 0x4b7   : > { %v4198_v28 = vadd.f32 %v4197_v40, %v4029_v31  ;;  %v6295_v40 = vld [vmem:[%s6508_s25 + $0xd8] sm:$0xff]  ;;  %v4811_v5 = vmul.f32 %v6297_v52, %v4610_v25 }
 0x4b8   : > { %v4894_v31 = vadd.f32 %v4893_v49, %v4892_v34  ;;  %v4809_v57 = vmul.f32 %v6295_v40, %v4600_v61  ;;  %v6300_v34 = vld [vmem:[%s6508_s25 + $0x100] sm:$0xff] }
 0x4b9   : > { %v5104_v17 = vsel %vm4328_vm3, %v4198_v28, 0.0  ;;  %4779 = vperm.xlu2 %5754, %v4198_v28   ;;  %v4327_v51 = vmul.f32 %v8733_v48, %v4198_v28  ;;  %v4903_v41 = vsel %vm4328_vm3, %v4811_v5, 0.0 }
 0x4ba   : > { %v8743_v32 = vadd.f32 %v5104_v17, %v5103_v60  ;;  %v6293_v60 = vld [vmem:[%s6508_s25 + $0xc8] sm:$0xff]  ;;  %v4605_v14 = vpop.permute.xlu0 %4604  ;;  %v4899_v42 = vsel %vm4328_vm3, %v4809_v57, 0.0  ;;  %v6303_v57 = vld [vmem:[%s6508_s25 + $0x118] sm:$0xff] }
 0x4bb   : > { %v4454_v54 = vsel %vm4328_vm3, %v4327_v51, 0.0  ;;  %v4807_v20 = vmul.f32 %v6293_v60, %v4590_v44  ;;  %v4810_v28 = vmul.f32 %v6296_v12, %v4605_v14  ;;  %v6299_v60 = vld [vmem:[%s6508_s25 + $0xf8] sm:$0xff] }
 0x4bc   : > { %v4455_v6 = vadd.f32 %v4454_v54, %v4453_v2 }
 0x4bd   : > { %v4895_v63 = vsel %vm4328_vm3, %v4807_v20, 0.0  ;;  %v4901_v2 = vsel %vm4328_vm3, %v4810_v28, 0.0 }
 0x4be   : > { %v4456_v8 = vrot.slane %v4455_v6, 4  ;;  %v4896_v16 = vadd.f32 %v4895_v63, %v4894_v31  ;;  %v4615_v51 = vpop.permute.xlu2 %4614  ;;  %v4625_v4 = vpop.permute.xlu1 %4624 }
 0x4bf   : > { %v4812_v13 = vmul.f32 %v6298_v21, %v4615_v51  ;;  %v4814_v37 = vmul.f32 %v6300_v34, %v4625_v4  ;;  %v6307_v34 = vld [vmem:[%s6508_s25 + $0x138] sm:$0xff] }
 0x4c0   : > { %v4457_v7 = vadd.f32 %v4456_v8, %v4455_v6  ;;  %v4898_v45 = vadd.f32 %v4897_v46, %v4896_v16  ;;  %v6301_v46 = vld [vmem:[%s6508_s25 + $0x108] sm:$0xff]  ;;  %v6302_v16 = vld [vmem:[%s6508_s25 + $0x110] sm:$0xff] }
 0x4c2   : > { %v4458_v18 = vrot.slane %v4457_v7, 2  ;;  %v4900_v44 = vadd.f32 %v4899_v42, %v4898_v45  ;;  %v4620_v54 = vpop.permute.xlu0 %4619 }
 0x4c3   : > { %v4813_v20 = vmul.f32 %v6299_v60, %v4620_v54  ;;  %v6306_v54 = vld [vmem:[%s6508_s25 + $0x130] sm:$0xff] }
 0x4c4   : > { %v4459_v10 = vadd.f32 %v4458_v18, %v4457_v7  ;;  %v4902_v50 = vadd.f32 %v4901_v2, %v4900_v44  ;;  %v4905_v7 = vsel %vm4328_vm3, %v4812_v13, 0.0  ;;  %v4909_v18 = vsel %vm4328_vm3, %v4814_v37, 0.0  ;;  %v6305_v2 = vld [vmem:[%s6508_s25 + $0x128] sm:$0xff] }
 0x4c5   : > { %v4907_v61 = vsel %vm4328_vm3, %v4813_v20, 0.0 }
 0x4c6   : > { %v4460_v43 = vrot.slane %v4459_v10, 1  ;;  %v4904_v8 = vadd.f32 %v4903_v41, %v4902_v50  ;;  %v4630_v29 = vpop.permute.xlu2 %4629  ;;  %v4640_v14 = vpop.permute.xlu1 %4639 }
 0x4c7   : > { %v4817_v12 = vmul.f32 %v6303_v57, %v4640_v14 }
 0x4c8   : > { %v4461_v17 = vadd.f32 %v4460_v43, %v4459_v10  ;;  %v4906_v49 = vadd.f32 %v4905_v7, %v4904_v8  ;;  %v4815_v10 = vmul.f32 %v6301_v46, %v4630_v29  ;;  %v6308_v29 = vld [vmem:[%s6508_s25 + $0x140] sm:$0xff] }
 0x4c9   : > { %v4915_v5 = vsel %vm4328_vm3, %v4817_v12, 0.0 }
 0x4ca   : > { %v5114_v62 = vmul.f32 %v5113_v53, %v4461_v17  ;;  %v4635_v63 = vpop.permute.xlu0 %4634  ;;  %v4908_v31 = vadd.f32 %v4907_v61, %v4906_v49  ;;  %v4911_v43 = vsel %vm4328_vm3, %v4815_v10, 0.0 }
 0x4cb   : > { %v4816_v25 = vmul.f32 %v6302_v16, %v4635_v63 }
 0x4cc   : > { %v5115_v6 = vadd.f32 %v5114_v62, %v5112_v47  ;;  %v4910_v40 = vadd.f32 %v4909_v18, %v4908_v31  ;;  %v6304_v47 = vld [vmem:[%s6508_s25 + $0x120] sm:$0xff]  ;;  %s5144_s25 = sshll.u32 %s8871_s9, 4  ;;  %s5145_s25 = int_to_ptr.hbm [resolvable:$true] %s5144_s25 }
 0x4cd   : > { %v4913_v45 = vsel %vm4328_vm3, %v4816_v25, 0.0 }
 0x4ce   : > { %5117 = vst.msk [vmem:[#allocation5] sm:$0x1] %vm5116_vm4, %v5115_v6  ;;  %v4645_v28 = vpop.permute.xlu2 %4644  ;;  %v4912_v53 = vadd.f32 %v4911_v43, %v4910_v40  ;;  %v4655_v51 = vpop.permute.xlu1 %4654 }
 0x4cf   : > { %5724 = dma.vmem_to_hbm [thread:$0]  (%p5731_p11), %s5131_s18, 16, %s5133_s24, [#allocation6]   ;;  %v4818_v42 = vmul.f32 %v6304_v47, %v4645_v28  ;;  %v4820_v41 = vmul.f32 %v6306_v54, %v4655_v51 }
 0x4d0   : > { %v4914_v17 = vadd.f32 %v4913_v45, %v4912_v53 }
 0x4d1   : > { %v4917_v50 = vsel %vm4328_vm3, %v4818_v42, 0.0  ;;  %v4921_v60 = vsel %vm4328_vm3, %v4820_v41, 0.0 }
 0x4d2   : > { %v4650_v52 = vpop.permute.xlu0 %4649  ;;  %v4916_v44 = vadd.f32 %v4915_v5, %v4914_v17 }
 0x4d3   : > { %v4819_v62 = vmul.f32 %v6305_v2, %v4650_v52 }
 0x4d4   : > { %v4918_v21 = vadd.f32 %v4917_v50, %v4916_v44 }
 0x4d5   : > { %v4919_v4 = vsel %vm4328_vm3, %v4819_v62, 0.0 }
 0x4d6   : > { %v4660_v6 = vpop.permute.xlu2 %4659  ;;  %v4920_v20 = vadd.f32 %v4919_v4, %v4918_v21  ;;  %v4670_v8 = vpop.permute.xlu1 %4669 }
 0x4d7   : > { %v4821_v37 = vmul.f32 %v6307_v34, %v4660_v6  ;;  %v4823_v49 = vmul.f32 %v4670_v8, %v8473_v27 }
 0x4d8   : > { %v4922_v61 = vadd.f32 %v4921_v60, %v4920_v20 }
 0x4d9   : > { %v4923_v18 = vsel %vm4328_vm3, %v4821_v37, 0.0  ;;  %v4927_v10 = vsel %vm4328_vm3, %v4823_v49, 0.0 }
 0x4da   : > { %v4665_v13 = vpop.permute.xlu0 %4664  ;;  %v4924_v14 = vadd.f32 %v4923_v18, %v4922_v61 }
 0x4db   : > { %v4822_v7 = vmul.f32 %v6308_v29, %v4665_v13 }
 0x4dd   : > { %v4925_v31 = vsel %vm4328_vm3, %v4822_v7, 0.0 }
 0x4de   : > { %v4675_v63 = vpop.permute.xlu2 %4674  ;;  %v4926_v16 = vadd.f32 %v4925_v31, %v4924_v14  ;;  %v4685_v25 = vpop.permute.xlu1 %4684 }
 0x4df   : > { %v4824_v40 = vmul.f32 %v4675_v63, %v8491_v3  ;;  %v4826_v28 = vmul.f32 %v4685_v25, %v8515_v19 }
 0x4e0   : > { %v4928_v12 = vadd.f32 %v4927_v10, %v4926_v16 }
 0x4e1   : > { %v4929_v27 = vsel %vm4328_vm3, %v4824_v40, 0.0  ;;  %v4933_v5 = vsel %vm4328_vm3, %v4826_v28, 0.0 }
 0x4e2   : > { %v4680_v46 = vpop.permute.xlu0 %4679  ;;  %v4930_v53 = vadd.f32 %v4929_v27, %v4928_v12 }
 0x4e3   : > { %v4825_v57 = vmul.f32 %v4680_v46, %v8497_v9 }
 0x4e5   : > { %v4931_v45 = vsel %vm4328_vm3, %v4825_v57, 0.0 }
 0x4e6   : > { %v4690_v43 = vpop.permute.xlu2 %4689  ;;  %v4932_v17 = vadd.f32 %v4931_v45, %v4930_v53  ;;  %v4700_v51 = vpop.permute.xlu1 %4699 }
 0x4e7   : > { %v4827_v47 = vmul.f32 %v4690_v43, %v8521_v30  ;;  %v4829_v9 = vmul.f32 %v4700_v51, %v8545_v1 }
 0x4e8   : > { %v4934_v42 = vadd.f32 %v4933_v5, %v4932_v17 }
 0x4e9   : > { %v4935_v19 = vsel %vm4328_vm3, %v4827_v47, 0.0  ;;  %v4939_v41 = vsel %vm4328_vm3, %v4829_v9, 0.0 }
 0x4ea   : > { %v4695_v52 = vpop.permute.xlu0 %4694  ;;  %v4936_v44 = vadd.f32 %v4935_v19, %v4934_v42  ;;  %v5106_v42 = vrot.slane %v8743_v32, 4 }
 0x4eb   : > { %v4828_v3 = vmul.f32 %v4695_v52, %v8539_v58 }
 0x4ec   : > { %v5107_v19 = vadd.f32 %v5106_v42, %v8743_v32 }
 0x4ed   : > { %v4937_v62 = vsel %vm4328_vm3, %v4828_v3, 0.0 }
 0x4ee   : > { %v4705_v2 = vpop.permute.xlu2 %4704  ;;  %v4938_v6 = vadd.f32 %v4937_v62, %v4936_v44  ;;  %v4715_v50 = vpop.permute.xlu1 %4714 }
 0x4ef   : > { %v4830_v4 = vmul.f32 %v4705_v2, %v8551_v59  ;;  %v4832_v58 = vmul.f32 %v4715_v50, %v8563_v15 }
 0x4f0   : > { %v4940_v21 = vadd.f32 %v4939_v41, %v4938_v6 }
 0x4f1   : > { %v4941_v1 = vsel %vm4328_vm3, %v4830_v4, 0.0  ;;  %v4945_v34 = vsel %vm4328_vm3, %v4832_v58, 0.0  ;;  %v5108_v4 = vrot.slane %v5107_v19, 2 }
 0x4f2   : > { %v4710_v54 = vpop.permute.xlu0 %4709  ;;  %v4942_v20 = vadd.f32 %v4941_v1, %v4940_v21 }
 0x4f3   : > { %v4831_v30 = vmul.f32 %v4710_v54, %v8557_v0  ;;  %v5109_v32 = vadd.f32 %v5108_v4, %v5107_v19 }
 0x4f5   : > { %v4943_v60 = vsel %vm4328_vm3, %v4831_v30, 0.0  ;;  %v5110_v1 = vrot.slane %v5109_v32, 1 }
 0x4f6   : > { %v4720_v13 = vpop.permute.xlu2 %4719  ;;  %v4944_v37 = vadd.f32 %v4943_v60, %v4942_v20  ;;  %v4730_v29 = vpop.permute.xlu1 %4729 }
 0x4f7   : > { %v4833_v7 = vmul.f32 %v4720_v13, %v8569_v26  ;;  %v4835_v0 = vmul.f32 %v4730_v29, %v8644_v24 }
 0x4f8   : > { %v4946_v61 = vadd.f32 %v4945_v34, %v4944_v37 }
 0x4f9   : > { %v4947_v15 = vsel %vm4328_vm3, %v4833_v7, 0.0  ;;  %v4951_v14 = vsel %vm4328_vm3, %v4835_v0, 0.0  ;;  %v5118_v7 = vld [vmem:[#allocation7] sm:$0x1] }
 0x4fa   : > { %v4725_v8 = vpop.permute.xlu0 %4724  ;;  %v4948_v18 = vadd.f32 %v4947_v15, %v4946_v61 }
 0x4fb   : > { %v4834_v59 = vmul.f32 %v4725_v8, %v8575_v55  ;;  %v5111_v8 = vadd.f32 %v5110_v1, %v5109_v32 }
 0x4fd   : > { %v4949_v63 = vsel %vm4328_vm3, %v4834_v59, 0.0 }
 0x4fe   : > { %v4735_v49 = vpop.permute.xlu2 %4734  ;;  %v4950_v46 = vadd.f32 %v4949_v63, %v4948_v18  ;;  %v4745_v10 = vpop.permute.xlu1 %4744 }
 0x4ff   : > { %v4836_v16 = vmul.f32 %v4735_v49, %v8650_v39  ;;  %v4838_v55 = vmul.f32 %v4745_v10, %v8666_v11 }
 0x500   : > { %v4952_v25 = vadd.f32 %v4951_v14, %v4950_v46 }
 0x501   : > { %v4953_v24 = vsel %vm4328_vm3, %v4836_v16, 0.0  ;;  %v4957_v43 = vsel %vm4328_vm3, %v4838_v55, 0.0 }
 0x502   : > { %v4740_v31 = vpop.permute.xlu0 %4739  ;;  %v4954_v12 = vadd.f32 %v4953_v24, %v4952_v25 }
 0x503   : > { %v4837_v26 = vmul.f32 %v4740_v31, %v8660_v33 }
 0x505   : > { %v4955_v57 = vsel %vm4328_vm3, %v4837_v26, 0.0 }
 0x506   : > { %v4750_v40 = vpop.permute.xlu2 %4749  ;;  %v4956_v27 = vadd.f32 %v4955_v57, %v4954_v12 }
 0x507   : > { %v4839_v53 = vmul.f32 %v4750_v40, %v8674_v22 }
 0x508   : > { %v4958_v52 = vadd.f32 %v4957_v43, %v4956_v27 }
 0x509   : > { %v4959_v11 = vsel %vm4328_vm3, %v4839_v53, 0.0 }
 0x50a   : > { %v4755_v28 = vpop.permute.xlu0 %4754  ;;  %v4960_v51 = vadd.f32 %v4959_v11, %v4958_v52 }
 0x50b   : > { %v4760_v45 = vpop.permute.xlu1 %4759  ;;  %v4840_v39 = vmul.f32 %v4755_v28, %v8682_v56 }
 0x50c   : > { %v4841_v33 = vmul.f32 %v4760_v45, %v8691_v23 }
 0x50d   : > { %v4961_v17 = vsel %vm4328_vm3, %v4840_v39, 0.0 }
 0x50e   : > { %v4765_v5 = vpop.permute.xlu2 %4764  ;;  %v4963_v3 = vsel %vm4328_vm3, %v4841_v33, 0.0  ;;  %v4962_v9 = vadd.f32 %v4961_v17, %v4960_v51 }
 0x50f   : > { %v4842_v2 = vmul.f32 %v4765_v5, %v8698_v35 }
 0x510   : > { %v4964_v56 = vadd.f32 %v4963_v3, %v4962_v9 }
 0x511   : > { %v4965_v62 = vsel %vm4328_vm3, %v4842_v2, 0.0 }
 0x512   : > { %v4966_v54 = vadd.f32 %v4965_v62, %v4964_v56 }
 0x516   : > { %v4780_v23 = vpop.permute.xlu2 %4779 }
 0x517   : > { %v4845_v6 = vmul.f32 %v4780_v23, %v8733_v48  ;;  %v5119_v48 = vstv %s442_s15 }
 0x518   : > { %v5120_v29 = vmul.f32 %v5119_v48, %v5111_v8 }
 0x519   : > { %v4971_v21 = vsel %vm4328_vm3, %v4845_v6, 0.0 }
 0x51b   : > { %v4770_v47 = vpop.permute.xlu0 %4769 }
 0x51c   : > { %v4843_v22 = vmul.f32 %v4770_v47, %v8706_v38 }
 0x51e   : > { %v4967_v44 = vsel %vm4328_vm3, %v4843_v22, 0.0 }
 0x51f   : > { %v4968_v30 = vadd.f32 %v4967_v44, %v4966_v54 }
 0x523   : > { %v4775_v41 = vpop.permute.xlu1 %4774 }
 0x524   : > { %v4844_v50 = vmul.f32 %v4775_v41, %v8719_v36 }
 0x526   : > { %v4969_v35 = vsel %vm4328_vm3, %v4844_v50, 0.0 }
 0x527   : > { %v4970_v38 = vadd.f32 %v4969_v35, %v4968_v30 }
 0x529   : > { %v4972_v58 = vadd.f32 %v4971_v21, %v4970_v38 }
 0x52b   : > { %v4973_v13 = vrot.slane %v4972_v58, 4 }
 0x52d   : > { %v4974_v60 = vadd.f32 %v4973_v13, %v4972_v58 }
 0x52f   : > { %v4975_v20 = vrot.slane %v4974_v60, 2 }
 0x531   : > { %v4976_v34 = vadd.f32 %v4975_v20, %v4974_v60 }
 0x533   : > { %v4977_v36 = vrot.slane %v4976_v34, 1 }
 0x535   : > { %v4978_v37 = vadd.f32 %v4977_v36, %v4976_v34 }
 0x537   : > { %v5121_v59 = vadd.f32 %v5120_v29, %v4978_v37 }
 0x539   : > { %v5122_v61 = vadd.f32 %v5121_v59, %v5118_v7 }
 0x53b   : > { %5123 = vst.msk [vmem:[#allocation7] sm:$0x1] %vm5116_vm4, %v5122_v61 }
 0x53c   : > { %5726 = dma.vmem_to_hbm [thread:$0]  (%p5731_p11), %s5143_s20, 16, %s5145_s25, [#allocation8]  }
 0x53d   : > { %6396 = dma.done.wait (%p5731_p11), [#allocation6], 16  }
 0x53e   : > { %6398 = vsyncadd (%p5731_p11), [#allocation6], 4294967280 }
 0x53f   : > { %6400 = dma.done.wait (%p5731_p11), [#allocation8], 16  }
 0x540   : > { %6402 = vsyncadd (%p5731_p11), [#allocation8], 4294967280 }
 0x541 PF: > { %s35_s17 = sadd.s32 1, %s6405_s17  }
 0x542   : > { %p32_p12 = scmp.ge.s32.totalorder %s35_s17, 8  }
 0x544   :  { %34 = sbr.rel (!%p32_p12) target bundleno = 9 (0x9), region = 98 }
 0x549   :  { %5163 = vsyncpa [#allocation6], 1 }
 0x54a   :  { %5165 = vsyncpa [#allocation6 + $0x1], 1 }
 0x54b   :  { %5166 = vsyncpa [#allocation8], 1 }

</bundles_post_ra>
